<compile_context>
chip_gen: v6e
topology: v6e:2x2x1
jax: 0.10.0
libtpu: 0.0.40
codegen_flags: <defaults>
</compile_context>

<pallas_src>
import functools

import numpy as np
import jax
import jax.numpy as jnp
from jax import lax
from jax.experimental import pallas as pl
from jax.experimental.pallas import tpu as pltpu


# ----------------------------------------------------------------------------
# Fused DoubleConv kernel (one (batch, row-tile) grid step per invocation)
# ----------------------------------------------------------------------------
def _double_conv_kernel(H, W, TH, slope, ln_eps,
                        x_ref, w1_ref, t1_ref, w2_ref, g2_ref, b2_ref,
                        o_ref, xpad_ref, y1pad_ref):
    # x_ref    : (1, H, W, Cin)       full image, resident across the row tiles
    # w1_ref   : (9*Cin, Cmid)        conv1 weights (BN scale pre-folded), im2col layout
    # t1_ref   : (1, Cmid)            folded BatchNorm shift
    # w2_ref   : (9*Cmid, Cout)       conv2 weights, im2col layout
    # g2_ref   : (1, Cout)            LayerNorm gamma
    # b2_ref   : (1, Cout)            LayerNorm beta
    # o_ref    : (1, TH, W, Cout)     output row tile
    # xpad_ref : (H+4, W+2, Cin)      zero-padded input (2-row / 1-col halo), persistent
    # y1pad_ref: (TH+2, W+2, Cmid)    zero-padded conv2 input tile (1-row halo each side)
    h = pl.program_id(1)
    n_h = pl.num_programs(1)
    Cin = x_ref.shape[-1]
    Cmid = w1_ref.shape[-1]
    Cout = w2_ref.shape[-1]

    # -- once per image: build the zero-padded input copy in VMEM scratch; it
    #    stays resident for the remaining row tiles of this image.
    @pl.when(h == 0)
    def _():
        xpad_ref[...] = jnp.zeros_like(xpad_ref)
        xpad_ref[pl.ds(2, H), pl.ds(1, W), :] = x_ref[0]

    r0 = pl.multiple_of(h * TH, TH)                 # first output row of this tile

    # -- conv1 (+ folded BN + LeakyReLU) over TH+2 rows (1-row halo for conv2),
    #    as a single im2col matmul: ((TH+2)*W, 9*Cin) @ (9*Cin, Cmid)
    win = xpad_ref[pl.ds(r0, TH + 4), :, :]                         # (TH+4, W+2, Cin)
    cols1 = jnp.concatenate(
        [win[kh:kh + TH + 2, kw:kw + W, :]
         for kh in range(3) for kw in range(3)], axis=-1)           # (TH+2, W, 9*Cin)
    y1 = jnp.dot(cols1.reshape((TH + 2) * W, 9 * Cin), w1_ref[...],
                 preferred_element_type=jnp.float32)                # (., Cmid)
    y1 = y1 + t1_ref[...]                                           # BN shift (scale folded)
    y1 = jnp.maximum(y1, slope * y1)                                # LeakyReLU

    # -- zero-padded conv2 input tile; rows outside the image are zero padding
    #    (padding of the activation, NOT conv1 applied to padding).
    y1pad_ref[...] = jnp.zeros_like(y1pad_ref)
    y1pad_ref[pl.ds(0, TH + 2), pl.ds(1, W), :] = y1.reshape(TH + 2, W, Cmid)

    @pl.when(h == 0)
    def _():
        y1pad_ref[0, :, :] = jnp.zeros((W + 2, Cmid), jnp.float32)

    @pl.when(h == n_h - 1)
    def _():
        y1pad_ref[TH + 1, :, :] = jnp.zeros((W + 2, Cmid), jnp.float32)

    # -- conv2 (+ per-pixel LayerNorm over channels + LeakyReLU)
    y1p = y1pad_ref[...]                                            # (TH+2, W+2, Cmid)
    cols2 = jnp.concatenate(
        [y1p[kh:kh + TH, kw:kw + W, :]
         for kh in range(3) for kw in range(3)], axis=-1)           # (TH, W, 9*Cmid)
    y2 = jnp.dot(cols2.reshape(TH * W, 9 * Cmid), w2_ref[...],
                 preferred_element_type=jnp.float32)                # (TH*W, Cout)
    mu = jnp.mean(y2, axis=-1, keepdims=True)
    xc = y2 - mu
    var = jnp.mean(xc * xc, axis=-1, keepdims=True)
    y2 = xc * lax.rsqrt(var + ln_eps) * g2_ref[...] + b2_ref[...]   # LayerNorm([Cout])
    y2 = jnp.maximum(y2, slope * y2)                                # LeakyReLU
    o_ref[0] = y2.reshape(TH, W, Cout).astype(o_ref.dtype)


def _pick_row_tile(H, tile_h):
    """Prefer a sublane-aligned (multiple of 8) row tile that divides H."""
    th = max(1, min(tile_h, H))
    cand = (th // 8) * 8
    while cand >= 8:
        if H % cand == 0:
            return cand
        cand -= 8
    while H % th:
        th -= 1
    return th


def double_conv_pallas(x_nhwc, w1, t1, w2, g2, b2, *,
                       tile_h, slope=0.01, ln_eps=1e-5):
    """x_nhwc: (N, H, W, Cin); w1: (9*Cin, Cmid) with BN scale folded in;
       t1: (1, Cmid) folded BN shift; w2: (9*Cmid, Cout); g2/b2: (1, Cout) LN affine."""
    N, H, W, Cin = x_nhwc.shape
    Cmid = w1.shape[-1]
    Cout = w2.shape[-1]
    th = _pick_row_tile(H, tile_h)
    n_h = H // th

    kernel = functools.partial(_double_conv_kernel, H, W, th, slope, ln_eps)
    return pl.pallas_call(
        kernel,
        out_shape=jax.ShapeDtypeStruct((N, H, W, Cout), jnp.float32),
        grid=(N, n_h),
        in_specs=[
            # full image, index_map independent of h -> stays resident across row tiles
            pl.BlockSpec((1, H, W, Cin), lambda n, h: (n, 0, 0, 0)),
            pl.BlockSpec((9 * Cin, Cmid), lambda n, h: (0, 0)),
            pl.BlockSpec((1, Cmid), lambda n, h: (0, 0)),
            pl.BlockSpec((9 * Cmid, Cout), lambda n, h: (0, 0)),
            pl.BlockSpec((1, Cout), lambda n, h: (0, 0)),
            pl.BlockSpec((1, Cout), lambda n, h: (0, 0)),
        ],
        out_specs=pl.BlockSpec((1, th, W, Cout), lambda n, h: (n, h, 0, 0)),
        scratch_shapes=[
            pltpu.VMEM((H + 4, W + 2, Cin), jnp.float32),     # padded input (per image)
            pltpu.VMEM((th + 2, W + 2, Cmid), jnp.float32),   # padded conv1 output tile
        ],
        compiler_params=pltpu.CompilerParams(
            dimension_semantics=("parallel", "arbitrary")),
    )(x_nhwc, w1, t1, w2, g2, b2)


# ----------------------------------------------------------------------------
# Public wrapper: NCHW in / NCHW out, PyTorch parameter layouts
# ----------------------------------------------------------------------------
def double_conv_forward(x_nchw, w1_oihw, bn_gamma, bn_beta, bn_mean, bn_var,
                        w2_oihw, ln_gamma, ln_beta, *,
                        bn_eps=1e-5, ln_eps=1e-5, slope=0.01, tile_h=8):
    # TODO(synk): BatchNorm is folded in inference mode (running stats); training-mode
    # batch statistics would need an extra cross-(N,H,W) reduction pass.
    x = jnp.transpose(x_nchw, (0, 2, 3, 1)).astype(jnp.float32)      # NHWC
    Cmid, Cin = w1_oihw.shape[0], w1_oihw.shape[1]
    Cout = w2_oihw.shape[0]
    # im2col weight layout: (Co, Ci, kh, kw) -> (kh*3*Ci + kw*Ci + ci, co)
    # (in a real model these folds/reshapes happen once at parameter init, not per call)
    w1 = jnp.transpose(w1_oihw, (2, 3, 1, 0)).reshape(9 * Cin, Cmid).astype(jnp.float32)
    w2 = jnp.transpose(w2_oihw, (2, 3, 1, 0)).reshape(9 * Cmid, Cout).astype(jnp.float32)
    # fold inference BatchNorm: scale goes into the conv1 weights, shift stays separate
    inv = (bn_gamma / jnp.sqrt(bn_var + bn_eps)).astype(jnp.float32)
    w1 = w1 * inv[None, :]
    t1 = (bn_beta - bn_mean * inv)[None, :].astype(jnp.float32)
    g2 = ln_gamma[None, :].astype(jnp.float32)
    b2 = ln_beta[None, :].astype(jnp.float32)
    out = double_conv_pallas(x, w1, t1, w2, g2, b2,
                             tile_h=tile_h, slope=slope, ln_eps=ln_eps)
    return jnp.transpose(out, (0, 3, 1, 2))                          # back to NCHW


# ----------------------------------------------------------------------------
# NumPy reference (matches PyTorch semantics: BN in eval mode, LN over channels)
# ----------------------------------------------------------------------------
def double_conv_ref(x, w1, bn_g, bn_b, bn_m, bn_v, w2, ln_g, ln_b,
                    bn_eps=1e-5, ln_eps=1e-5, slope=0.01):
    def conv3x3(xin, w):                       # NCHW, padding=1, no bias
        N, C, H, W = xin.shape
        xp = np.pad(xin, ((0, 0), (0, 0), (1, 1), (1, 1)))
        out = np.zeros((N, w.shape[0], H, W), np.float32)
        for kh in range(3):
            for kw in range(3):
                out += np.einsum('nchw,oc->nohw',
                                 xp[:, :, kh:kh + H, kw:kw + W], w[:, :, kh, kw])
        return out

    def leaky(v):
        return np.where(v > 0, v, slope * v)

    y = conv3x3(np.asarray(x, np.float32), np.asarray(w1, np.float32))
    y = (y - bn_m[None, :, None, None]) / np.sqrt(bn_v[None, :, None, None] + bn_eps)
    y = y * bn_g[None, :, None, None] + bn_b[None, :, None, None]
    y = leaky(y)
    y = conv3x3(y, np.asarray(w2, np.float32))
    mu = y.mean(axis=1, keepdims=True)
    var = ((y - mu) ** 2).mean(axis=1, keepdims=True)
    y = (y - mu) / np.sqrt(var + ln_eps) * ln_g[None, :, None, None] + ln_b[None, :, None, None]
    return leaky(y)


# ----------------------------------------------------------------------------
if __name__ == "__main__":
    key = jax.random.PRNGKey(0)
    ks = jax.random.split(key, 9)

    N, Cin, Cmid, Cout, H, W = 2, 8, 16, 16, 16, 16

    x = jax.random.normal(ks[0], (N, Cin, H, W), jnp.float32)
    w1 = 0.1 * jax.random.normal(ks[1], (Cmid, Cin, 3, 3), jnp.float32)
    bn_g = 1.0 + 0.1 * jax.random.normal(ks[2], (Cmid,), jnp.float32)
    bn_b = 0.1 * jax.random.normal(ks[3], (Cmid,), jnp.float32)
    bn_m = 0.1 * jax.random.normal(ks[4], (Cmid,), jnp.float32)
    bn_v = 0.5 + jax.random.uniform(ks[5], (Cmid,), jnp.float32)
    w2 = 0.1 * jax.random.normal(ks[6], (Cout, Cmid, 3, 3), jnp.float32)
    ln_g = 1.0 + 0.1 * jax.random.normal(ks[7], (Cout,), jnp.float32)
    ln_b = 0.1 * jax.random.normal(ks[8], (Cout,), jnp.float32)

    # tile_h=8 -> grid (2, 2): sublane-aligned row tiles, 1.25x halo recompute,
    # still multiple grid steps for the auto-pipeline to overlap.
    out = double_conv_forward(x, w1, bn_g, bn_b, bn_m, bn_v, w2, ln_g, ln_b, tile_h=8)
    out = jax.block_until_ready(out)
    assert out.shape == (N, Cout, H, W), out.shape

    ref = double_conv_ref(np.asarray(x), np.asarray(w1), np.asarray(bn_g),
                          np.asarray(bn_b), np.asarray(bn_m), np.asarray(bn_v),
                          np.asarray(w2), np.asarray(ln_g), np.asarray(ln_b))
    # Default MXU precision truncates f32 operands to bf16 (f32 accumulation),
    # so compare against the f32 reference with a correspondingly relaxed tolerance.
    np.testing.assert_allclose(np.asarray(out), ref, rtol=3e-2, atol=3e-2)

    print("KERNEL_OK")
</pallas_src>

<mosaic_0001>
module attributes {stable_mosaic.version = 11 : i64} {
  func.func @_double_conv_kernel(%arg0: i32, %arg1: i32, %arg2: memref<1x16x16x8xf32, #tpu.memory_space<vmem>>, %arg3: memref<72x16xf32, #tpu.memory_space<vmem>>, %arg4: memref<1x16xf32, #tpu.memory_space<vmem>>, %arg5: memref<144x16xf32, #tpu.memory_space<vmem>>, %arg6: memref<1x16xf32, #tpu.memory_space<vmem>>, %arg7: memref<1x16xf32, #tpu.memory_space<vmem>>, %arg8: memref<1x8x16x16xf32, #tpu.memory_space<vmem>>, %arg9: memref<20x18x8xf32, #tpu.memory_space<vmem>>, %arg10: memref<10x18x16xf32, #tpu.memory_space<vmem>>) attributes {dimension_semantics = [#tpu.dimension_semantics<parallel>, #tpu.dimension_semantics<arbitrary>], iteration_bounds = array<i64: 2, 2>, scalar_prefetch = 0 : i64, scratch_operands = 2 : i64, tpu.core_type = #tpu.core_type<tc>, window_params = [{transform_indices = @transform_0, window_bounds = array<i64: 1, 16, 16, 8>}, {pipeline_mode = #tpu.pipeline_mode<synchronous>, transform_indices = @transform_1, window_bounds = array<i64: 72, 16>}, {pipeline_mode = #tpu.pipeline_mode<synchronous>, transform_indices = @transform_2, window_bounds = array<i64: 1, 16>}, {pipeline_mode = #tpu.pipeline_mode<synchronous>, transform_indices = @transform_3, window_bounds = array<i64: 144, 16>}, {pipeline_mode = #tpu.pipeline_mode<synchronous>, transform_indices = @transform_4, window_bounds = array<i64: 1, 16>}, {pipeline_mode = #tpu.pipeline_mode<synchronous>, transform_indices = @transform_5, window_bounds = array<i64: 1, 16>}, {transform_indices = @transform_6, window_bounds = array<i64: 1, 8, 16, 16>}]} {
    %c0_i32 = arith.constant 0 : i32
    %0 = arith.cmpi eq, %arg1, %c0_i32 : i32
    %1 = arith.extui %0 : i1 to i32
    %c0_i32_0 = arith.constant 0 : i32
    %2 = arith.cmpi ne, %1, %c0_i32_0 : i32
    scf.if %2 {
      %cst_36 = arith.constant 0.000000e+00 : f32
      %79 = vector.broadcast %cst_36 : f32 to vector<20x18x8xf32>
      %c0_37 = arith.constant 0 : index
      %c0_38 = arith.constant 0 : index
      %c0_39 = arith.constant 0 : index
      %80 = vector.load %arg9[%c0_37, %c0_38, %c0_39] : memref<20x18x8xf32, #tpu.memory_space<vmem>>, vector<20x18x8xf32>
      tpu.vector_store %arg9[%c0_37, %c0_38, %c0_39], %79 {strides = array<i32>} : memref<20x18x8xf32, #tpu.memory_space<vmem>>, vector<20x18x8xf32>,
      %c0_40 = arith.constant 0 : index
      %c0_41 = arith.constant 0 : index
      %c0_42 = arith.constant 0 : index
      %c0_43 = arith.constant 0 : index
      %81 = vector.load %arg2[%c0_40, %c0_41, %c0_42, %c0_43] : memref<1x16x16x8xf32, #tpu.memory_space<vmem>>, vector<1x16x16x8xf32>
      %82 = vector.shape_cast %81 : vector<1x16x16x8xf32> to vector<16x16x8xf32>
      %c2 = arith.constant 2 : index
      %c1_44 = arith.constant 1 : index
      %c0_45 = arith.constant 0 : index
      %83 = vector.load %arg9[%c2, %c1_44, %c0_45] : memref<20x18x8xf32, #tpu.memory_space<vmem>>, vector<16x16x8xf32>
      tpu.vector_store %arg9[%c2, %c1_44, %c0_45], %82 {strides = array<i32>} : memref<20x18x8xf32, #tpu.memory_space<vmem>>, vector<16x16x8xf32>,
    } else {
    }
    %c8_i32 = arith.constant 8 : i32
    %3 = arith.muli %arg1, %c8_i32 : i32
    %4 = tpu.assume_multiple %3, 8 : i32
    %5 = arith.index_cast %4 : i32 to index
    %c0 = arith.constant 0 : index
    %c0_1 = arith.constant 0 : index
    %6 = vector.load %arg9[%5, %c0, %c0_1] : memref<20x18x8xf32, #tpu.memory_space<vmem>>, vector<12x18x8xf32>
    %7 = vector.extract_strided_slice %6 {offsets = [0, 0, 0], sizes = [10, 16, 8], strides = [1, 1, 1]} : vector<12x18x8xf32> to vector<10x16x8xf32>
    %8 = vector.extract_strided_slice %6 {offsets = [0, 1, 0], sizes = [10, 16, 8], strides = [1, 1, 1]} : vector<12x18x8xf32> to vector<10x16x8xf32>
    %9 = vector.extract_strided_slice %6 {offsets = [0, 2, 0], sizes = [10, 16, 8], strides = [1, 1, 1]} : vector<12x18x8xf32> to vector<10x16x8xf32>
    %10 = vector.extract_strided_slice %6 {offsets = [1, 0, 0], sizes = [10, 16, 8], strides = [1, 1, 1]} : vector<12x18x8xf32> to vector<10x16x8xf32>
    %11 = vector.extract_strided_slice %6 {offsets = [1, 1, 0], sizes = [10, 16, 8], strides = [1, 1, 1]} : vector<12x18x8xf32> to vector<10x16x8xf32>
    %12 = vector.extract_strided_slice %6 {offsets = [1, 2, 0], sizes = [10, 16, 8], strides = [1, 1, 1]} : vector<12x18x8xf32> to vector<10x16x8xf32>
    %13 = vector.extract_strided_slice %6 {offsets = [2, 0, 0], sizes = [10, 16, 8], strides = [1, 1, 1]} : vector<12x18x8xf32> to vector<10x16x8xf32>
    %14 = vector.extract_strided_slice %6 {offsets = [2, 1, 0], sizes = [10, 16, 8], strides = [1, 1, 1]} : vector<12x18x8xf32> to vector<10x16x8xf32>
    %15 = vector.extract_strided_slice %6 {offsets = [2, 2, 0], sizes = [10, 16, 8], strides = [1, 1, 1]} : vector<12x18x8xf32> to vector<10x16x8xf32>
    %16 = tpu.concatenate %7, %8, %9, %10, %11, %12, %13, %14, %15 in 2 : vector<10x16x8xf32>, vector<10x16x8xf32>, vector<10x16x8xf32>, vector<10x16x8xf32>, vector<10x16x8xf32>, vector<10x16x8xf32>, vector<10x16x8xf32>, vector<10x16x8xf32>, vector<10x16x8xf32> -> vector<10x16x72xf32>
    %17 = vector.shape_cast %16 : vector<10x16x72xf32> to vector<160x72xf32>
    %c0_2 = arith.constant 0 : index
    %c0_3 = arith.constant 0 : index
    %18 = vector.load %arg3[%c0_2, %c0_3] : memref<72x16xf32, #tpu.memory_space<vmem>>, vector<72x16xf32>
    %cst = arith.constant dense<0.000000e+00> : vector<160x16xf32>
    %19 = tpu.matmul %17, %18, %cst {dimension_numbers = #tpu.dot_dimension_numbers<[1], [0], [0], [1], [0, 0, 1, 1], [], []>} : vector<160x72xf32>, vector<72x16xf32>, vector<160x16xf32> -> vector<160x16xf32>
    %c0_4 = arith.constant 0 : index
    %c0_5 = arith.constant 0 : index
    %20 = vector.load %arg4[%c0_4, %c0_5] : memref<1x16xf32, #tpu.memory_space<vmem>>, vector<1x16xf32>
    %21 = vector.broadcast %20 : vector<1x16xf32> to vector<160x16xf32>
    %22 = arith.addf %19, %21 : vector<160x16xf32>
    %cst_6 = arith.constant 0.00999999977 : f32
    %23 = vector.broadcast %cst_6 : f32 to vector<160x16xf32>
    %24 = arith.mulf %23, %22 : vector<160x16xf32>
    %25 = arith.maximumf %22, %24 : vector<160x16xf32>
    %cst_7 = arith.constant 0.000000e+00 : f32
    %26 = vector.broadcast %cst_7 : f32 to vector<10x18x16xf32>
    %c0_8 = arith.constant 0 : index
    %c0_9 = arith.constant 0 : index
    %c0_10 = arith.constant 0 : index
    %27 = vector.load %arg10[%c0_8, %c0_9, %c0_10] : memref<10x18x16xf32, #tpu.memory_space<vmem>>, vector<10x18x16xf32>
    tpu.vector_store %arg10[%c0_8, %c0_9, %c0_10], %26 {strides = array<i32>} : memref<10x18x16xf32, #tpu.memory_space<vmem>>, vector<10x18x16xf32>,
    %28 = vector.shape_cast %25 : vector<160x16xf32> to vector<10x16x16xf32>
    %c0_11 = arith.constant 0 : index
    %c1 = arith.constant 1 : index
    %c0_12 = arith.constant 0 : index
    %29 = vector.load %arg10[%c0_11, %c1, %c0_12] : memref<10x18x16xf32, #tpu.memory_space<vmem>>, vector<10x16x16xf32>
    tpu.vector_store %arg10[%c0_11, %c1, %c0_12], %28 {strides = array<i32>} : memref<10x18x16xf32, #tpu.memory_space<vmem>>, vector<10x16x16xf32>,
    %c0_i32_13 = arith.constant 0 : i32
    %30 = arith.cmpi eq, %arg1, %c0_i32_13 : i32
    %31 = arith.extui %30 : i1 to i32
    %c0_i32_14 = arith.constant 0 : i32
    %32 = arith.cmpi ne, %31, %c0_i32_14 : i32
    scf.if %32 {
      %cst_36 = arith.constant 0.000000e+00 : f32
      %79 = vector.broadcast %cst_36 : f32 to vector<18x16xf32>
      %c0_37 = arith.constant 0 : index
      %c0_38 = arith.constant 0 : index
      %c0_39 = arith.constant 0 : index
      %80 = vector.load %arg10[%c0_37, %c0_38, %c0_39] : memref<10x18x16xf32, #tpu.memory_space<vmem>>, vector<1x18x16xf32>
      %81 = vector.shape_cast %80 : vector<1x18x16xf32> to vector<18x16xf32>
      %82 = vector.shape_cast %79 : vector<18x16xf32> to vector<1x18x16xf32>
      tpu.vector_store %arg10[%c0_37, %c0_38, %c0_39], %82 {strides = array<i32>} : memref<10x18x16xf32, #tpu.memory_space<vmem>>, vector<1x18x16xf32>,
    } else {
    }
    %c1_i32 = arith.constant 1 : i32
    %33 = arith.cmpi eq, %arg1, %c1_i32 : i32
    %34 = arith.extui %33 : i1 to i32
    %c0_i32_15 = arith.constant 0 : i32
    %35 = arith.cmpi ne, %34, %c0_i32_15 : i32
    scf.if %35 {
      %cst_36 = arith.constant 0.000000e+00 : f32
      %79 = vector.broadcast %cst_36 : f32 to vector<18x16xf32>
      %c9 = arith.constant 9 : index
      %c0_37 = arith.constant 0 : index
      %c0_38 = arith.constant 0 : index
      %80 = vector.load %arg10[%c9, %c0_37, %c0_38] : memref<10x18x16xf32, #tpu.memory_space<vmem>>, vector<1x18x16xf32>
      %81 = vector.shape_cast %80 : vector<1x18x16xf32> to vector<18x16xf32>
      %82 = vector.shape_cast %79 : vector<18x16xf32> to vector<1x18x16xf32>
      tpu.vector_store %arg10[%c9, %c0_37, %c0_38], %82 {strides = array<i32>} : memref<10x18x16xf32, #tpu.memory_space<vmem>>, vector<1x18x16xf32>,
    } else {
    }
    %c0_16 = arith.constant 0 : index
    %c0_17 = arith.constant 0 : index
    %c0_18 = arith.constant 0 : index
    %36 = vector.load %arg10[%c0_16, %c0_17, %c0_18] : memref<10x18x16xf32, #tpu.memory_space<vmem>>, vector<10x18x16xf32>
    %37 = vector.extract_strided_slice %36 {offsets = [0, 0, 0], sizes = [8, 16, 16], strides = [1, 1, 1]} : vector<10x18x16xf32> to vector<8x16x16xf32>
    %38 = vector.extract_strided_slice %36 {offsets = [0, 1, 0], sizes = [8, 16, 16], strides = [1, 1, 1]} : vector<10x18x16xf32> to vector<8x16x16xf32>
    %39 = vector.extract_strided_slice %36 {offsets = [0, 2, 0], sizes = [8, 16, 16], strides = [1, 1, 1]} : vector<10x18x16xf32> to vector<8x16x16xf32>
    %40 = vector.extract_strided_slice %36 {offsets = [1, 0, 0], sizes = [8, 16, 16], strides = [1, 1, 1]} : vector<10x18x16xf32> to vector<8x16x16xf32>
    %41 = vector.extract_strided_slice %36 {offsets = [1, 1, 0], sizes = [8, 16, 16], strides = [1, 1, 1]} : vector<10x18x16xf32> to vector<8x16x16xf32>
    %42 = vector.extract_strided_slice %36 {offsets = [1, 2, 0], sizes = [8, 16, 16], strides = [1, 1, 1]} : vector<10x18x16xf32> to vector<8x16x16xf32>
    %43 = vector.extract_strided_slice %36 {offsets = [2, 0, 0], sizes = [8, 16, 16], strides = [1, 1, 1]} : vector<10x18x16xf32> to vector<8x16x16xf32>
    %44 = vector.extract_strided_slice %36 {offsets = [2, 1, 0], sizes = [8, 16, 16], strides = [1, 1, 1]} : vector<10x18x16xf32> to vector<8x16x16xf32>
    %45 = vector.extract_strided_slice %36 {offsets = [2, 2, 0], sizes = [8, 16, 16], strides = [1, 1, 1]} : vector<10x18x16xf32> to vector<8x16x16xf32>
    %46 = tpu.concatenate %37, %38, %39, %40, %41, %42, %43, %44, %45 in 2 : vector<8x16x16xf32>, vector<8x16x16xf32>, vector<8x16x16xf32>, vector<8x16x16xf32>, vector<8x16x16xf32>, vector<8x16x16xf32>, vector<8x16x16xf32>, vector<8x16x16xf32>, vector<8x16x16xf32> -> vector<8x16x144xf32>
    %47 = vector.shape_cast %46 : vector<8x16x144xf32> to vector<128x144xf32>
    %c0_19 = arith.constant 0 : index
    %c0_20 = arith.constant 0 : index
    %48 = vector.load %arg5[%c0_19, %c0_20] : memref<144x16xf32, #tpu.memory_space<vmem>>, vector<144x16xf32>
    %cst_21 = arith.constant dense<0.000000e+00> : vector<128x16xf32>
    %49 = tpu.matmul %47, %48, %cst_21 {dimension_numbers = #tpu.dot_dimension_numbers<[1], [0], [0], [1], [0, 0, 1, 1], [], []>} : vector<128x144xf32>, vector<144x16xf32>, vector<128x16xf32> -> vector<128x16xf32>
    %cst_22 = arith.constant dense<0.000000e+00> : vector<128xf32>
    %50 = vector.multi_reduction <add>, %49, %cst_22 [1] : vector<128x16xf32> to vector<128xf32>
    %51 = vector.shape_cast %50 : vector<128xf32> to vector<128x1xf32>
    %cst_23 = arith.constant 1.600000e+01 : f32
    %52 = vector.broadcast %cst_23 : f32 to vector<128x1xf32>
    %53 = arith.divf %51, %52 : vector<128x1xf32>
    %54 = vector.broadcast %53 : vector<128x1xf32> to vector<128x16xf32>
    %55 = arith.subf %49, %54 : vector<128x16xf32>
    %56 = arith.mulf %55, %55 : vector<128x16xf32>
    %cst_24 = arith.constant dense<0.000000e+00> : vector<128xf32>
    %57 = vector.multi_reduction <add>, %56, %cst_24 [1] : vector<128x16xf32> to vector<128xf32>
    %58 = vector.shape_cast %57 : vector<128xf32> to vector<128x1xf32>
    %cst_25 = arith.constant 1.600000e+01 : f32
    %59 = vector.broadcast %cst_25 : f32 to vector<128x1xf32>
    %60 = arith.divf %58, %59 : vector<128x1xf32>
    %cst_26 = arith.constant 9.99999974E-6 : f32
    %61 = vector.broadcast %cst_26 : f32 to vector<128x1xf32>
    %62 = arith.addf %60, %61 : vector<128x1xf32>
    %63 = math.rsqrt %62 : vector<128x1xf32>
    %64 = vector.broadcast %63 : vector<128x1xf32> to vector<128x16xf32>
    %65 = arith.mulf %55, %64 : vector<128x16xf32>
    %c0_27 = arith.constant 0 : index
    %c0_28 = arith.constant 0 : index
    %66 = vector.load %arg6[%c0_27, %c0_28] : memref<1x16xf32, #tpu.memory_space<vmem>>, vector<1x16xf32>
    %67 = vector.broadcast %66 : vector<1x16xf32> to vector<128x16xf32>
    %68 = arith.mulf %65, %67 : vector<128x16xf32>
    %c0_29 = arith.constant 0 : index
    %c0_30 = arith.constant 0 : index
    %69 = vector.load %arg7[%c0_29, %c0_30] : memref<1x16xf32, #tpu.memory_space<vmem>>, vector<1x16xf32>
    %70 = vector.broadcast %69 : vector<1x16xf32> to vector<128x16xf32>
    %71 = arith.addf %68, %70 : vector<128x16xf32>
    %cst_31 = arith.constant 0.00999999977 : f32
    %72 = vector.broadcast %cst_31 : f32 to vector<128x16xf32>
    %73 = arith.mulf %72, %71 : vector<128x16xf32>
    %74 = arith.maximumf %71, %73 : vector<128x16xf32>
    %75 = vector.shape_cast %74 : vector<128x16xf32> to vector<8x16x16xf32>
    %c0_32 = arith.constant 0 : index
    %c0_33 = arith.constant 0 : index
    %c0_34 = arith.constant 0 : index
    %c0_35 = arith.constant 0 : index
    %76 = vector.load %arg8[%c0_32, %c0_33, %c0_34, %c0_35] : memref<1x8x16x16xf32, #tpu.memory_space<vmem>>, vector<1x8x16x16xf32>
    %77 = vector.shape_cast %76 : vector<1x8x16x16xf32> to vector<8x16x16xf32>
    %78 = vector.shape_cast %75 : vector<8x16x16xf32> to vector<1x8x16x16xf32>
    tpu.vector_store %arg8[%c0_32, %c0_33, %c0_34, %c0_35], %78 {strides = array<i32>} : memref<1x8x16x16xf32, #tpu.memory_space<vmem>>, vector<1x8x16x16xf32>,
    return
  }
  func.func @transform_0(%arg0: i32, %arg1: i32) -> (i32, i32, i32, i32) {
    %c0_i32 = arith.constant 0 : i32
    %c0_i32_0 = arith.constant 0 : i32
    %c0_i32_1 = arith.constant 0 : i32
    %c0_i32_2 = arith.constant 0 : i32
    return %arg0, %c0_i32, %c0_i32_0, %c0_i32_1 : i32, i32, i32, i32
  }
  func.func @transform_1(%arg0: i32, %arg1: i32) -> (i32, i32) {
    %c0_i32 = arith.constant 0 : i32
    %c0_i32_0 = arith.constant 0 : i32
    %c0_i32_1 = arith.constant 0 : i32
    return %c0_i32, %c0_i32_0 : i32, i32
  }
  func.func @transform_2(%arg0: i32, %arg1: i32) -> (i32, i32) {
    %c0_i32 = arith.constant 0 : i32
    %c0_i32_0 = arith.constant 0 : i32
    %c0_i32_1 = arith.constant 0 : i32
    return %c0_i32, %c0_i32_0 : i32, i32
  }
  func.func @transform_3(%arg0: i32, %arg1: i32) -> (i32, i32) {
    %c0_i32 = arith.constant 0 : i32
    %c0_i32_0 = arith.constant 0 : i32
    %c0_i32_1 = arith.constant 0 : i32
    return %c0_i32, %c0_i32_0 : i32, i32
  }
  func.func @transform_4(%arg0: i32, %arg1: i32) -> (i32, i32) {
    %c0_i32 = arith.constant 0 : i32
    %c0_i32_0 = arith.constant 0 : i32
    %c0_i32_1 = arith.constant 0 : i32
    return %c0_i32, %c0_i32_0 : i32, i32
  }
  func.func @transform_5(%arg0: i32, %arg1: i32) -> (i32, i32) {
    %c0_i32 = arith.constant 0 : i32
    %c0_i32_0 = arith.constant 0 : i32
    %c0_i32_1 = arith.constant 0 : i32
    return %c0_i32, %c0_i32_0 : i32, i32
  }
  func.func @transform_6(%arg0: i32, %arg1: i32) -> (i32, i32, i32, i32) {
    %c0_i32 = arith.constant 0 : i32
    %c0_i32_0 = arith.constant 0 : i32
    %c0_i32_1 = arith.constant 0 : i32
    return %arg0, %arg1, %c0_i32, %c0_i32_0 : i32, i32, i32, i32
  }
}

</mosaic_0001>

<bundles_post_ra>
// kernel: tpu_custom_call.1
= control target key start
LH: loop header
LB: loop body
LE: loop exit
PB: predicated region body
PF: predicated region fallthrough
CT: control target
= control target key end

     0   :  { %11 = vsyncpa [#allocation5], 0  ;;  %s5539_s0 = inlined_call_operand.vmem [shape: f32[2,16,16,8], index: 0, kind: input, shape index: {}]   ;;  %s5540_s1 = inlined_call_operand.vmem [shape: f32[72,16], index: 1, kind: input, shape index: {}]   ;;  %s5541_s2 = inlined_call_operand.vmem [shape: f32[1,16], index: 2, kind: input, shape index: {}]   ;;  %s5542_s3 = inlined_call_operand.vmem [shape: f32[144,16], index: 3, kind: input, shape index: {}]   ;;  %s5543_s4 = inlined_call_operand.vmem [shape: f32[1,16], index: 4, kind: input, shape index: {}]   ;;  %s5544_s5 = inlined_call_operand.vmem [shape: f32[1,16], index: 5, kind: input, shape index: {}]   ;;  %s5545_s6 = inlined_call_operand.hbm [shape: f32[2,16,16,16], index: 6, kind: output, shape index: {}]  }
   0x1   :  { %13 = vsyncpa [#allocation5 + $0x1], 0  ;;  %s3511_s21 = smov 0   ;;  %s3513_s22 = smov 0  }
   0x2   :  { %s3515_s23 = smov 0   ;;  %s3517_s24 = smov 0  }
   0x3   :  { %s3519_s25 = smov 0   ;;  %s3521_s26 = smov 0  }
   0x4   :  { %s3523_s27 = smov 0   ;;  %s3525_s28 = smov 0  }
   0x5 LB: > { %s2792_s29 = sadd.s32 4294967295, %s3457_s28   ;;  %s2793_s30 = sadd.s32 4294967294, %s3457_s28   ;;  %s3457_s28 = sphi %s3525_s28, %s19_s28   ;;  %s3453_s27 = sphi %s3523_s27, %s5577_s27   ;;  %s3449_s26 = sphi %s3521_s26, %s5576_s26   ;;  %s3445_s25 = sphi %s3519_s25, %s5575_s25   ;;  %s3441_s24 = sphi %s3517_s24, %s5574_s24   ;;  %s3437_s23 = sphi %s3515_s23, %s5573_s23   ;;  %s3433_s22 = sphi %s3513_s22, %s5572_s22   ;;  %s3429_s21 = sphi %s3511_s21, %s5571_s21  }
   0x6   : > { %s28_s7 = sadd.s32 1, %s3449_s26  ;;  %s31_s8 = sadd.s32 1, %s3453_s27 }
   0x7   : > { %p29_p0 = scmp.ge.s32.totalorder %s28_s7, 2  ;;  %p181_p1 = scmp.ne.s32.totalorder %s3437_s23, %s3433_s22 }
   0x8   : > { %p182_p2 = scmp.eq.s32.totalorder %s2792_s29, 3  ;;  %p187_p5 = scmp.ne.s32.totalorder %s3433_s22, %s3429_s21 }
   0x9   : > { %s5579_s7 = smov (%p29_p0, %s28_s7), 0  ;;  %s5581_s8 = smov (!%p29_p0, %s31_s8), %s3453_s27 }
   0xa   : > { %s167_s9 = ssub.s32 %s3449_s26, %s5579_s7  ;;  %p3562_p3 = por %p182_p2, %p181_p1 }
   0xb   : > { %p33_p4 = scmp.ge.s32.totalorder %s5581_s8, 2  ;;  %p188_p6 = scmp.eq.s32.totalorder %s2793_s30, 3 }
   0xc   : > { %p2796_p7 = scmp.ge.s32.totalorder %s3457_s28, 1  ;;  %p229_p9 = scmp.lt.s32.totalorder %s3457_s28, 5 }
   0xd   : > { %s5583_s8 = smov (%p33_p4, %s5581_s8), 0  ;;  %p3571_p8 = por %p188_p6, %p187_p5 }
   0xe   : > { %s166_s12 = ssub.s32 %s3453_s27, %s5583_s8  ;;  %s171_s13 = sadd.s32 1, %s3437_s23 }
   0xf   : > { %s168_s14 = sor.u32 %s167_s9, %s166_s12  ;;  %p230_p10 = pnand %p2796_p7, %p229_p9 }
  0x10   : > { %p169_p11 = scmp.eq.s32.totalorder %s168_s14, 0  ;;  %s5546_s16 = sand.u32 (!%p230_p10), 1, %s3433_s22  }
  0x11   : > { %233 = sbr.rel (%p230_p10) target bundleno = 1499 (0x5db), region = 44  ;;  %p259_p12 = scmp.lt.s32.totalorder (!%p230_p10), %s3445_s25, 1 }
  0x12   : > { %s3580_s15 = scalar_select %p169_p11, %s3437_s23, %s171_s13  }
  0x13   : > { %s2797_s17 = sshll.u32 (!%p230_p10), %s5546_s16, 7  ;;  %p2800_p13 = scmp.ne.s32.totalorder (!%p230_p10), %s3441_s24, 0 }
  0x14   : > { %s3592_s9 = scalar_lea.vmem (!%p230_p10), [#allocation4], %s2797_s17 }
  0x16   : > { %s260_s18 = scalar_select %p259_p12, %s3445_s25, 1 }
  0x17   : > { %268 = sbr.rel (%p2800_p13) target bundleno = 75 (0x4b), region = 48 }
  0x18   : > { %s2851_s19 = sshll.u32 %s260_s18, 8 }
  0x19   : > { %s3590_s30 = scalar_lea.vmem %s5539_s0, %s2851_s19 }
  0x1c   : > { %vm269_vm0 = vcmask 64512   ;;  %vm272_vm1 = vcmask 58368   ;;  %v3598_v0 = vld [vmem:[%s3590_s30] sm:$0xff]  ;;  %v3601_v1 = vld [vmem:[%s3590_s30 + $0x8] sm:$0xff]  ;;  %v3604_v2 = vld [vmem:[%s3590_s30 + $0x10] sm:$0xff]  ;;  %v3459_v3 = vmov 0.0  }
  0x1d   : > { %277 = vst.msk [vmem:[#allocation2 + $0x30] sm:$0xff] %vm269_vm0, %v3459_v3  ;;  %270 = vst.msk [vmem:[#allocation2] sm:$0xff] %vm269_vm0, %v3459_v3  ;;  %v334_v4 = vld [vmem:[%s3590_s30 + $0x18] sm:$0xff]  ;;  %v335_v5 = vld [vmem:[%s3590_s30 + $0x20] sm:$0xff] }
  0x1e   : > { %271 = vst.msk [vmem:[#allocation2 + $0x8] sm:$0xff] %vm269_vm0, %v3459_v3  ;;  %274 = vst.msk [vmem:[#allocation2 + $0x18] sm:$0xff] %vm269_vm0, %v3459_v3  ;;  %v336_v6 = vld [vmem:[%s3590_s30 + $0x28] sm:$0xff]  ;;  %v337_v7 = vld [vmem:[%s3590_s30 + $0x30] sm:$0xff] }
  0x1f   : > { %275 = vst.msk [vmem:[#allocation2 + $0x20] sm:$0xff] %vm269_vm0, %v3459_v3  ;;  %278 = vst.msk [vmem:[#allocation2 + $0x38] sm:$0xff] %vm269_vm0, %v3459_v3  ;;  %v338_v8 = vld [vmem:[%s3590_s30 + $0x38] sm:$0xff]  ;;  %v339_v9 = vld [vmem:[%s3590_s30 + $0x40] sm:$0xff] }
  0x20   : > { %280 = vst.msk [vmem:[#allocation2 + $0x48] sm:$0xff] %vm269_vm0, %v3459_v3  ;;  %281 = vst.msk [vmem:[#allocation2 + $0x50] sm:$0xff] %vm269_vm0, %v3459_v3  ;;  %v340_v10 = vld [vmem:[%s3590_s30 + $0x48] sm:$0xff]  ;;  %v341_v11 = vld [vmem:[%s3590_s30 + $0x50] sm:$0xff] }
  0x21   : > { %283 = vst.msk [vmem:[#allocation2 + $0x60] sm:$0xff] %vm269_vm0, %v3459_v3  ;;  %284 = vst.msk [vmem:[#allocation2 + $0x68] sm:$0xff] %vm269_vm0, %v3459_v3  ;;  %v342_v12 = vld [vmem:[%s3590_s30 + $0x58] sm:$0xff]  ;;  %v343_v13 = vld [vmem:[%s3590_s30 + $0x60] sm:$0xff] }
  0x22   : > { %286 = vst.msk [vmem:[#allocation2 + $0x78] sm:$0xff] %vm269_vm0, %v3459_v3  ;;  %287 = vst.msk [vmem:[#allocation2 + $0x80] sm:$0xff] %vm269_vm0, %v3459_v3  ;;  %v344_v14 = vld [vmem:[%s3590_s30 + $0x68] sm:$0xff]  ;;  %v345_v15 = vld [vmem:[%s3590_s30 + $0x70] sm:$0xff] }
  0x23   : > { %289 = vst.msk [vmem:[#allocation2 + $0x90] sm:$0xff] %vm269_vm0, %v3459_v3  ;;  %290 = vst.msk [vmem:[#allocation2 + $0x98] sm:$0xff] %vm269_vm0, %v3459_v3  ;;  %v346_v16 = vld [vmem:[%s3590_s30 + $0x78] sm:$0xff]  ;;  %v347_v17 = vld [vmem:[%s3590_s30 + $0x80] sm:$0xff] }
  0x24   : > { %292 = vst.msk [vmem:[#allocation2 + $0xa8] sm:$0xff] %vm269_vm0, %v3459_v3  ;;  %293 = vst.msk [vmem:[#allocation2 + $0xb0] sm:$0xff] %vm269_vm0, %v3459_v3  ;;  %v348_v18 = vld [vmem:[%s3590_s30 + $0x88] sm:$0xff]  ;;  %v349_v19 = vld [vmem:[%s3590_s30 + $0x90] sm:$0xff] }
  0x25   : > { %295 = vst.msk [vmem:[#allocation2 + $0xc0] sm:$0xff] %vm269_vm0, %v3459_v3  ;;  %296 = vst.msk [vmem:[#allocation2 + $0xc8] sm:$0xff] %vm269_vm0, %v3459_v3  ;;  %v350_v20 = vld [vmem:[%s3590_s30 + $0x98] sm:$0xff]  ;;  %v351_v21 = vld [vmem:[%s3590_s30 + $0xa0] sm:$0xff] }
  0x26   : > { %298 = vst.msk [vmem:[#allocation2 + $0xd8] sm:$0xff] %vm269_vm0, %v3459_v3  ;;  %299 = vst.msk [vmem:[#allocation2 + $0xe0] sm:$0xff] %vm269_vm0, %v3459_v3  ;;  %v352_v22 = vld [vmem:[%s3590_s30 + $0xa8] sm:$0xff]  ;;  %v353_v23 = vld [vmem:[%s3590_s30 + $0xb0] sm:$0xff] }
  0x27   : > { %301 = vst.msk [vmem:[#allocation2 + $0xf0] sm:$0xff] %vm269_vm0, %v3459_v3  ;;  %302 = vst.msk [vmem:[#allocation2 + $0xf8] sm:$0xff] %vm269_vm0, %v3459_v3  ;;  %v354_v24 = vld [vmem:[%s3590_s30 + $0xb8] sm:$0xff]  ;;  %v355_v25 = vld [vmem:[%s3590_s30 + $0xc0] sm:$0xff] }
  0x28   : > { %304 = vst.msk [vmem:[#allocation2 + $0x108] sm:$0xff] %vm269_vm0, %v3459_v3  ;;  %305 = vst.msk [vmem:[#allocation2 + $0x110] sm:$0xff] %vm269_vm0, %v3459_v3  ;;  %v356_v26 = vld [vmem:[%s3590_s30 + $0xc8] sm:$0xff]  ;;  %v357_v27 = vld [vmem:[%s3590_s30 + $0xd0] sm:$0xff] }
  0x29   : > { %307 = vst.msk [vmem:[#allocation2 + $0x120] sm:$0xff] %vm269_vm0, %v3459_v3  ;;  %308 = vst.msk [vmem:[#allocation2 + $0x128] sm:$0xff] %vm269_vm0, %v3459_v3  ;;  %v358_v28 = vld [vmem:[%s3590_s30 + $0xd8] sm:$0xff]  ;;  %v359_v29 = vld [vmem:[%s3590_s30 + $0xe0] sm:$0xff] }
  0x2a   : > { %310 = vst.msk [vmem:[#allocation2 + $0x138] sm:$0xff] %vm269_vm0, %v3459_v3  ;;  %311 = vst.msk [vmem:[#allocation2 + $0x140] sm:$0xff] %vm269_vm0, %v3459_v3  ;;  %v360_v30 = vld [vmem:[%s3590_s30 + $0xe8] sm:$0xff]  ;;  %v361_v31 = vld [vmem:[%s3590_s30 + $0xf0] sm:$0xff] }
  0x2b   : > { %313 = vst.msk [vmem:[#allocation2 + $0x150] sm:$0xff] %vm269_vm0, %v3459_v3  ;;  %314 = vst.msk [vmem:[#allocation2 + $0x158] sm:$0xff] %vm269_vm0, %v3459_v3  ;;  %v362_v32 = vld [vmem:[%s3590_s30 + $0xf8] sm:$0xff] }
  0x2c   : > { %316 = vst.msk [vmem:[#allocation2 + $0x168] sm:$0xff] %vm269_vm0, %v3459_v3  ;;  %317 = vst.msk [vmem:[#allocation2 + $0x170] sm:$0xff] %vm269_vm0, %v3459_v3 }
  0x2d   : > { %319 = vst.msk [vmem:[#allocation2 + $0x180] sm:$0xff] %vm269_vm0, %v3459_v3  ;;  %320 = vst.msk [vmem:[#allocation2 + $0x188] sm:$0xff] %vm269_vm0, %v3459_v3 }
  0x2e   : > { %322 = vst.msk [vmem:[#allocation2 + $0x198] sm:$0xff] %vm269_vm0, %v3459_v3  ;;  %323 = vst.msk [vmem:[#allocation2 + $0x1a0] sm:$0xff] %vm269_vm0, %v3459_v3 }
  0x2f   : > { %325 = vst.msk [vmem:[#allocation2 + $0x1b0] sm:$0xff] %vm269_vm0, %v3459_v3  ;;  %326 = vst.msk [vmem:[#allocation2 + $0x1b8] sm:$0xff] %vm269_vm0, %v3459_v3 }
  0x30   : > { %328 = vst.msk [vmem:[#allocation2 + $0x1c8] sm:$0xff] %vm269_vm0, %v3459_v3  ;;  %329 = vst.msk [vmem:[#allocation2 + $0x1d0] sm:$0xff] %vm269_vm0, %v3459_v3 }
  0x31   : > { %279 = vst.msk [vmem:[#allocation2 + $0x40] sm:$0x3] %vm272_vm1, %v3459_v3  ;;  %273 = vst.msk [vmem:[#allocation2 + $0x10] sm:$0x3] %vm272_vm1, %v3459_v3 }
  0x32   : > { %276 = vst.msk [vmem:[#allocation2 + $0x28] sm:$0x3] %vm272_vm1, %v3459_v3  ;;  %282 = vst.msk [vmem:[#allocation2 + $0x58] sm:$0x3] %vm272_vm1, %v3459_v3 }
  0x33   : > { %285 = vst.msk [vmem:[#allocation2 + $0x70] sm:$0x3] %vm272_vm1, %v3459_v3  ;;  %288 = vst.msk [vmem:[#allocation2 + $0x88] sm:$0x3] %vm272_vm1, %v3459_v3 }
  0x34   : > { %291 = vst.msk [vmem:[#allocation2 + $0xa0] sm:$0x3] %vm272_vm1, %v3459_v3  ;;  %294 = vst.msk [vmem:[#allocation2 + $0xb8] sm:$0x3] %vm272_vm1, %v3459_v3 }
  0x35   : > { %297 = vst.msk [vmem:[#allocation2 + $0xd0] sm:$0x3] %vm272_vm1, %v3459_v3  ;;  %300 = vst.msk [vmem:[#allocation2 + $0xe8] sm:$0x3] %vm272_vm1, %v3459_v3 }
  0x36   : > { %303 = vst.msk [vmem:[#allocation2 + $0x100] sm:$0x3] %vm272_vm1, %v3459_v3  ;;  %306 = vst.msk [vmem:[#allocation2 + $0x118] sm:$0x3] %vm272_vm1, %v3459_v3 }
  0x37   : > { %309 = vst.msk [vmem:[#allocation2 + $0x130] sm:$0x3] %vm272_vm1, %v3459_v3  ;;  %312 = vst.msk [vmem:[#allocation2 + $0x148] sm:$0x3] %vm272_vm1, %v3459_v3 }
  0x38   : > { %315 = vst.msk [vmem:[#allocation2 + $0x160] sm:$0x3] %vm272_vm1, %v3459_v3  ;;  %318 = vst.msk [vmem:[#allocation2 + $0x178] sm:$0x3] %vm272_vm1, %v3459_v3 }
  0x39   : > { %321 = vst.msk [vmem:[#allocation2 + $0x190] sm:$0x3] %vm272_vm1, %v3459_v3  ;;  %324 = vst.msk [vmem:[#allocation2 + $0x1a8] sm:$0x3] %vm272_vm1, %v3459_v3 }
  0x3a   : > { %327 = vst.msk [vmem:[#allocation2 + $0x1c0] sm:$0x3] %vm272_vm1, %v3459_v3  ;;  %330 = vst.msk [vmem:[#allocation2 + $0x1d8] sm:$0x3] %vm272_vm1, %v3459_v3 }
  0x3b   : > { %364 = vst.msk [vmem:[#allocation2 + $0x31] sm:$0xff] %vm269_vm0, %v3598_v0  ;;  %365 = vst.msk [vmem:[#allocation2 + $0x39] sm:$0xff] %vm269_vm0, %v3601_v1 }
  0x3c   : > { %366 = vst.msk [vmem:[#allocation2 + $0x49] sm:$0xff] %vm269_vm0, %v3604_v2  ;;  %367 = vst.msk [vmem:[#allocation2 + $0x51] sm:$0xff] %vm269_vm0, %v334_v4 }
  0x3d   : > { %368 = vst.msk [vmem:[#allocation2 + $0x61] sm:$0xff] %vm269_vm0, %v335_v5  ;;  %369 = vst.msk [vmem:[#allocation2 + $0x69] sm:$0xff] %vm269_vm0, %v336_v6 }
  0x3e   : > { %370 = vst.msk [vmem:[#allocation2 + $0x79] sm:$0xff] %vm269_vm0, %v337_v7  ;;  %371 = vst.msk [vmem:[#allocation2 + $0x81] sm:$0xff] %vm269_vm0, %v338_v8 }
  0x3f   : > { %372 = vst.msk [vmem:[#allocation2 + $0x91] sm:$0xff] %vm269_vm0, %v339_v9  ;;  %373 = vst.msk [vmem:[#allocation2 + $0x99] sm:$0xff] %vm269_vm0, %v340_v10 }
  0x40   : > { %374 = vst.msk [vmem:[#allocation2 + $0xa9] sm:$0xff] %vm269_vm0, %v341_v11  ;;  %375 = vst.msk [vmem:[#allocation2 + $0xb1] sm:$0xff] %vm269_vm0, %v342_v12 }
  0x41   : > { %376 = vst.msk [vmem:[#allocation2 + $0xc1] sm:$0xff] %vm269_vm0, %v343_v13  ;;  %377 = vst.msk [vmem:[#allocation2 + $0xc9] sm:$0xff] %vm269_vm0, %v344_v14 }
  0x42   : > { %378 = vst.msk [vmem:[#allocation2 + $0xd9] sm:$0xff] %vm269_vm0, %v345_v15  ;;  %379 = vst.msk [vmem:[#allocation2 + $0xe1] sm:$0xff] %vm269_vm0, %v346_v16 }
  0x43   : > { %380 = vst.msk [vmem:[#allocation2 + $0xf1] sm:$0xff] %vm269_vm0, %v347_v17  ;;  %381 = vst.msk [vmem:[#allocation2 + $0xf9] sm:$0xff] %vm269_vm0, %v348_v18 }
  0x44   : > { %382 = vst.msk [vmem:[#allocation2 + $0x109] sm:$0xff] %vm269_vm0, %v349_v19  ;;  %383 = vst.msk [vmem:[#allocation2 + $0x111] sm:$0xff] %vm269_vm0, %v350_v20 }
  0x45   : > { %384 = vst.msk [vmem:[#allocation2 + $0x121] sm:$0xff] %vm269_vm0, %v351_v21  ;;  %385 = vst.msk [vmem:[#allocation2 + $0x129] sm:$0xff] %vm269_vm0, %v352_v22 }
  0x46   : > { %386 = vst.msk [vmem:[#allocation2 + $0x139] sm:$0xff] %vm269_vm0, %v353_v23  ;;  %387 = vst.msk [vmem:[#allocation2 + $0x141] sm:$0xff] %vm269_vm0, %v354_v24 }
  0x47   : > { %388 = vst.msk [vmem:[#allocation2 + $0x151] sm:$0xff] %vm269_vm0, %v355_v25  ;;  %389 = vst.msk [vmem:[#allocation2 + $0x159] sm:$0xff] %vm269_vm0, %v356_v26 }
  0x48   : > { %390 = vst.msk [vmem:[#allocation2 + $0x169] sm:$0xff] %vm269_vm0, %v357_v27  ;;  %391 = vst.msk [vmem:[#allocation2 + $0x171] sm:$0xff] %vm269_vm0, %v358_v28 }
  0x49   : > { %392 = vst.msk [vmem:[#allocation2 + $0x181] sm:$0xff] %vm269_vm0, %v359_v29  ;;  %393 = vst.msk [vmem:[#allocation2 + $0x189] sm:$0xff] %vm269_vm0, %v360_v30 }
  0x4a   : > { %394 = vst.msk [vmem:[#allocation2 + $0x199] sm:$0xff] %vm269_vm0, %v361_v31  ;;  %395 = vst.msk [vmem:[#allocation2 + $0x1a1] sm:$0xff] %vm269_vm0, %v362_v32 }
  0x4b PF: > { %s2802_s12 = smul.u32 192, %s3441_s24  ;;  %vm465_vm2 = vcmask 1046528   ;;  %s5547_s14 = smov 8   ;;  %vm576_vm3 = vcmask 1045504   ;;  %v1249_v15 = vld [vmem:[%s5540_s1 + $0x40] sm:$0xff]  ;;  %v1248_v16 = vld [vmem:[%s5540_s1 + $0x38] sm:$0xff] }
  0x4c   : > { %s5553_s17 = smov 16   ;;  %s5549_s18 = smov 24   ;;  %2882 = vmatprep.subr.mxu0 %v1249_v15  ;;  %v1247_v18 = vld [vmem:[%s5540_s1 + $0x30] sm:$0xff]  ;;  %v1246_v19 = vld [vmem:[%s5540_s1 + $0x28] sm:$0xff]  ;;  %v1245_v20 = vld [vmem:[%s5540_s1 + $0x20] sm:$0xff]  ;;  %vm1073_vm4 = vcmask 64512  }
  0x4d   : > { %s3731_s13 = scalar_lea.vmem [#allocation2], %s2802_s12  ;;  %s3463_s19 = smov 32   ;;  %2883 = vmatpush3.msra.mxu0 %v1249_v15  ;;  %v1244_v21 = vld [vmem:[%s5540_s1 + $0x18] sm:$0xff]  ;;  %v1243_v22 = vld [vmem:[%s5540_s1 + $0x10] sm:$0xff]  ;;  %v1242_v23 = vld [vmem:[%s5540_s1 + $0x8] sm:$0xff]  ;;  %vm1094_vm5 = vcmask 130048  }
  0x4e   : > { %s5551_s30 = smov 40   ;;  %2884 = vmatprep.subr.mxu0 %v1248_v16  ;;  %v1241_v24 = vld [vmem:[%s5540_s1] sm:$0xff]  ;;  %s3466_s20 = smov 56   ;;  %vm1115_vm6 = vcmask 195584   ;;  %vm1136_vm7 = vcmask 261120   ;;  %vm1157_vm8 = vcmask 326656  }
  0x4f   : > { %2885 = vmatpush3.msra.mxu0 %v1248_v16  ;;  %s5563_s29 = smov 40   ;;  %s5564_s16 = smov 16   ;;  %vm1178_vm9 = vcmask 392192   ;;  %vm1199_vm10 = vcmask 457728   ;;  %vm1220_vm11 = vcmask 523264   ;;  %vm1257_vm12 = vcmask 588800  }
  0x50   : > { %2886 = vmatprep.subr.mxu0 %v1247_v18  ;;  %s5565_s12 = smov 8   ;;  %vm1525_vm13 = vcmask 123904  }
  0x51   : > { %v3734_v33 = vld [vmem:[%s3731_s13 + $0x18] sm:$0xff]  ;;  %v3737_v34 = vld [vmem:[%s3731_s13 + $0x20] sm:$0xff]  ;;  %v3745_v38 = vld [vmem:[%s3731_s13 + $0x8] sm:$0xff]  ;;  %2887 = vmatpush3.msra.mxu0 %v1247_v18 }
  0x52   : > { %v3740_v35 = vld [vmem:[%s3731_s13] sm:$0xff]  ;;  %v471_v36 = vrot.slane %v3734_v33, 1  ;;  %v472_v37 = vrot.slane %v3737_v34, 1  ;;  %v3749_v40 = vld [vmem:[%s3731_s13 + $0x28] sm:$0x3]  ;;  %v467_v41 = vrot.slane %v3745_v38, 1  ;;  %2888 = vmatprep.subr.mxu0 %v1246_v19 }
  0x53   : > { %v466_v39 = vrot.slane %v3740_v35, 1  ;;  %v474_v42 = vrot.slane %v3749_v40, 1  ;;  %v401_v43 = vld [vmem:[%s3731_s13 + $0x10] sm:$0x3]  ;;  %v3755_v44 = vld [vmem:[%s3731_s13 + $0x38] sm:$0xff]  ;;  %v3779_v57 = vld [vmem:[%s3731_s13 + $0x48] sm:$0xff]  ;;  %2889 = vmatpush3.msra.mxu0 %v1246_v19 }
  0x54   : > { %v473_v45 = vsel %vm465_vm2, %v471_v36, %v472_v37  ;;  %v469_v46 = vrot.slane %v401_v43, 1  ;;  %v3759_v47 = vld [vmem:[%s3731_s13 + $0x40] sm:$0x3]  ;;  %v3762_v48 = vld [vmem:[%s3731_s13 + $0x30] sm:$0xff]  ;;  %v477_v51 = vrot.slane %v3755_v44, 1  ;;  %v481_v62 = vrot.slane %v3779_v57, 1  ;;  %2890 = vmatprep.subr.mxu0 %v1245_v20 }
  0x55   : > { %520 = vrot.lane.b32.xlu1 %v473_v45, %s5547_s14  ;;  %v468_v49 = vsel %vm465_vm2, %v466_v39, %v467_v41  ;;  %v475_v50 = vsel %vm465_vm2, %v472_v37, %v474_v42  ;;  %v479_v52 = vrot.slane %v3759_v47, 1  ;;  %v476_v54 = vrot.slane %v3762_v48, 1  ;;  %v3773_v55 = vld [vmem:[%s3731_s13 + $0x50] sm:$0xff]  ;;  %v3776_v56 = vld [vmem:[%s3731_s13 + $0x58] sm:$0x3]  ;;  %v3793_v63 = vld [vmem:[%s3731_s13 + $0x60] sm:$0xff]  ;;  %2891 = vmatpush3.msra.mxu0 %v1245_v20 }
  0x56   : > { %516 = vrot.lane.b32.xlu0 %v468_v49, %s5547_s14  ;;  %v470_v53 = vsel %vm465_vm2, %v467_v41, %v469_v46  ;;  %v482_v59 = vrot.slane %v3773_v55, 1  ;;  %v484_v60 = vrot.slane %v3776_v56, 1  ;;  %v3796_v0 = vld [vmem:[%s3731_s13 + $0x68] sm:$0xff]  ;;  %v577_v2 = vrot.slane %v3740_v35, 2  ;;  %2892 = vmatprep.subr.mxu0 %v1244_v21  ;;  %v413_v39 = vld [vmem:[%s3731_s13 + $0x70] sm:$0x3] }
  0x57   : > { %v3784_v58 = vsel %vm465_vm2, %v477_v51, %v479_v52  ;;  %v3789_v61 = vsel %vm465_vm2, %v476_v54, %v477_v51  ;;  %v578_v3 = vrot.slane %v3745_v38, 2  ;;  %v486_v5 = vrot.slane %v3793_v63, 1  ;;  %2893 = vmatpush3.msra.mxu0 %v1244_v21  ;;  %v3955_v51 = vld [vmem:[%s3731_s13 + $0x78] sm:$0xff]  ;;  %v4006_v20 = vld [vmem:[%s3731_s13 + $0x90] sm:$0xff] }
  0x58   : > { %v3803_v1 = vsel %vm465_vm2, %v482_v59, %v484_v60  ;;  %v3808_v4 = vsel %vm465_vm2, %v481_v62, %v482_v59  ;;  %v487_v6 = vrot.slane %v3796_v0, 1  ;;  %v580_v9 = vrot.slane %v401_v43, 2  ;;  %2894 = vmatprep.subr.mxu0 %v1243_v22 }
  0x59   : > { %522 = vrot.lane.b32.xlu1 %v475_v50, %s5547_s14  ;;  %v579_v7 = vsel %vm576_vm3, %v577_v2, %v578_v3  ;;  %v582_v11 = vrot.slane %v3734_v33, 2  ;;  %v583_v12 = vrot.slane %v3737_v34, 2  ;;  %v585_v14 = vrot.slane %v3749_v40, 2  ;;  %2895 = vmatpush3.msra.mxu0 %v1243_v22  ;;  %v416_v2 = vld [vmem:[%s3731_s13 + $0x88] sm:$0x3]  ;;  %v4011_v22 = vld [vmem:[%s3731_s13 + $0x98] sm:$0xff] }
  0x5a   : > { %518 = vrot.lane.b32.xlu0 %v470_v53, %s5547_s14  ;;  %v3820_v8 = vsel %vm465_vm2, %v486_v5, %v487_v6  ;;  %v581_v10 = vsel %vm576_vm3, %v578_v3, %v580_v9  ;;  %2896 = vmatprep.subr.mxu0 %v1242_v23  ;;  %v587_v25 = vrot.slane %v3762_v48, 2  ;;  %v588_v26 = vrot.slane %v3755_v44, 2  ;;  %v3960_v53 = vld [vmem:[%s3731_s13 + $0x80] sm:$0xff] }
  0x5b   : > { %v584_v13 = vsel %vm576_vm3, %v582_v11, %v583_v12  ;;  %v586_v17 = vsel %vm576_vm3, %v583_v12, %v585_v14  ;;  %2897 = vmatpush3.msra.mxu0 %v1242_v23  ;;  %v590_v27 = vrot.slane %v3759_v47, 2  ;;  %v592_v30 = vrot.slane %v3779_v57, 2 }
  0x5c   : > { %2898 = vmatprep.subr.mxu0 %v1241_v24  ;;  %v589_v28 = vsel %vm576_vm3, %v587_v25, %v588_v26  ;;  %v593_v31 = vrot.slane %v3773_v55, 2  ;;  %v595_v32 = vrot.slane %v3776_v56, 2  ;;  %v489_v40 = vrot.slane %v413_v39, 1 }
  0x5d   : > { %526 = vrot.lane.b32.xlu1 %v3784_v58, %s5547_s14  ;;  %2899 = vmatpush3.msra.mxu0 %v1241_v24  ;;  %v591_v29 = vsel %vm576_vm3, %v588_v26, %v590_v27  ;;  %v597_v42 = vrot.slane %v3793_v63, 2  ;;  %v598_v43 = vrot.slane %v3796_v0, 2  ;;  %v491_v56 = vrot.slane %v3955_v51, 1 }
  0x5e   : > { %524 = vrot.lane.b32.xlu0 %v3789_v61, %s5547_s14  ;;  %v594_v36 = vsel %vm576_vm3, %v592_v30, %v593_v31  ;;  %v596_v37 = vsel %vm576_vm3, %v593_v31, %v595_v32  ;;  %v490_v41 = vsel %vm465_vm2, %v487_v6, %v489_v40  ;;  %v602_v3 = vrot.slane %v3955_v51, 2  ;;  %v419_v31 = vld [vmem:[%s3731_s13 + $0xa0] sm:$0x3] }
  0x5f   : > { %v599_v46 = vsel %vm576_vm3, %v597_v42, %v598_v43  ;;  %v494_v6 = vrot.slane %v416_v2, 1  ;;  %v605_v12 = vrot.slane %v416_v2, 2  ;;  %v496_v24 = vrot.slane %v4006_v20, 1 }
  0x60   : > { %v497_v25 = vrot.slane %v4011_v22, 1 }
  0x61   : > { %530 = vrot.lane.b32.xlu1 %v3803_v1, %s5547_s14 }
  0x62   : > { %528 = vrot.lane.b32.xlu0 %v3808_v4, %s5547_s14 }
  0x65   : > { %627 = vrot.lane.b32.xlu1 %v579_v7, %s5553_s17 }
  0x66   : > { %532 = vrot.lane.b32.xlu0 %v3820_v8, %s5547_s14  ;;  %s5562_s14 = smov 24  }
  0x69   : > { %689 = vrot.lane.b32.xlu1 %v3734_v33, %s5549_s18 }
  0x6a   : > { %629 = vrot.lane.b32.xlu0 %v581_v10, %s5553_s17 }
  0x6d   : > { %755 = vrot.lane.b32.xlu1 %v473_v45, %s3463_s19  ;;  %v600_v45 = vrot.slane %v413_v39, 2 }
  0x6e   : > { %691 = vrot.lane.b32.xlu0 %v3737_v34, %s5549_s18 }
  0x6f   : > { %v601_v47 = vsel %vm576_vm3, %v598_v43, %v600_v45 }
  0x71   : > { %820 = vrot.lane.b32.xlu1 %v584_v13, %s5551_s30 }
  0x72   : > { %757 = vrot.lane.b32.xlu0 %v475_v50, %s3463_s19 }
  0x75   : > { %822 = vrot.lane.b32.xlu1 %v586_v17, %s5551_s30  ;;  %s3465_s30 = smov 48  }
  0x76   : > { %631 = vrot.lane.b32.xlu0 %v584_v13, %s5553_s17 }
  0x79   : > { %633 = vrot.lane.b32.xlu1 %v586_v17, %s5553_s17  ;;  %s3467_s17 = smov 64  }
  0x7a   : > { %882 = vrot.lane.b32.xlu0 %v3762_v48, %s3465_s30 }
  0x7d   : > { %884 = vrot.lane.b32.xlu1 %v3755_v44, %s3465_s30 }
  0x7e   : > { %693 = vrot.lane.b32.xlu0 %v3762_v48, %s5562_s14 }
  0x81   : > { %695 = vrot.lane.b32.xlu1 %v3755_v44, %s5562_s14 }
  0x82   : > { %948 = vrot.lane.b32.xlu0 %v3789_v61, %s3466_s20 }
  0x85   : > { %950 = vrot.lane.b32.xlu1 %v3784_v58, %s3466_s20 }
  0x86   : > { %759 = vrot.lane.b32.xlu0 %v3789_v61, %s3463_s19 }
  0x89   : > { %761 = vrot.lane.b32.xlu1 %v3784_v58, %s3463_s19  ;;  %v492_v58 = vrot.slane %v3960_v53, 1 }
  0x8a   : > { %1013 = vrot.lane.b32.xlu0 %v589_v28, %s3467_s17 }
  0x8b   : > { %v493_v61 = vsel %vm465_vm2, %v491_v56, %v492_v58  ;;  %v495_v10 = vsel %vm465_vm2, %v492_v58, %v494_v6 }
  0x8d   : > { %1015 = vrot.lane.b32.xlu1 %v591_v29, %s3467_s17 }
  0x8e   : > { %824 = vrot.lane.b32.xlu0 %v589_v28, %s5563_s29 }
  0x91   : > { %826 = vrot.lane.b32.xlu1 %v591_v29, %s5563_s29 }
  0x92   : > { %635 = vrot.lane.b32.xlu0 %v589_v28, %s5564_s16  ;;  %v498_v28 = vsel %vm465_vm2, %v496_v24, %v497_v25  ;;  %v4076_v24 = vld [vmem:[%s3731_s13 + $0xb0] sm:$0xff] }
  0x95   : > { %637 = vrot.lane.b32.xlu1 %v591_v29, %s5564_s16 }
  0x96   : > { %886 = vrot.lane.b32.xlu0 %v3779_v57, %s3465_s30 }
  0x99   : > { %888 = vrot.lane.b32.xlu1 %v3773_v55, %s3465_s30 }
  0x9a   : > { %697 = vrot.lane.b32.xlu0 %v3779_v57, %s5562_s14 }
  0x9d   : > { %699 = vrot.lane.b32.xlu1 %v3773_v55, %s5562_s14 }
  0x9e   : > { %952 = vrot.lane.b32.xlu0 %v3808_v4, %s3466_s20 }
  0xa1   : > { %954 = vrot.lane.b32.xlu1 %v3803_v1, %s3466_s20 }
  0xa2   : > { %763 = vrot.lane.b32.xlu0 %v3808_v4, %s3463_s19  ;;  %v603_v4 = vrot.slane %v3960_v53, 2 }
  0xa4   : > { %v606_v15 = vsel %vm576_vm3, %v603_v4, %v605_v12 }
  0xa5   : > { %765 = vrot.lane.b32.xlu1 %v3803_v1, %s3463_s19 }
  0xa6   : > { %1017 = vrot.lane.b32.xlu0 %v594_v36, %s3467_s17 }
  0xa9   : > { %1019 = vrot.lane.b32.xlu1 %v596_v37, %s3467_s17 }
  0xaa   : > { %828 = vrot.lane.b32.xlu0 %v594_v36, %s5563_s29 }
  0xad   : > { %830 = vrot.lane.b32.xlu1 %v596_v37, %s5563_s29 }
  0xae   : > { %639 = vrot.lane.b32.xlu0 %v594_v36, %s5564_s16  ;;  %v607_v36 = vrot.slane %v4006_v20, 2 }
  0xb1   : > { %641 = vrot.lane.b32.xlu1 %v596_v37, %s5564_s16  ;;  %v608_v37 = vrot.slane %v4011_v22, 2 }
  0xb2   : > { %890 = vrot.lane.b32.xlu0 %v3793_v63, %s3465_s30 }
  0xb5   : > { %892 = vrot.lane.b32.xlu1 %v3796_v0, %s3465_s30 }
  0xb6   : > { %701 = vrot.lane.b32.xlu0 %v3793_v63, %s5562_s14 }
  0xb9   : > { %703 = vrot.lane.b32.xlu1 %v3796_v0, %s5562_s14 }
  0xba   : > { %956 = vrot.lane.b32.xlu0 %v3820_v8, %s3466_s20 }
  0xbd   : > { %958 = vrot.lane.b32.xlu1 %v490_v41, %s3466_s20 }
  0xbe   : > { %767 = vrot.lane.b32.xlu0 %v3820_v8, %s3463_s19  ;;  %v604_v8 = vsel %vm576_vm3, %v602_v3, %v603_v4 }
  0xc1   : > { %769 = vrot.lane.b32.xlu1 %v490_v41, %s3463_s19 }
  0xc2   : > { %1021 = vrot.lane.b32.xlu0 %v599_v46, %s3467_s17 }
  0xc5   : > { %1023 = vrot.lane.b32.xlu1 %v601_v47, %s3467_s17 }
  0xc6   : > { %832 = vrot.lane.b32.xlu0 %v599_v46, %s5563_s29 }
  0xc7   : > { %v3948_v49 = vpop.permute.xlu1 %520 }
  0xc8   : > { %v3950_v50 = vpop.permute.xlu0 %516 }
  0xc9   : > { %643 = vrot.lane.b32.xlu1 %v599_v46, %s5564_s16  ;;  %v1074_v32 = vsel %vm1073_vm4, %v3740_v35, %v3950_v50  ;;  %v609_v50 = vsel %vm576_vm3, %v607_v36, %v608_v37 }
  0xca   : > { %534 = vrot.lane.b32.xlu0 %v490_v41, %s5565_s12  ;;  %v499_v41 = vrot.slane %v419_v31, 1 }
  0xcb   : > { %v3957_v52 = vpop.permute.xlu1 %522 }
  0xcc   : > { %v3962_v54 = vpop.permute.xlu0 %518 }
  0xcd   : > { %894 = vrot.lane.b32.xlu1 %v3955_v51, %s3465_s30  ;;  %v1075_v35 = vsel %vm1073_vm4, %v3745_v38, %v3962_v54  ;;  %v500_v54 = vsel %vm465_vm2, %v497_v25, %v499_v41 }
  0xce   : > { %834 = vrot.lane.b32.xlu0 %v601_v47, %s5563_s29 }
  0xcf   : > { %v3969_v59 = vpop.permute.xlu1 %526 }
  0xd0   : > { %v3971_v60 = vpop.permute.xlu0 %524 }
  0xd1   : > { %705 = vrot.lane.b32.xlu1 %v3955_v51, %s5562_s14 }
  0xd2   : > { %645 = vrot.lane.b32.xlu0 %v601_v47, %s5564_s16 }
  0xd3   : > { %v3977_v62 = vpop.permute.xlu1 %530 }
  0xd4   : > { %v3979_v1 = vpop.permute.xlu0 %528 }
  0xd5   : > { %960 = vrot.lane.b32.xlu1 %v493_v61, %s3466_s20 }
  0xd6   : > { %896 = vrot.lane.b32.xlu0 %v3960_v53, %s3465_s30 }
  0xd7   : > { %v628_v5 = vpop.permute.xlu1 %627 }
  0xd8   : > { %v3987_v7 = vpop.permute.xlu0 %532  ;;  %v1095_v39 = vsel %vm1094_vm5, %v1074_v32, %v628_v5  ;;  %v1076_v32 = vsel %vm1073_vm4, %v3734_v33, %v3948_v49 }
  0xd9   : > { %771 = vrot.lane.b32.xlu1 %v493_v61, %s3463_s19 }
  0xda   : > { %707 = vrot.lane.b32.xlu0 %v3960_v53, %s5562_s14 }
  0xdb   : > { %v690_v9 = vpop.permute.xlu1 %689 }
  0xdc   : > { %v630_v11 = vpop.permute.xlu0 %629  ;;  %v1116_v42 = vsel %vm1115_vm6, %v1095_v39, %v690_v9 }
  0xdd   : > { %1025 = vrot.lane.b32.xlu1 %v604_v8, %s3467_s17  ;;  %v1096_v46 = vsel %vm1094_vm5, %v1075_v35, %v630_v11  ;;  %v1077_v35 = vsel %vm1073_vm4, %v3737_v34, %v3957_v52 }
  0xde   : > { %962 = vrot.lane.b32.xlu0 %v495_v10, %s3466_s20 }
  0xdf   : > { %v756_v13 = vpop.permute.xlu1 %755 }
  0xe0   : > { %v692_v14 = vpop.permute.xlu0 %691  ;;  %v1137_v45 = vsel %vm1136_vm7, %v1116_v42, %v756_v13  ;;  %v422_v42 = vld [vmem:[%s3731_s13 + $0xb8] sm:$0x3] }
  0xe1   : > { %773 = vrot.lane.b32.xlu1 %v495_v10, %s3463_s19  ;;  %v1117_v56 = vsel %vm1115_vm6, %v1096_v46, %v692_v14 }
  0xe2   : > { %536 = vrot.lane.b32.xlu0 %v493_v61, %s5565_s12 }
  0xe3   : > { %v821_v16 = vpop.permute.xlu1 %820 }
  0xe4   : > { %v758_v17 = vpop.permute.xlu0 %757  ;;  %v1158_v47 = vsel %vm1157_vm8, %v1137_v45, %v821_v16 }
  0xe5   : > { %1027 = vrot.lane.b32.xlu1 %v606_v15, %s3467_s17  ;;  %v1138_v61 = vsel %vm1136_vm7, %v1117_v56, %v758_v17 }
  0xe6   : > { %836 = vrot.lane.b32.xlu0 %v604_v8, %s5563_s29 }
  0xe7   : > { %v823_v18 = vpop.permute.xlu1 %822 }
  0xe8   : > { %v4001_v19 = vpop.permute.xlu0 %631  ;;  %v1159_v4 = vsel %vm1157_vm8, %v1138_v61, %v823_v18  ;;  %v4073_v18 = vld [vmem:[%s3731_s13 + $0xa8] sm:$0xff] }
  0xe9   : > { %647 = vrot.lane.b32.xlu1 %v604_v8, %s5564_s16  ;;  %v610_v8 = vrot.slane %v419_v31, 2 }
  0xea   : > { %538 = vrot.lane.b32.xlu0 %v495_v10, %s5565_s12 }
  0xeb   : > { %v4008_v21 = vpop.permute.xlu1 %633  ;;  %v611_v13 = vsel %vm576_vm3, %v608_v37, %v610_v8  ;;  %v1097_v37 = vsel %vm1094_vm5, %v1076_v32, %v4001_v19  ;;  %v612_v19 = vrot.slane %v4073_v18, 2 }
  0xec   : > { %v883_v23 = vpop.permute.xlu0 %882  ;;  %v1098_v33 = vsel %vm1094_vm5, %v1077_v35, %v4008_v21 }
  0xed   : > { %898 = vrot.lane.b32.xlu1 %v4006_v20, %s3465_s30  ;;  %v1179_v58 = vsel %vm1178_vm9, %v1158_v47, %v883_v23 }
  0xee   : > { %838 = vrot.lane.b32.xlu0 %v606_v15, %s5563_s29 }
  0xef   : > { %v885_v26 = vpop.permute.xlu1 %884 }
  0xf0   : > { %v4018_v27 = vpop.permute.xlu0 %693  ;;  %v1180_v6 = vsel %vm1178_vm9, %v1159_v4, %v885_v26  ;;  %v501_v26 = vrot.slane %v4073_v18, 1 }
  0xf1   : > { %709 = vrot.lane.b32.xlu1 %v4006_v20, %s5562_s14 }
  0xf2   : > { %649 = vrot.lane.b32.xlu0 %v606_v15, %s5564_s16 }
  0xf3   : > { %v4024_v29 = vpop.permute.xlu1 %695 }
  0xf4   : > { %v949_v30 = vpop.permute.xlu0 %948  ;;  %v1119_v46 = vsel %vm1115_vm6, %v1098_v33, %v4024_v29 }
  0xf5   : > { %964 = vrot.lane.b32.xlu1 %v498_v28, %s3466_s20  ;;  %v1200_v2 = vsel %vm1199_vm10, %v1179_v58, %v949_v30 }
  0xf6   : > { %900 = vrot.lane.b32.xlu0 %v4011_v22, %s3465_s30 }
  0xf7   : > { %v951_v40 = vpop.permute.xlu1 %950 }
  0xf8   : > { %v760_v43 = vpop.permute.xlu0 %759  ;;  %v1201_v9 = vsel %vm1199_vm10, %v1180_v6, %v951_v40  ;;  %v1118_v40 = vsel %vm1115_vm6, %v1097_v37, %v4018_v27  ;;  %v613_v27 = vrot.slane %v4076_v24, 2 }
  0xf9   : > { %775 = vrot.lane.b32.xlu1 %v498_v28, %s3463_s19  ;;  %v1139_v45 = vsel %vm1136_vm7, %v1118_v40, %v760_v43  ;;  %v504_v43 = vrot.slane %v422_v42, 1 }
  0xfa   : > { %711 = vrot.lane.b32.xlu0 %v4011_v22, %s5562_s14  ;;  %v614_v29 = vsel %vm576_vm3, %v612_v19, %v613_v27 }
  0xfb   : > { %v762_v38 = vpop.permute.xlu1 %761 }
  0xfc   : > { %v1014_v3 = vpop.permute.xlu0 %1013  ;;  %v1140_v47 = vsel %vm1136_vm7, %v1119_v46, %v762_v38 }
  0xfd   : > { %1029 = vrot.lane.b32.xlu1 %v609_v50, %s3467_s17  ;;  %v1221_v5 = vsel %vm1220_vm11, %v1200_v2, %v1014_v3 }
  0xfe   : > { %966 = vrot.lane.b32.xlu0 %v500_v54, %s3466_s20  ;;  %2900 = vmatprep.mubr.msk.f32.mxu0 %vm1257_vm12, %v1221_v5  ;;  %v615_v5 = vrot.slane %v422_v42, 2 }
  0xff   : > { %v1016_v10 = vpop.permute.xlu1 %1015 }
 0x100   : > { %v1222_v11 = vsel %vm1220_vm11, %v1201_v9, %v1016_v10  ;;  %v825_v12 = vpop.permute.xlu0 %824  ;;  %v616_v9 = vsel %vm576_vm3, %v613_v27, %v615_v5 }
 0x101   : > { %777 = vrot.lane.b32.xlu1 %v500_v54, %s3463_s19  ;;  %2901 = vmatmul.mubr.msk.f32.vlgmr.msra.gmra.mxu0 %vm1257_vm12, %v1222_v11  ;;  %v1160_v49 = vsel %vm1157_vm8, %v1139_v45, %v825_v12 }
 0x102   : > { %540 = vrot.lane.b32.xlu0 %v498_v28, %s5565_s12  ;;  %v502_v28 = vrot.slane %v4076_v24, 1 }
 0x103   : > { %v827_v14 = vpop.permute.xlu1 %826 }
 0x104   : > { %v4064_v15 = vpop.permute.xlu0 %635  ;;  %v503_v36 = vsel %vm465_vm2, %v501_v26, %v502_v28  ;;  %v1161_v56 = vsel %vm1157_vm8, %v1140_v47, %v827_v14  ;;  %v505_v2 = vsel %vm465_vm2, %v502_v28, %v504_v43  ;;  %v4144_v14 = vld [vmem:[%s3731_s13 + $0xc0] sm:$0xff]  ;;  %v1078_v28 = vsel %vm1073_vm4, %v3762_v48, %v3971_v60 }
 0x105   : > { %1031 = vrot.lane.b32.xlu1 %v611_v13, %s3467_s17  ;;  %v1079_v48 = vsel %vm1073_vm4, %v3755_v44, %v3969_v59 }
 0x106   : > { %840 = vrot.lane.b32.xlu0 %v609_v50, %s5563_s29 }
 0x107   : > { %v4068_v16 = vpop.permute.xlu1 %637 }
 0x108   : > { %v887_v17 = vpop.permute.xlu0 %886  ;;  %v1100_v42 = vsel %vm1094_vm5, %v1079_v48, %v4068_v16 }
 0x109   : > { %651 = vrot.lane.b32.xlu1 %v609_v50, %s5564_s16  ;;  %v1181_v34 = vsel %vm1178_vm9, %v1160_v49, %v887_v17  ;;  %v425_v49 = vld [vmem:[%s3731_s13 + $0xd0] sm:$0x3] }
 0x10a   : > { %542 = vrot.lane.b32.xlu0 %v500_v54, %s5565_s12  ;;  %v509_v43 = vrot.slane %v425_v49, 1 }
 0x10b   : > { %v889_v23 = vpop.permute.xlu1 %888 }
 0x10c   : > { %v4078_v25 = vpop.permute.xlu0 %697  ;;  %v1182_v54 = vsel %vm1178_vm9, %v1161_v56, %v889_v23  ;;  %v4149_v23 = vld [vmem:[%s3731_s13 + $0xc8] sm:$0xff] }
 0x10d   : > { %902 = vrot.lane.b32.xlu1 %v4073_v18, %s3465_s30  ;;  %v507_v32 = vrot.slane %v4149_v23, 1  ;;  %v618_v46 = vrot.slane %v4149_v23, 2 }
 0x10e   : > { %842 = vrot.lane.b32.xlu0 %v611_v13, %s5563_s29 }
 0x10f   : > { %v4085_v30 = vpop.permute.xlu1 %699 }
 0x110   : > { %v953_v31 = vpop.permute.xlu0 %952  ;;  %v1121_v35 = vsel %vm1115_vm6, %v1100_v42, %v4085_v30  ;;  %v617_v30 = vrot.slane %v4144_v14, 2  ;;  %v1081_v42 = vsel %vm1073_vm4, %v3773_v55, %v3977_v62 }
 0x111   : > { %713 = vrot.lane.b32.xlu1 %v4073_v18, %s5562_s14  ;;  %v1202_v21 = vsel %vm1199_vm10, %v1181_v34, %v953_v31  ;;  %v506_v31 = vrot.slane %v4144_v14, 1 }
 0x112   : > { %653 = vrot.lane.b32.xlu0 %v611_v13, %s5564_s16 }
 0x113   : > { %v955_v39 = vpop.permute.xlu1 %954 }
 0x114   : > { %v764_v41 = vpop.permute.xlu0 %763  ;;  %v1203_v38 = vsel %vm1199_vm10, %v1182_v54, %v955_v39 }
 0x115   : > { %968 = vrot.lane.b32.xlu1 %v503_v36, %s3466_s20 }
 0x116   : > { %904 = vrot.lane.b32.xlu0 %v4076_v24, %s3465_s30 }
 0x117   : > { %v766_v52 = vpop.permute.xlu1 %765 }
 0x118   : > { %v1018_v50 = vpop.permute.xlu0 %1017  ;;  %v1142_v59 = vsel %vm1136_vm7, %v1121_v35, %v766_v52 }
 0x119   : > { %v1223_v58 = vsel %vm1220_vm11, %v1202_v21, %v1018_v50  ;;  %779 = vrot.lane.b32.xlu1 %v503_v36, %s3463_s19  ;;  %v619_v50 = vsel %vm576_vm3, %v617_v30, %v618_v46 }
 0x11a   : > { %715 = vrot.lane.b32.xlu0 %v4076_v24, %s5562_s14  ;;  %2903 = vmatprep.mubr.msk.f32.mxu0 %vm1257_vm12, %v1223_v58  ;;  %v510_v58 = vsel %vm465_vm2, %v507_v32, %v509_v43 }
 0x11b   : > { %v1020_v61 = vpop.permute.xlu1 %1019 }
 0x11c   : > { %v1224_v3 = vsel %vm1220_vm11, %v1203_v38, %v1020_v61  ;;  %v829_v4 = vpop.permute.xlu0 %828 }
 0x11d   : > { %1033 = vrot.lane.b32.xlu1 %v614_v29, %s3467_s17  ;;  %2904 = vmatmul.mubr.msk.f32.gmra.mxu0 %vm1257_vm12, %v1224_v3 }
 0x11e   : > { %970 = vrot.lane.b32.xlu0 %v505_v2, %s3466_s20 }
 0x11f   : > { %v831_v6 = vpop.permute.xlu1 %830 }
 0x120   : > { %v4130_v8 = vpop.permute.xlu0 %639  ;;  %v1163_v16 = vsel %vm1157_vm8, %v1142_v59, %v831_v6  ;;  %v3468_v6 = vmov 0.0   ;;  %v428_v59 = vld [vmem:[%s3731_s13 + $0xe8] sm:$0x3] }
 0x121   : > { %781 = vrot.lane.b32.xlu1 %v505_v2, %s3463_s19  ;;  %1524 = vst.msk [vmem:[#allocation3 + $0x8] sm:$0xff] %vm1094_vm5, %v3468_v6  ;;  %1523 = vst.msk [vmem:[#allocation3] sm:$0xff] %vm1094_vm5, %v3468_v6  ;;  %v625_v43 = vrot.slane %v428_v59, 2 }
 0x122   : > { %544 = vrot.lane.b32.xlu0 %v503_v36, %s5565_s12  ;;  %v1099_v36 = vsel %vm1094_vm5, %v1078_v28, %v4064_v15  ;;  %1526 = vst.msk [vmem:[#allocation3 + $0x10] sm:$0x3] %vm1525_vm13, %v3468_v6  ;;  %1529 = vst.msk [vmem:[#allocation3 + $0x28] sm:$0x3] %vm1525_vm13, %v3468_v6 }
 0x123   : > { %v4135_v10 = vpop.permute.xlu1 %641  ;;  %v1120_v39 = vsel %vm1115_vm6, %v1099_v36, %v4078_v25  ;;  %v508_v25 = vsel %vm465_vm2, %v506_v31, %v507_v32  ;;  %1527 = vst.msk [vmem:[#allocation3 + $0x18] sm:$0xff] %vm1094_vm5, %v3468_v6  ;;  %1528 = vst.msk [vmem:[#allocation3 + $0x20] sm:$0xff] %vm1094_vm5, %v3468_v6  ;;  %v4298_v32 = vld [vmem:[%s3731_s13 + $0xe0] sm:$0xff] }
 0x124   : > { %v891_v11 = vpop.permute.xlu0 %890  ;;  %v1141_v60 = vsel %vm1136_vm7, %v1120_v39, %v764_v41  ;;  %1530 = vst.msk [vmem:[#allocation3 + $0x30] sm:$0xff] %vm1094_vm5, %v3468_v6  ;;  %1531 = vst.msk [vmem:[#allocation3 + $0x38] sm:$0xff] %vm1094_vm5, %v3468_v6 }
 0x125   : > { %1035 = vrot.lane.b32.xlu1 %v616_v9, %s3467_s17  ;;  %v1162_v15 = vsel %vm1157_vm8, %v1141_v60, %v829_v4  ;;  %1532 = vst.msk [vmem:[#allocation3 + $0x40] sm:$0x3] %vm1525_vm13, %v3468_v6  ;;  %1535 = vst.msk [vmem:[#allocation3 + $0x58] sm:$0x3] %vm1525_vm13, %v3468_v6 }
 0x126   : > { %844 = vrot.lane.b32.xlu0 %v614_v29, %s5563_s29  ;;  %v1183_v45 = vsel %vm1178_vm9, %v1162_v15, %v891_v11  ;;  %1533 = vst.msk [vmem:[#allocation3 + $0x48] sm:$0xff] %vm1094_vm5, %v3468_v6  ;;  %1534 = vst.msk [vmem:[#allocation3 + $0x50] sm:$0xff] %vm1094_vm5, %v3468_v6  ;;  %v1080_v11 = vsel %vm1073_vm4, %v3779_v57, %v3979_v1  ;;  %v1102_v15 = vsel %vm1094_vm5, %v1081_v42, %v4135_v10 }
 0x127   : > { %v893_v12 = vpop.permute.xlu1 %892  ;;  %1536 = vst.msk [vmem:[#allocation3 + $0x60] sm:$0xff] %vm1094_vm5, %v3468_v6  ;;  %1537 = vst.msk [vmem:[#allocation3 + $0x68] sm:$0xff] %vm1094_vm5, %v3468_v6 }
 0x128   : > { %v4139_v13 = vpop.permute.xlu0 %701  ;;  %v1184_v27 = vsel %vm1178_vm9, %v1163_v16, %v893_v12  ;;  %1538 = vst.msk [vmem:[#allocation3 + $0x70] sm:$0x3] %vm1525_vm13, %v3468_v6  ;;  %1541 = vst.msk [vmem:[#allocation3 + $0x88] sm:$0x3] %vm1525_vm13, %v3468_v6  ;;  %v1101_v12 = vsel %vm1094_vm5, %v1080_v11, %v4130_v8  ;;  %v514_v16 = vrot.slane %v428_v59, 1 }
 0x129   : > { %655 = vrot.lane.b32.xlu1 %v614_v29, %s5564_s16  ;;  %v620_v29 = vrot.slane %v425_v49, 2  ;;  %1539 = vst.msk [vmem:[#allocation3 + $0x78] sm:$0xff] %vm1094_vm5, %v3468_v6  ;;  %1540 = vst.msk [vmem:[#allocation3 + $0x80] sm:$0xff] %vm1094_vm5, %v3468_v6  ;;  %v1122_v28 = vsel %vm1115_vm6, %v1101_v12, %v4139_v13 }
 0x12a   : > { %546 = vrot.lane.b32.xlu0 %v505_v2, %s5565_s12  ;;  %1542 = vst.msk [vmem:[#allocation3 + $0x90] sm:$0xff] %vm1094_vm5, %v3468_v6  ;;  %1543 = vst.msk [vmem:[#allocation3 + $0x98] sm:$0xff] %vm1094_vm5, %v3468_v6 }
 0x12b   : > { %v4146_v17 = vpop.permute.xlu1 %703  ;;  %v4214_v2 = vsel %vm576_vm3, %v618_v46, %v620_v29  ;;  %1544 = vst.msk [vmem:[#allocation3 + $0xa0] sm:$0x3] %vm1525_vm13, %v3468_v6  ;;  %1547 = vst.msk [vmem:[#allocation3 + $0xb8] sm:$0x3] %vm1525_vm13, %v3468_v6 }
 0x12c   : > { %v957_v26 = vpop.permute.xlu0 %956  ;;  %1545 = vst.msk [vmem:[#allocation3 + $0xa8] sm:$0xff] %vm1094_vm5, %v3468_v6  ;;  %1546 = vst.msk [vmem:[#allocation3 + $0xb0] sm:$0xff] %vm1094_vm5, %v3468_v6  ;;  %v1123_v35 = vsel %vm1115_vm6, %v1102_v15, %v4146_v17 }
 0x12d   : > { %906 = vrot.lane.b32.xlu1 %v4144_v14, %s3465_s30  ;;  %v1204_v41 = vsel %vm1199_vm10, %v1183_v45, %v957_v26  ;;  %1548 = vst.msk [vmem:[#allocation3 + $0xc0] sm:$0xff] %vm1094_vm5, %v3468_v6  ;;  %1549 = vst.msk [vmem:[#allocation3 + $0xc8] sm:$0xff] %vm1094_vm5, %v3468_v6  ;;  %v4291_v26 = vld [vmem:[%s3731_s13 + $0xd8] sm:$0xff] }
 0x12e   : > { %846 = vrot.lane.b32.xlu0 %v616_v9, %s5563_s29  ;;  %1550 = vst.msk [vmem:[#allocation3 + $0xd0] sm:$0x3] %vm1525_vm13, %v3468_v6  ;;  %1553 = vst.msk [vmem:[#allocation3 + $0xe8] sm:$0x3] %vm1525_vm13, %v3468_v6  ;;  %v511_v13 = vrot.slane %v4291_v26, 1  ;;  %v622_v17 = vrot.slane %v4291_v26, 2 }
 0x12f   : > { %v959_v37 = vpop.permute.xlu1 %958  ;;  %1551 = vst.msk [vmem:[#allocation3 + $0xd8] sm:$0xff] %vm1094_vm5, %v3468_v6  ;;  %1552 = vst.msk [vmem:[#allocation3 + $0xe0] sm:$0xff] %vm1094_vm5, %v3468_v6 }
 0x130   : > { %v4163_v40 = vpop.permute.xlu0 %767  ;;  %v1205_v34 = vsel %vm1199_vm10, %v1184_v27, %v959_v37  ;;  %v512_v37 = vrot.slane %v4298_v32, 1 }
 0x131   : > { %717 = vrot.lane.b32.xlu1 %v4144_v14, %s5562_s14  ;;  %v1143_v36 = vsel %vm1136_vm7, %v1122_v28, %v4163_v40  ;;  %v430_v28 = vld [vmem:[%s3731_s13 + $0xf8] sm:$0xff] }
 0x132   : > { %657 = vrot.lane.b32.xlu0 %v616_v9, %s5564_s16 }
 0x133   : > { %v4179_v44 = vpop.permute.xlu1 %769 }
 0x134   : > { %v1022_v33 = vpop.permute.xlu0 %1021  ;;  %v1144_v55 = vsel %vm1136_vm7, %v1123_v35, %v4179_v44 }
 0x135   : > { %v1225_v19 = vsel %vm1220_vm11, %v1204_v41, %v1022_v33  ;;  %972 = vrot.lane.b32.xlu1 %v508_v25, %s3466_s20  ;;  %v623_v33 = vrot.slane %v4298_v32, 2 }
 0x136   : > { %908 = vrot.lane.b32.xlu0 %v4149_v23, %s3465_s30  ;;  %2906 = vmatprep.mubr.msk.f32.mxu0 %vm1257_vm12, %v1225_v19 }
 0x137   : > { %v1024_v52 = vpop.permute.xlu1 %1023  ;;  %v624_v30 = vsel %vm576_vm3, %v622_v17, %v623_v33 }
 0x138   : > { %v1226_v47 = vsel %vm1220_vm11, %v1205_v34, %v1024_v52  ;;  %v4195_v21 = vpop.permute.xlu0 %832  ;;  %v515_v34 = vsel %vm465_vm2, %v512_v37, %v514_v16 }
 0x139   : > { %783 = vrot.lane.b32.xlu1 %v508_v25, %s3463_s19  ;;  %2907 = vmatmul.mubr.msk.f32.gmra.mxu0 %vm1257_vm12, %v1226_v47  ;;  %v1164_v1 = vsel %vm1157_vm8, %v1143_v36, %v4195_v21 }
 0x13a   : > { %719 = vrot.lane.b32.xlu0 %v4149_v23, %s5562_s14 }
 0x13b   : > { %v4202_v56 = vpop.permute.xlu1 %643 }
 0x13c   : > { %v4205_v54 = vpop.permute.xlu0 %534 }
 0x13d   : > { %1037 = vrot.lane.b32.xlu1 %v619_v50, %s3467_s17 }
 0x13e   : > { %974 = vrot.lane.b32.xlu0 %v510_v58, %s3466_s20 }
 0x13f   : > { %v895_v38 = vpop.permute.xlu1 %894 }
 0x140   : > { %v4209_v61 = vpop.permute.xlu0 %834  ;;  %v1185_v8 = vsel %vm1178_vm9, %v1164_v1, %v895_v38 }
 0x141   : > { %785 = vrot.lane.b32.xlu1 %v510_v58, %s3463_s19  ;;  %v1165_v41 = vsel %vm1157_vm8, %v1144_v55, %v4209_v61  ;;  %v816_v55 = vrot.slane %v430_v28, 2 }
 0x142   : > { %548 = vrot.lane.b32.xlu0 %v508_v25, %s5565_s12  ;;  %v513_v25 = vsel %vm465_vm2, %v511_v13, %v512_v37 }
 0x143   : > { %v4216_v3 = vpop.permute.xlu1 %705 }
 0x144   : > { %v4218_v4 = vpop.permute.xlu0 %645 }
 0x145   : > { %1039 = vrot.lane.b32.xlu1 %v4214_v2, %s3467_s17 }
 0x146   : > { %848 = vrot.lane.b32.xlu0 %v619_v50, %s5563_s29 }
 0x147   : > { %v961_v5 = vpop.permute.xlu1 %960 }
 0x148   : > { %v897_v9 = vpop.permute.xlu0 %896  ;;  %v1206_v39 = vsel %vm1199_vm10, %v1185_v8, %v961_v5  ;;  %v751_v8 = vrot.slane %v430_v28, 1 }
 0x149   : > { %659 = vrot.lane.b32.xlu1 %v619_v50, %s5564_s16  ;;  %v1186_v10 = vsel %vm1178_vm9, %v1165_v41, %v897_v9  ;;  %v626_v50 = vsel %vm576_vm3, %v623_v33, %v625_v43  ;;  %v429_v9 = vld [vmem:[%s3731_s13 + $0xf0] sm:$0xff] }
 0x14a   : > { %550 = vrot.lane.b32.xlu0 %v510_v58, %s5565_s12  ;;  %v815_v35 = vrot.slane %v429_v9, 2  ;;  %v433_v43 = vld [vmem:[%s3731_s13 + $0x110] sm:$0xff] }
 0x14b   : > { %v4295_v31 = vpop.permute.xlu1 %771 }
 0x14c   : > { %v4302_v57 = vpop.permute.xlu0 %707  ;;  %v817_v17 = vsel %vm576_vm3, %v815_v35, %v816_v55 }
 0x14d   : > { %910 = vrot.lane.b32.xlu1 %v4291_v26, %s3465_s30 }
 0x14e   : > { %850 = vrot.lane.b32.xlu0 %v4214_v2, %s5563_s29 }
 0x14f   : > { %v1026_v40 = vpop.permute.xlu1 %1025 }
 0x150   : > { %v1227_v48 = vsel %vm1220_vm11, %v1206_v39, %v1026_v40  ;;  %v963_v60 = vpop.permute.xlu0 %962 }
 0x151   : > { %721 = vrot.lane.b32.xlu1 %v4291_v26, %s5562_s14  ;;  %2909 = vmatprep.mubr.msk.f32.mxu0 %vm1257_vm12, %v1227_v48  ;;  %v1207_v49 = vsel %vm1199_vm10, %v1186_v10, %v963_v60 }
 0x152   : > { %661 = vrot.lane.b32.xlu0 %v4214_v2, %s5564_s16  ;;  %v1082_v2 = vsel %vm1073_vm4, %v3793_v63, %v3987_v7 }
 0x153   : > { %v4328_v45 = vpop.permute.xlu1 %773  ;;  %v1103_v5 = vsel %vm1094_vm5, %v1082_v2, %v4202_v56  ;;  %v750_v56 = vrot.slane %v429_v9, 1 }
 0x154   : > { %v4332_v62 = vpop.permute.xlu0 %536  ;;  %v1124_v11 = vsel %vm1115_vm6, %v1103_v5, %v4216_v3 }
 0x155   : > { %976 = vrot.lane.b32.xlu1 %v513_v25, %s3466_s20  ;;  %v1145_v36 = vsel %vm1136_vm7, %v1124_v11, %v4295_v31  ;;  %v1083_v31 = vsel %vm1073_vm4, %v3796_v0, %v4205_v54  ;;  %v752_v48 = vsel %vm465_vm2, %v750_v56, %v751_v8  ;;  %v431_v54 = vld [vmem:[%s3731_s13 + $0x100] sm:$0x3]  ;;  %v1084_v11 = vsel %vm1073_vm4, %v3955_v51, %v4332_v62 }
 0x156   : > { %912 = vrot.lane.b32.xlu0 %v4298_v32, %s3465_s30  ;;  %v1104_v40 = vsel %vm1094_vm5, %v1083_v31, %v4218_v4  ;;  %v753_v41 = vrot.slane %v431_v54, 1  ;;  %v818_v16 = vrot.slane %v431_v54, 2 }
 0x157   : > { %v1028_v44 = vpop.permute.xlu1 %1027  ;;  %v1125_v60 = vsel %vm1115_vm6, %v1104_v40, %v4302_v57 }
 0x158   : > { %v1228_v19 = vsel %vm1220_vm11, %v1207_v49, %v1028_v44  ;;  %v837_v27 = vpop.permute.xlu0 %836  ;;  %v1146_v15 = vsel %vm1136_vm7, %v1125_v60, %v4328_v45  ;;  %v754_v49 = vsel %vm465_vm2, %v751_v8, %v753_v41 }
 0x159   : > { %787 = vrot.lane.b32.xlu1 %v513_v25, %s3463_s19  ;;  %2910 = vmatmul.mubr.msk.f32.gmra.mxu0 %vm1257_vm12, %v1228_v19  ;;  %v1166_v63 = vsel %vm1157_vm8, %v1145_v36, %v837_v27  ;;  %v1009_v36 = vrot.slane %v433_v43, 2 }
 0x15a   : > { %723 = vrot.lane.b32.xlu0 %v4298_v32, %s5562_s14 }
 0x15b   : > { %v4350_v46 = vpop.permute.xlu1 %647 }
 0x15c   : > { %v4353_v52 = vpop.permute.xlu0 %538 }
 0x15d   : > { %1041 = vrot.lane.b32.xlu1 %v624_v30, %s3467_s17 }
 0x15e   : > { %978 = vrot.lane.b32.xlu0 %v515_v34, %s3466_s20 }
 0x15f   : > { %v899_v47 = vpop.permute.xlu1 %898 }
 0x160   : > { %v839_v21 = vpop.permute.xlu0 %838  ;;  %v1187_v7 = vsel %vm1178_vm9, %v1166_v63, %v899_v47  ;;  %v434_v47 = vld [vmem:[%s3731_s13 + $0x118] sm:$0x3] }
 0x161   : > { %789 = vrot.lane.b32.xlu1 %v515_v34, %s3463_s19 }
 0x162   : > { %552 = vrot.lane.b32.xlu0 %v513_v25, %s5565_s12  ;;  %v1167_v25 = vsel %vm1157_vm8, %v1146_v15, %v839_v21 }
 0x163   : > { %v4360_v58 = vpop.permute.xlu1 %709 }
 0x164   : > { %v4362_v29 = vpop.permute.xlu0 %649 }
 0x165   : > { %1043 = vrot.lane.b32.xlu1 %v626_v50, %s3467_s17 }
 0x166   : > { %852 = vrot.lane.b32.xlu0 %v624_v30, %s5563_s29 }
 0x167   : > { %v965_v38 = vpop.permute.xlu1 %964 }
 0x168   : > { %v901_v61 = vpop.permute.xlu0 %900  ;;  %v1208_v3 = vsel %vm1199_vm10, %v1187_v7, %v965_v38  ;;  %v944_v38 = vrot.slane %v433_v43, 1  ;;  %v1011_v7 = vrot.slane %v434_v47, 2 }
 0x169   : > { %663 = vrot.lane.b32.xlu1 %v624_v30, %s5564_s16  ;;  %v1188_v4 = vsel %vm1178_vm9, %v1167_v25, %v901_v61  ;;  %v819_v30 = vsel %vm576_vm3, %v816_v55, %v818_v16  ;;  %v946_v61 = vrot.slane %v434_v47, 1 }
 0x16a   : > { %554 = vrot.lane.b32.xlu0 %v515_v34, %s5565_s12 }
 0x16b   : > { %v4376_v12 = vpop.permute.xlu1 %775  ;;  %v947_v63 = vsel %vm465_vm2, %v944_v38, %v946_v61 }
 0x16c   : > { %v4381_v1 = vpop.permute.xlu0 %711 }
 0x16d   : > { %914 = vrot.lane.b32.xlu1 %v429_v9, %s3465_s30 }
 0x16e   : > { %854 = vrot.lane.b32.xlu0 %v626_v50, %s5563_s29 }
 0x16f   : > { %v1030_v13 = vpop.permute.xlu1 %1029 }
 0x170   : > { %v1229_v37 = vsel %vm1220_vm11, %v1208_v3, %v1030_v13  ;;  %v967_v39 = vpop.permute.xlu0 %966 }
 0x171   : > { %725 = vrot.lane.b32.xlu1 %v429_v9, %s5562_s14  ;;  %2912 = vmatprep.mubr.msk.f32.mxu0 %vm1257_vm12, %v1229_v37  ;;  %v1209_v57 = vsel %vm1199_vm10, %v1188_v4, %v967_v39  ;;  %v1012_v39 = vsel %vm576_vm3, %v1009_v36, %v1011_v7 }
 0x172   : > { %665 = vrot.lane.b32.xlu0 %v626_v50, %s5564_s16  ;;  %v432_v50 = vld [vmem:[%s3731_s13 + $0x108] sm:$0xff] }
 0x173   : > { %v4400_v42 = vpop.permute.xlu1 %777  ;;  %v943_v5 = vrot.slane %v432_v50, 1  ;;  %v1008_v8 = vrot.slane %v432_v50, 2 }
 0x174   : > { %v4404_v0 = vpop.permute.xlu0 %540 }
 0x175   : > { %980 = vrot.lane.b32.xlu1 %v752_v48, %s3466_s20  ;;  %v945_v13 = vsel %vm465_vm2, %v943_v5, %v944_v38  ;;  %v1010_v40 = vsel %vm576_vm3, %v1008_v8, %v1009_v36 }
 0x176   : > { %916 = vrot.lane.b32.xlu0 %v430_v28, %s3465_s30 }
 0x177   : > { %v1032_v59 = vpop.permute.xlu1 %1031 }
 0x178   : > { %v1230_v10 = vsel %vm1220_vm11, %v1209_v57, %v1032_v59  ;;  %v841_v45 = vpop.permute.xlu0 %840 }
 0x179   : > { %791 = vrot.lane.b32.xlu1 %v752_v48, %s3463_s19  ;;  %2913 = vmatmul.mubr.msk.f32.gmra.mxu0 %vm1257_vm12, %v1230_v10 }
 0x17a   : > { %727 = vrot.lane.b32.xlu0 %v430_v28, %s5562_s14  ;;  %v1105_v28 = vsel %vm1094_vm5, %v1084_v11, %v4350_v46 }
 0x17b   : > { %v4417_v33 = vpop.permute.xlu1 %651  ;;  %v1126_v56 = vsel %vm1115_vm6, %v1105_v28, %v4360_v58 }
 0x17c   : > { %v4420_v44 = vpop.permute.xlu0 %542  ;;  %v1147_v51 = vsel %vm1136_vm7, %v1126_v56, %v4376_v12  ;;  %v1085_v12 = vsel %vm1073_vm4, %v3960_v53, %v4353_v52 }
 0x17d   : > { %1045 = vrot.lane.b32.xlu1 %v817_v17, %s3467_s17  ;;  %v1168_v37 = vsel %vm1157_vm8, %v1147_v51, %v841_v45  ;;  %v1106_v15 = vsel %vm1094_vm5, %v1085_v12, %v4362_v29  ;;  %v4509_v51 = vld [vmem:[%s5541_s2] ss:$0 sm:$0xff] }
 0x17e   : > { %982 = vrot.lane.b32.xlu0 %v754_v49, %s3466_s20  ;;  %v1127_v54 = vsel %vm1115_vm6, %v1106_v15, %v4381_v1 }
 0x17f   : > { %v903_v19 = vpop.permute.xlu1 %902  ;;  %v1148_v4 = vsel %vm1136_vm7, %v1127_v54, %v4400_v42 }
 0x180   : > { %v843_v27 = vpop.permute.xlu0 %842  ;;  %v1189_v46 = vsel %vm1178_vm9, %v1168_v37, %v903_v19  ;;  %v1086_v19 = vsel %vm1073_vm4, %v4006_v20, %v4404_v0  ;;  %v1087_v20 = vsel %vm1073_vm4, %v4011_v22, %v4420_v44 }
 0x181   : > { %856 = vrot.lane.b32.xlu1 %v817_v17, %s5563_s29  ;;  %v1169_v55 = vsel %vm1157_vm8, %v1148_v4, %v843_v27  ;;  %v1107_v27 = vsel %vm1094_vm5, %v1086_v19, %v4417_v33 }
 0x182   : > { %793 = vrot.lane.b32.xlu0 %v754_v49, %s3463_s19 }
 0x183   : > { %v714_v34 = vpop.permute.xlu1 %713 }
 0x184   : > { %v4429_v21 = vpop.permute.xlu0 %653 }
 0x185   : > { %858 = vrot.lane.b32.xlu1 %v819_v30, %s5563_s29  ;;  %v1108_v0 = vsel %vm1094_vm5, %v1087_v20, %v4429_v21 }
 0x186   : > { %1047 = vrot.lane.b32.xlu0 %v819_v30, %s3467_s17  ;;  %v1128_v30 = vsel %vm1115_vm6, %v1107_v27, %v714_v34 }
 0x187   : > { %v969_v2 = vpop.permute.xlu1 %968 }
 0x188   : > { %v905_v9 = vpop.permute.xlu0 %904  ;;  %v1210_v58 = vsel %vm1199_vm10, %v1189_v46, %v969_v2 }
 0x189   : > { %920 = vrot.lane.b32.xlu1 %v433_v43, %s3465_s30  ;;  %v1190_v53 = vsel %vm1178_vm9, %v1169_v55, %v905_v9 }
 0x18a   : > { %918 = vrot.lane.b32.xlu0 %v432_v50, %s3465_s30 }
 0x18b   : > { %v780_v3 = vpop.permute.xlu1 %779 }
 0x18c   : > { %v716_v62 = vpop.permute.xlu0 %715  ;;  %v1149_v47 = vsel %vm1136_vm7, %v1128_v30, %v780_v3 }
 0x18d   : > { %986 = vrot.lane.b32.xlu1 %v947_v63, %s3466_s20  ;;  %v1129_v33 = vsel %vm1115_vm6, %v1108_v0, %v716_v62 }
 0x18e   : > { %984 = vrot.lane.b32.xlu0 %v945_v13, %s3466_s20 }
 0x18f   : > { %v1034_v31 = vpop.permute.xlu1 %1033 }
 0x190   : > { %v1231_v48 = vsel %vm1220_vm11, %v1210_v58, %v1034_v31  ;;  %v971_v60 = vpop.permute.xlu0 %970 }
 0x191   : > { %1051 = vrot.lane.b32.xlu1 %v1012_v39, %s3467_s17  ;;  %2915 = vmatprep.mubr.msk.f32.mxu0 %vm1257_vm12, %v1231_v48  ;;  %v1211_v52 = vsel %vm1199_vm10, %v1190_v53, %v971_v60 }
 0x192   : > { %1049 = vrot.lane.b32.xlu0 %v1010_v40, %s3467_s17 }
 0x193   : > { %v782_v25 = vpop.permute.xlu1 %781 }
 0x194   : > { %v545_v35 = vpop.permute.xlu0 %544  ;;  %v1150_v28 = vsel %vm1136_vm7, %v1129_v33, %v782_v25 }
 0x195   : > { %v1088_v4 = vsel %vm1073_vm4, %v4073_v18, %v545_v35 }
 0x197   : > { %v1036_v57 = vpop.permute.xlu1 %1035 }
 0x198   : > { %v1232_v59 = vsel %vm1220_vm11, %v1211_v52, %v1036_v57  ;;  %v845_v29 = vpop.permute.xlu0 %844 }
 0x199   : > { %2916 = vmatmul.mubr.msk.f32.gmra.mxu0 %vm1257_vm12, %v1232_v59  ;;  %v1170_v38 = vsel %vm1157_vm8, %v1149_v47, %v845_v29 }
 0x19b   : > { %v656_v41 = vpop.permute.xlu1 %655 }
 0x19c   : > { %v4472_v10 = vpop.permute.xlu0 %546  ;;  %v1109_v55 = vsel %vm1094_vm5, %v1088_v4, %v656_v41 }
 0x19d   : > { %v1089_v35 = vsel %vm1073_vm4, %v4076_v24, %v4472_v10 }
 0x19f   : > { %v907_v1 = vpop.permute.xlu1 %906 }
 0x1a0   : > { %v847_v45 = vpop.permute.xlu0 %846  ;;  %v1191_v61 = vsel %vm1178_vm9, %v1170_v38, %v907_v1 }
 0x1a1   : > { %v1171_v63 = vsel %vm1157_vm8, %v1150_v28, %v847_v45 }
 0x1a3   : > { %v718_v17 = vpop.permute.xlu1 %717 }
 0x1a4   : > { %v4474_v42 = vpop.permute.xlu0 %657  ;;  %v1130_v53 = vsel %vm1115_vm6, %v1109_v55, %v718_v17 }
 0x1a5   : > { %v1110_v41 = vsel %vm1094_vm5, %v1089_v35, %v4474_v42 }
 0x1a7   : > { %v973_v49 = vpop.permute.xlu1 %972 }
 0x1a8   : > { %v909_v16 = vpop.permute.xlu0 %908  ;;  %v1212_v2 = vsel %vm1199_vm10, %v1191_v61, %v973_v49 }
 0x1a9   : > { %v1192_v7 = vsel %vm1178_vm9, %v1171_v63, %v909_v16 }
 0x1ab   : > { %v784_v43 = vpop.permute.xlu1 %783 }
 0x1ac   : > { %v720_v50 = vpop.permute.xlu0 %719  ;;  %v1151_v57 = vsel %vm1136_vm7, %v1130_v53, %v784_v43 }
 0x1ad   : > { %v1131_v17 = vsel %vm1115_vm6, %v1110_v41, %v720_v50 }
 0x1af   : > { %v1038_v5 = vpop.permute.xlu1 %1037 }
 0x1b0   : > { %v1233_v9 = vsel %vm1220_vm11, %v1212_v2, %v1038_v5  ;;  %v975_v11 = vpop.permute.xlu0 %974 }
 0x1b1   : > { %2918 = vmatprep.mubr.msk.f32.mxu0 %vm1257_vm12, %v1233_v9  ;;  %v1213_v56 = vsel %vm1199_vm10, %v1192_v7, %v975_v11 }
 0x1b3   : > { %v786_v34 = vpop.permute.xlu1 %785 }
 0x1b4   : > { %v4495_v36 = vpop.permute.xlu0 %548  ;;  %v1152_v27 = vsel %vm1136_vm7, %v1131_v17, %v786_v34 }
 0x1b7   : > { %v1040_v8 = vpop.permute.xlu1 %1039 }
 0x1b8   : > { %v1234_v22 = vsel %vm1220_vm11, %v1213_v56, %v1040_v8  ;;  %v849_v44 = vpop.permute.xlu0 %848 }
 0x1b9   : > { %2919 = vmatmul.mubr.msk.f32.gmra.mxu0 %vm1257_vm12, %v1234_v22  ;;  %v1172_v29 = vsel %vm1157_vm8, %v1151_v57, %v849_v44  ;;  %v1090_v44 = vsel %vm1073_vm4, %v4144_v14, %v4495_v36 }
 0x1bb   : > { %v4502_v21 = vpop.permute.xlu1 %659 }
 0x1bc   : > { %v4504_v3 = vpop.permute.xlu0 %550 }
 0x1bd   : > { %v1091_v14 = vsel %vm1073_vm4, %v4149_v23, %v4504_v3 }
 0x1bf   : > { %v911_v13 = vpop.permute.xlu1 %910 }
 0x1c0   : > { %v851_v62 = vpop.permute.xlu0 %850  ;;  %v1193_v1 = vsel %vm1178_vm9, %v1172_v29, %v911_v13  ;;  %v1111_v13 = vsel %vm1094_vm5, %v1090_v44, %v4502_v21 }
 0x1c1   : > { %v2902_v37 = vpop.f32.mrf.mxu0  ;;  %v1173_v43 = vsel %vm1157_vm8, %v1152_v27, %v851_v62 }
 0x1c2   : > { %v1390_v46 = vadd.f32 %v2902_v37, %v4509_v51 }
 0x1c3   : > { %v722_v39 = vpop.permute.xlu1 %721  ;;  %v1384_v58 = vpop.f32.mrf.mxu0 }
 0x1c4   : > { %v1484_v31 = vmul.f32 0.01, %v1390_v46  ;;  %v1385_v40 = vadd.f32 %v4509_v51, %v1384_v58  ;;  %v4513_v48 = vpop.permute.xlu0 %661  ;;  %v1132_v62 = vsel %vm1115_vm6, %v1111_v13, %v722_v39 }
 0x1c5   : > { %v1112_v36 = vsel %vm1094_vm5, %v1091_v14, %v4513_v48 }
 0x1c6   : > { %v1504_v60 = vmax.f32 %v1390_v46, %v1484_v31  ;;  %v1483_v12 = vmul.f32 0.01, %v1385_v40 }
 0x1c7   : > { %v977_v15 = vpop.permute.xlu1 %976 }
 0x1c8   : > { %1555 = vst.msk [vmem:[#allocation3 + $0x9] sm:$0xff] %vm1094_vm5, %v1504_v60  ;;  %v1503_v54 = vmax.f32 %v1385_v40, %v1483_v12  ;;  %v913_v25 = vpop.permute.xlu0 %912  ;;  %v1214_v45 = vsel %vm1199_vm10, %v1193_v1, %v977_v15 }
 0x1c9   : > { %v1194_v47 = vsel %vm1178_vm9, %v1173_v43, %v913_v25 }
 0x1ca   : > { %1554 = vst.msk [vmem:[#allocation3 + $0x1] sm:$0xff] %vm1094_vm5, %v1503_v54 }
 0x1cb   : > { %v788_v52 = vpop.permute.xlu1 %787 }
 0x1cc   : > { %v724_v59 = vpop.permute.xlu0 %723  ;;  %v1153_v46 = vsel %vm1136_vm7, %v1132_v62, %v788_v52 }
 0x1cd   : > { %v1133_v39 = vsel %vm1115_vm6, %v1112_v36, %v724_v59 }
 0x1cf   : > { %v1042_v49 = vpop.permute.xlu1 %1041 }
 0x1d0   : > { %v1235_v16 = vsel %vm1220_vm11, %v1214_v45, %v1042_v49  ;;  %v979_v18 = vpop.permute.xlu0 %978 }
 0x1d1   : > { %2921 = vmatprep.mubr.msk.f32.mxu0 %vm1257_vm12, %v1235_v16  ;;  %v1215_v38 = vsel %vm1199_vm10, %v1194_v47, %v979_v18 }
 0x1d3   : > { %v790_v19 = vpop.permute.xlu1 %789 }
 0x1d4   : > { %v553_v30 = vpop.permute.xlu0 %552  ;;  %v1154_v4 = vsel %vm1136_vm7, %v1133_v39, %v790_v19 }
 0x1d5   : > { %v1092_v35 = vsel %vm1073_vm4, %v4291_v26, %v553_v30 }
 0x1d7   : > { %v1044_v61 = vpop.permute.xlu1 %1043 }
 0x1d8   : > { %v1236_v24 = vsel %vm1220_vm11, %v1215_v38, %v1044_v61  ;;  %v853_v10 = vpop.permute.xlu0 %852 }
 0x1d9   : > { %2922 = vmatmul.mubr.msk.f32.gmra.mxu0 %vm1257_vm12, %v1236_v24  ;;  %v1174_v31 = vsel %vm1157_vm8, %v1153_v46, %v853_v10 }
 0x1db   : > { %v664_v2 = vpop.permute.xlu1 %663 }
 0x1dc   : > { %v555_v42 = vpop.permute.xlu0 %554  ;;  %v1113_v27 = vsel %vm1094_vm5, %v1092_v35, %v664_v2 }
 0x1dd   : > { %v2905_v5 = vpop.f32.mrf.mxu0  ;;  %v1093_v18 = vsel %vm1073_vm4, %v4298_v32, %v555_v42 }
 0x1de   : > { %v1400_v50 = vadd.f32 %v2905_v5, %v4509_v51 }
 0x1df   : > { %v915_v9 = vpop.permute.xlu1 %914  ;;  %v1394_v11 = vpop.f32.mrf.mxu0 }
 0x1e0   : > { %v1486_v20 = vmul.f32 0.01, %v1400_v50  ;;  %v1395_v0 = vadd.f32 %v4509_v51, %v1394_v11  ;;  %v855_v33 = vpop.permute.xlu0 %854  ;;  %v1195_v40 = vsel %vm1178_vm9, %v1174_v31, %v915_v9 }
 0x1e1   : > { %v1175_v55 = vsel %vm1157_vm8, %v1154_v4, %v855_v33 }
 0x1e2   : > { %v1506_v34 = vmax.f32 %v1400_v50, %v1486_v20  ;;  %v1485_v28 = vmul.f32 0.01, %v1395_v0 }
 0x1e3   : > { %v726_v63 = vpop.permute.xlu1 %725 }
 0x1e4   : > { %1557 = vst.msk [vmem:[#allocation3 + $0x21] sm:$0xff] %vm1094_vm5, %v1506_v34  ;;  %v1505_v7 = vmax.f32 %v1395_v0, %v1485_v28  ;;  %v666_v56 = vpop.permute.xlu0 %665  ;;  %v1134_v38 = vsel %vm1115_vm6, %v1113_v27, %v726_v63 }
 0x1e5   : > { %v1114_v41 = vsel %vm1094_vm5, %v1093_v18, %v666_v56 }
 0x1e6   : > { %1556 = vst.msk [vmem:[#allocation3 + $0x19] sm:$0xff] %vm1094_vm5, %v1505_v7 }
 0x1e7   : > { %v981_v8 = vpop.permute.xlu1 %980 }
 0x1e8   : > { %v917_v22 = vpop.permute.xlu0 %916  ;;  %v1216_v60 = vsel %vm1199_vm10, %v1195_v40, %v981_v8 }
 0x1e9   : > { %v1196_v53 = vsel %vm1178_vm9, %v1175_v55, %v917_v22 }
 0x1eb   : > { %v792_v37 = vpop.permute.xlu1 %791 }
 0x1ec   : > { %v728_v58 = vpop.permute.xlu0 %727  ;;  %v1155_v10 = vsel %vm1136_vm7, %v1134_v38, %v792_v37 }
 0x1ed   : > { %v1135_v43 = vsel %vm1115_vm6, %v1114_v41, %v728_v58 }
 0x1ef   : > { %v1046_v12 = vpop.permute.xlu1 %1045 }
 0x1f0   : > { %v1237_v15 = vsel %vm1220_vm11, %v1216_v60, %v1046_v12  ;;  %v983_v54 = vpop.permute.xlu0 %982 }
 0x1f1   : > { %2924 = vmatprep.mubr.msk.f32.mxu0 %vm1257_vm12, %v1237_v15  ;;  %v1217_v57 = vsel %vm1199_vm10, %v1196_v53, %v983_v54 }
 0x1f3   : > { %v857_v21 = vpop.permute.xlu1 %856 }
 0x1f4   : > { %v794_v25 = vpop.permute.xlu0 %793  ;;  %v1176_v30 = vsel %vm1157_vm8, %v1155_v10, %v857_v21 }
 0x1f5   : > { %v1156_v61 = vsel %vm1136_vm7, %v1135_v43, %v794_v25 }
 0x1f7   : > { %v859_v52 = vpop.permute.xlu1 %858 }
 0x1f8   : > { %v1048_v29 = vpop.permute.xlu0 %1047  ;;  %v1177_v26 = vsel %vm1157_vm8, %v1156_v61, %v859_v52 }
 0x1f9   : > { %v1238_v1 = vsel %vm1220_vm11, %v1217_v57, %v1048_v29  ;;  %v2908_v23 = vpop.f32.mrf.mxu0 }
 0x1fa   : > { %v1410_v3 = vadd.f32 %v2908_v23, %v4509_v51  ;;  %2925 = vmatmul.mubr.msk.f32.gmra.mxu0 %vm1257_vm12, %v1238_v1 }
 0x1fb   : > { %v921_v48 = vpop.permute.xlu1 %920  ;;  %v1404_v59 = vpop.f32.mrf.mxu0 }
 0x1fc   : > { %v1488_v45 = vmul.f32 0.01, %v1410_v3  ;;  %v1405_v49 = vadd.f32 %v4509_v51, %v1404_v59  ;;  %v919_v16 = vpop.permute.xlu0 %918  ;;  %v1198_v42 = vsel %vm1178_vm9, %v1177_v26, %v921_v48 }
 0x1fd   : > { %v1197_v2 = vsel %vm1178_vm9, %v1176_v30, %v919_v16 }
 0x1fe   : > { %v1508_v17 = vmax.f32 %v1410_v3, %v1488_v45  ;;  %v1487_v19 = vmul.f32 0.01, %v1405_v49 }
 0x1ff   : > { %v987_v47 = vpop.permute.xlu1 %986 }
 0x200   : > { %1559 = vst.msk [vmem:[#allocation3 + $0x39] sm:$0xff] %vm1094_vm5, %v1508_v17  ;;  %v1507_v24 = vmax.f32 %v1405_v49, %v1487_v19  ;;  %v985_v32 = vpop.permute.xlu0 %984  ;;  %v1219_v5 = vsel %vm1199_vm10, %v1198_v42, %v987_v47 }
 0x201   : > { %v1218_v9 = vsel %vm1199_vm10, %v1197_v2, %v985_v32 }
 0x202   : > { %1558 = vst.msk [vmem:[#allocation3 + $0x31] sm:$0xff] %vm1094_vm5, %v1507_v24 }
 0x203   : > { %v1052_v50 = vpop.permute.xlu1 %1051 }
 0x204   : > { %v1240_v11 = vsel %vm1220_vm11, %v1219_v5, %v1052_v50  ;;  %v1050_v20 = vpop.permute.xlu0 %1049 }
 0x205   : > { %v1239_v0 = vsel %vm1220_vm11, %v1218_v9, %v1050_v20 }
 0x206   : > { %2927 = vmatprep.mubr.msk.f32.mxu0 %vm1257_vm12, %v1239_v0 }
 0x207   : > { %2928 = vmatmul.mubr.msk.f32.gmra.mxu0 %vm1257_vm12, %v1240_v11 }
 0x219   : > { %v2911_v33 = vpop.f32.mrf.mxu0 }
 0x21a   : > { %v1420_v34 = vadd.f32 %v2911_v33, %v4509_v51 }
 0x21b   : > { %v1414_v28 = vpop.f32.mrf.mxu0 }
 0x21c   : > { %v1490_v63 = vmul.f32 0.01, %v1420_v34  ;;  %v1415_v7 = vadd.f32 %v4509_v51, %v1414_v28 }
 0x21e   : > { %v1510_v56 = vmax.f32 %v1420_v34, %v1490_v63  ;;  %v1489_v8 = vmul.f32 0.01, %v1415_v7 }
 0x220   : > { %1561 = vst.msk [vmem:[#allocation3 + $0x51] sm:$0xff] %vm1094_vm5, %v1510_v56  ;;  %v1509_v22 = vmax.f32 %v1415_v7, %v1489_v8 }
 0x222   : > { %1560 = vst.msk [vmem:[#allocation3 + $0x49] sm:$0xff] %vm1094_vm5, %v1509_v22 }
 0x239   : > { %v2914_v44 = vpop.f32.mrf.mxu0 }
 0x23a   : > { %v1430_v13 = vadd.f32 %v2914_v44, %v4509_v51 }
 0x23b   : > { %v1424_v62 = vpop.f32.mrf.mxu0 }
 0x23c   : > { %v1492_v37 = vmul.f32 0.01, %v1430_v13  ;;  %v1425_v46 = vadd.f32 %v4509_v51, %v1424_v62 }
 0x23e   : > { %v1512_v58 = vmax.f32 %v1430_v13, %v1492_v37  ;;  %v1491_v31 = vmul.f32 0.01, %v1425_v46 }
 0x240   : > { %1563 = vst.msk [vmem:[#allocation3 + $0x69] sm:$0xff] %vm1094_vm5, %v1512_v58  ;;  %v1511_v40 = vmax.f32 %v1425_v46, %v1491_v31 }
 0x242   : > { %1562 = vst.msk [vmem:[#allocation3 + $0x61] sm:$0xff] %vm1094_vm5, %v1511_v40 }
 0x259   : > { %v2917_v60 = vpop.f32.mrf.mxu0 }
 0x25a   : > { %v1440_v12 = vadd.f32 %v2917_v60, %v4509_v51 }
 0x25b   : > { %v1434_v15 = vpop.f32.mrf.mxu0 }
 0x25c   : > { %v1494_v54 = vmul.f32 0.01, %v1440_v12  ;;  %v1435_v14 = vadd.f32 %v4509_v51, %v1434_v15 }
 0x25e   : > { %v1514_v36 = vmax.f32 %v1440_v12, %v1494_v54  ;;  %v1493_v21 = vmul.f32 0.01, %v1435_v14 }
 0x260   : > { %1565 = vst.msk [vmem:[#allocation3 + $0x81] sm:$0xff] %vm1094_vm5, %v1514_v36  ;;  %v1513_v39 = vmax.f32 %v1435_v14, %v1493_v21 }
 0x262   : > { %1564 = vst.msk [vmem:[#allocation3 + $0x79] sm:$0xff] %vm1094_vm5, %v1513_v39 }
 0x279   : > { %v2920_v25 = vpop.f32.mrf.mxu0 }
 0x27a   : > { %v1450_v4 = vadd.f32 %v2920_v25, %v4509_v51 }
 0x27b   : > { %v1444_v55 = vpop.f32.mrf.mxu0 }
 0x27c   : > { %v1496_v53 = vmul.f32 0.01, %v1450_v4  ;;  %v1445_v52 = vadd.f32 %v4509_v51, %v1444_v55 }
 0x27e   : > { %v1516_v57 = vmax.f32 %v1450_v4, %v1496_v53  ;;  %v1495_v29 = vmul.f32 0.01, %v1445_v52 }
 0x280   : > { %1567 = vst.msk [vmem:[#allocation3 + $0x99] sm:$0xff] %vm1094_vm5, %v1516_v57  ;;  %v1515_v1 = vmax.f32 %v1445_v52, %v1495_v29 }
 0x282   : > { %1566 = vst.msk [vmem:[#allocation3 + $0x91] sm:$0xff] %vm1094_vm5, %v1515_v1 }
 0x299   : > { %v2923_v23 = vpop.f32.mrf.mxu0 }
 0x29a   : > { %v1460_v3 = vadd.f32 %v2923_v23, %v4509_v51 }
 0x29b   : > { %v1454_v48 = vpop.f32.mrf.mxu0 }
 0x29c   : > { %v1498_v59 = vmul.f32 0.01, %v1460_v3  ;;  %v1455_v45 = vadd.f32 %v4509_v51, %v1454_v48 }
 0x29e   : > { %v1518_v49 = vmax.f32 %v1460_v3, %v1498_v59  ;;  %v1497_v16 = vmul.f32 0.01, %v1455_v45 }
 0x2a0   : > { %1569 = vst.msk [vmem:[#allocation3 + $0xb1] sm:$0xff] %vm1094_vm5, %v1518_v49  ;;  %v1517_v18 = vmax.f32 %v1455_v45, %v1497_v16 }
 0x2a2   : > { %1568 = vst.msk [vmem:[#allocation3 + $0xa9] sm:$0xff] %vm1094_vm5, %v1517_v18 }
 0x2ba   : > { %v2926_v35 = vpop.f32.mrf.mxu0 }
 0x2bb   : > { %v1470_v41 = vadd.f32 %v2926_v35, %v4509_v51 }
 0x2bc   : > { %v1464_v17 = vpop.f32.mrf.mxu0 }
 0x2bd   : > { %v1500_v19 = vmul.f32 0.01, %v1470_v41  ;;  %v1465_v27 = vadd.f32 %v4509_v51, %v1464_v17 }
 0x2bf   : > { %v1520_v43 = vmax.f32 %v1470_v41, %v1500_v19  ;;  %v1499_v47 = vmul.f32 0.01, %v1465_v27 }
 0x2c1   : > { %1571 = vst.msk [vmem:[#allocation3 + $0xc9] sm:$0xff] %vm1094_vm5, %v1520_v43  ;;  %v1519_v38 = vmax.f32 %v1465_v27, %v1499_v47 }
 0x2c3   : > { %1570 = vst.msk [vmem:[#allocation3 + $0xc1] sm:$0xff] %vm1094_vm5, %v1519_v38 }
 0x2c7   : > { %v2929_v61 = vpop.f32.mrf.mxu0 }
 0x2c8   : > { %v1480_v24 = vadd.f32 %v2929_v61, %v4509_v51 }
 0x2c9   : > { %v1474_v32 = vpop.f32.mrf.mxu0 }
 0x2ca   : > { %v1502_v10 = vmul.f32 0.01, %v1480_v24  ;;  %v1475_v26 = vadd.f32 %v4509_v51, %v1474_v32 }
 0x2cc   : > { %v1522_v30 = vmax.f32 %v1480_v24, %v1502_v10  ;;  %v1501_v42 = vmul.f32 0.01, %v1475_v26  ;;  %1576 = sbr.rel (%p2800_p13) target bundleno = 724 (0x2d4), region = 52 }
 0x2ce   : > { %1573 = vst.msk [vmem:[#allocation3 + $0xe1] sm:$0xff] %vm1094_vm5, %v1522_v30  ;;  %v1521_v2 = vmax.f32 %v1475_v26, %v1501_v42 }
 0x2d0   : > { %1572 = vst.msk [vmem:[#allocation3 + $0xd9] sm:$0xff] %vm1094_vm5, %v1521_v2 }
 0x2d1   : > { %v3469_v5 = vmov 0.0  }
 0x2d2   : > { %1577 = vst.msk [vmem:[#allocation3] sm:$0xff] %vm1094_vm5, %v3469_v5  ;;  %1578 = vst.msk [vmem:[#allocation3 + $0x8] sm:$0xff] %vm1094_vm5, %v3469_v5 }
 0x2d3   : > { %1579 = vst.msk [vmem:[#allocation3 + $0x10] sm:$0x3] %vm1525_vm13, %v3469_v5 }
 0x2d4 PF: > { %p2825_p0 = scmp.ne.s32.totalorder %s3441_s24, 1 }
 0x2d6   : > { %1583 = sbr.rel (%p2825_p0) target bundleno = 734 (0x2de), region = 56 }
 0x2db   : > { %v3470_v51 = vmov 0.0  }
 0x2dc   : > { %1585 = vst.msk [vmem:[#allocation3 + $0xd8] sm:$0xff] %vm1094_vm5, %v3470_v51  ;;  %1586 = vst.msk [vmem:[#allocation3 + $0xe0] sm:$0xff] %vm1094_vm5, %v3470_v51 }
 0x2dd   : > { %1587 = vst.msk [vmem:[#allocation3 + $0xe8] sm:$0x3] %vm1525_vm13, %v3470_v51 }
 0x2de PF: > { %v4628_v50 = vld [vmem:[#allocation3 + $0x50] sm:$0xff]  ;;  %v4630_v9 = vld [vmem:[#allocation3 + $0x60] sm:$0xff]  ;;  %v4632_v11 = vld [vmem:[#allocation3 + $0x38] sm:$0xff]  ;;  %2930 = vmatprep.subr.mxu1 %v3468_v6  ;;  %2249 = vmatprep.subr.mxu0 %v3468_v6  ;;  %s5566_s18 = smov 16   ;;  %s5556_s13 = smov 96   ;;  %vm2148_vm14 = vcmask 654336  }
 0x2df   : > { %v3053_v20 = vpack.i.bf16 %v4630_v9, %v4628_v50  ;;  %v1596_v0 = vld [vmem:[#allocation3 + $0x40] sm:$0x3]  ;;  %v4638_v33 = vld [vmem:[#allocation3 + $0x48] sm:$0xff]  ;;  %v1653_v34 = vrot.slane %v4632_v11, 1  ;;  %v1658_v28 = vrot.slane %v4628_v50, 1  ;;  %v1662_v22 = vrot.slane %v4630_v9, 1 }
 0x2e0   : > { %v4642_v63 = vld [vmem:[#allocation3 + $0x68] sm:$0xff]  ;;  %v1655_v7 = vrot.slane %v1596_v0, 1  ;;  %v1657_v56 = vrot.slane %v4638_v33, 1  ;;  %v1599_v8 = vld [vmem:[#allocation3 + $0x58] sm:$0x3]  ;;  %v1741_v37 = vrot.slane %v4632_v11, 2 }
 0x2e1   : > { %v1663_v44 = vrot.slane %v4642_v63, 1  ;;  %3054 = vrot.lane.b32.xlu1 %v3053_v20, %s3465_s30  ;;  %v1660_v13 = vrot.slane %v1599_v8, 1  ;;  %v1748_v62 = vrot.slane %v1599_v8, 2  ;;  %v1743_v46 = vrot.slane %v1596_v0, 2  ;;  %v4661_v12 = vld [vmem:[#allocation3 + $0x78] sm:$0xff]  ;;  %v4674_v39 = vld [vmem:[#allocation3 + $0x80] sm:$0xff] }
 0x2e2   : > { %v4652_v58 = vsel %vm465_vm2, %v1653_v34, %v1655_v7  ;;  %v4655_v31 = vsel %vm465_vm2, %v1657_v56, %v1658_v28  ;;  %v1745_v60 = vrot.slane %v4638_v33, 2  ;;  %v1602_v15 = vld [vmem:[#allocation3 + $0x70] sm:$0x3]  ;;  %v1746_v21 = vrot.slane %v4628_v50, 2  ;;  %v2214_v49 = vld [vmem:[%s5542_s3 + $0x78] sm:$0xff]  ;;  %v2212_v27 = vld [vmem:[%s5542_s3 + $0x68] sm:$0xff] }
 0x2e3   : > { %v4658_v40 = vsel %vm465_vm2, %v1662_v22, %v1663_v44  ;;  %v3058_v54 = vpack.i.bf16 %v4655_v31, %v4652_v58  ;;  %v4666_v14 = vsel %vm465_vm2, %v1658_v28, %v1660_v13  ;;  %v4671_v36 = vsel %vm576_vm3, %v1741_v37, %v1743_v46  ;;  %v2213_v16 = vld [vmem:[%s5542_s3 + $0x70] sm:$0xff]  ;;  %2948 = vmatpush1.msra.mxu1 %v2214_v49  ;;  %v4716_v43 = vld [vmem:[#allocation3 + $0x88] sm:$0x3]  ;;  %v4720_v38 = vld [vmem:[#allocation3 + $0x98] sm:$0xff]  ;;  %s3472_s29 = smov 80   ;;  %s5558_s16 = smov 112  }
 0x2e4   : > { %v3068_v25 = vpack.i.bf16 %v4658_v40, %v4666_v14  ;;  %v1750_v4 = vrot.slane %v4630_v9, 2  ;;  %v1751_v55 = vrot.slane %v4642_v63, 2  ;;  %v4682_v53 = vsel %vm576_vm3, %v1745_v60, %v1746_v21  ;;  %2931 = vmatprep.subr.mxu1 %v3468_v6  ;;  %v4718_v47 = vld [vmem:[#allocation3 + $0x90] sm:$0xff]  ;;  %v2211_v24 = vld [vmem:[%s5542_s3 + $0x60] sm:$0xff]  ;;  %v4743_v42 = vld [vmem:[%s5542_s3 + $0x58] sm:$0xff]  ;;  %2250 = vmatpush1.msra.mxu0 %v2214_v49  ;;  %s5567_s14 = smov 96  }
 0x2e5   : > { %3059 = vrot.lane.b32.xlu0 %v3058_v54, %s5566_s18  ;;  %v3078_v52 = vpack.i.bf16 %v4661_v12, %v4642_v63  ;;  %v4687_v57 = vsel %vm576_vm3, %v1746_v21, %v1748_v62  ;;  %v1665_v29 = vrot.slane %v1602_v15, 1  ;;  %v3063_v1 = vpack.i.bf16 %v4682_v53, %v4671_v36  ;;  %2949 = vmatpush1.msra.mxu1 %v2213_v16  ;;  %v4752_v2 = vld [vmem:[%s5542_s3 + $0x50] sm:$0xff]  ;;  %v4769_v0 = vld [vmem:[%s5542_s3 + $0x48] sm:$0xff]  ;;  %v4777_v28 = vld [vmem:[%s5542_s3 + $0x40] sm:$0xff]  ;;  %s5568_s12 = smov 112  }
 0x2e6   : > { %3069 = vrot.lane.b32.xlu1 %v3068_v25, %s3467_s17  ;;  %v4693_v23 = vsel %vm576_vm3, %v1750_v4, %v1751_v55  ;;  %v1667_v3 = vrot.slane %v4661_v12, 1  ;;  %v1668_v48 = vrot.slane %v4674_v39, 1  ;;  %v1753_v59 = vrot.slane %v1602_v15, 2  ;;  %2932 = vmatprep.subr.mxu1 %v3468_v6  ;;  %v4793_v8 = vld [vmem:[%s5542_s3 + $0x38] sm:$0xff]  ;;  %v4800_v22 = vld [vmem:[%s5542_s3 + $0x30] sm:$0xff]  ;;  %v4805_v13 = vld [vmem:[#allocation3 + $0x8] sm:$0xff] }
 0x2e7   : > { %v3073_v45 = vpack.i.bf16 %v4693_v23, %v4687_v57  ;;  %v1666_v18 = vsel %vm465_vm2, %v1663_v44, %v1665_v29  ;;  %v1755_v17 = vrot.slane %v4661_v12, 2  ;;  %v1756_v19 = vrot.slane %v4674_v39, 2  ;;  %2950 = vmatpush1.msra.mxu1 %v2212_v27  ;;  %2251 = vmatprep.subr.mxu0 %v3468_v6  ;;  %v4803_v44 = vld [vmem:[#allocation3] sm:$0xff]  ;;  %v4813_v62 = vld [vmem:[%s5542_s3 + $0x28] sm:$0xff] }
 0x2e8   : > { %v1669_v35 = vsel %vm465_vm2, %v1667_v3, %v1668_v48  ;;  %v1754_v41 = vsel %vm576_vm3, %v1751_v55, %v1753_v59  ;;  %v1670_v10 = vrot.slane %v4716_v43, 1  ;;  %v1672_v26 = vrot.slane %v4718_v47, 1  ;;  %2933 = vmatprep.subr.mxu1 %v3468_v6  ;;  %2252 = vmatpush1.msra.mxu0 %v2213_v16  ;;  %v4816_v46 = vld [vmem:[#allocation3 + $0xa8] sm:$0xff]  ;;  %v4821_v21 = vld [vmem:[#allocation3 + $0xa0] sm:$0x3]  ;;  %v4826_v55 = vld [vmem:[#allocation3 + $0xb0] sm:$0xff] }
 0x2e9   : > { %3064 = vrot.lane.b32.xlu0 %v3063_v1, %s3463_s19  ;;  %2831 = vmatprep.mubr.msk.f32.mxu1 %vm1094_vm5, %v1754_v41  ;;  %v4724_v61 = vpack.i.bf16 %v1669_v35, %v1666_v18  ;;  %v4734_v32 = vsel %vm576_vm3, %v1755_v17, %v1756_v19  ;;  %v1673_v30 = vrot.slane %v4720_v38, 1  ;;  %v3113_v56 = vpack.i.bf16 %v4718_v47, %v4674_v39  ;;  %v4845_v3 = vld [vmem:[%s5542_s3 + $0x18] sm:$0xff]  ;;  %v4866_v18 = vld [vmem:[%s5542_s3 + $0x10] sm:$0xff] }
 0x2ea   : > { %3079 = vrot.lane.b32.xlu1 %v3078_v52, %s5556_s13  ;;  %2951 = vmatpush1.msra.mxu1 %v2211_v24  ;;  %v3108_v5 = vpack.i.bf16 %v4734_v32, %v1754_v41  ;;  %v4758_v51 = vsel %vm465_vm2, %v1668_v48, %v1670_v10  ;;  %v1758_v60 = vrot.slane %v4716_v43, 2  ;;  %v1760_v15 = vrot.slane %v4718_v47, 2  ;;  %v1590_v35 = vld [vmem:[#allocation3 + $0x10] sm:$0x3] }
 0x2eb   : > { %2934 = vmatprep.subr.mxu1 %v3468_v6  ;;  %v4763_v20 = vsel %vm465_vm2, %v1672_v26, %v1673_v30  ;;  %2253 = vmatprep.subr.mxu0 %v3468_v6  ;;  %v1761_v54 = vrot.slane %v4720_v38, 2  ;;  %v1643_v4 = vrot.slane %v4805_v13, 1  ;;  %v3148_v29 = vpack.i.bf16 %v4816_v46, %v4720_v38 }
 0x2ec   : > { %2952 = vmatpush1.msra.mxu1 %v4743_v42  ;;  %v3118_v7 = vpack.i.bf16 %v4763_v20, %v4758_v51  ;;  %2254 = vmatpush1.msra.mxu0 %v2212_v27  ;;  %v1675_v1 = vrot.slane %v4821_v21, 1  ;;  %v4851_v48 = vsel %vm576_vm3, %v1756_v19, %v1758_v60  ;;  %v1678_v49 = vrot.slane %v4826_v55, 1  ;;  %v4881_v19 = vld [vmem:[%s5542_s3 + $0x8] sm:$0xff] }
 0x2ed   : > { %3074 = vrot.lane.b32.xlu0 %v3073_v45, %s3472_s29  ;;  %2935 = vmatprep.subr.mxu1 %v3468_v6  ;;  %v4856_v59 = vsel %vm576_vm3, %v1760_v15, %v1761_v54  ;;  %v1731_v10 = vrot.slane %v4805_v13, 2  ;;  %v1645_v26 = vrot.slane %v1590_v35, 1  ;;  %vm2165_vm15 = vcmask 785408  }
 0x2ee   : > { %3089 = vrot.lane.b32.xlu1 %v3068_v25, %s5566_s18  ;;  %2953 = vmatpush1.msra.mxu1 %v4752_v2  ;;  %v1642_v25 = vrot.slane %v4803_v44, 1  ;;  %v3143_v41 = vpack.i.bf16 %v4856_v59, %v4851_v48  ;;  %v1676_v17 = vsel %vm465_vm2, %v1673_v30, %v1675_v1  ;;  %v4895_v30 = vld [vmem:[#allocation3 + $0x20] sm:$0xff]  ;;  %v1733_v1 = vrot.slane %v1590_v35, 2 }
 0x2ef   : > { %2936 = vmatprep.subr.mxu1 %v3468_v6  ;;  %2255 = vmatprep.subr.mxu0 %v3468_v6  ;;  %v1648_v15 = vrot.slane %v4895_v30, 1  ;;  %v1736_v35 = vrot.slane %v4895_v30, 2  ;;  %vm2182_vm0 = vcmask 916480  }
 0x2f0   : > { %2954 = vmatpush1.msra.mxu1 %v4769_v0  ;;  %2256 = vmatpush1.msra.mxu0 %v2211_v24  ;;  %v1644_v16 = vsel %vm465_vm2, %v1642_v25, %v1643_v4  ;;  %v1730_v24 = vrot.slane %v4803_v44, 2 }
 0x2f1   : > { %3084 = vrot.lane.b32.xlu0 %v4724_v61, %s5558_s16  ;;  %2937 = vmatprep.subr.mxu1 %v3468_v6  ;;  %v3158_v27 = vpack.i.bf16 %v4758_v51, %v1644_v16 }
 0x2f2   : > { %3099 = vrot.lane.b32.xlu1 %v3078_v52, %s3465_s30  ;;  %2955 = vmatpush1.msra.mxu1 %v4777_v28  ;;  %v4832_v52 = vld [vmem:[%s5542_s3 + $0x20] sm:$0xff] }
 0x2f3   : > { %2938 = vmatprep.subr.mxu1 %v3468_v6  ;;  %2257 = vmatprep.subr.mxu0 %v3468_v6 }
 0x2f4   : > { %2956 = vmatpush1.msra.mxu1 %v4793_v8  ;;  %2258 = vmatpush1.msra.mxu0 %v4743_v42  ;;  %v4901_v42 = vld [vmem:[%s5542_s3] sm:$0xff] }
 0x2f5   : > { %3094 = vrot.lane.b32.xlu0 %v3073_v45, %s3463_s19  ;;  %2939 = vmatprep.subr.mxu1 %v3468_v6  ;;  %v1677_v45 = vrot.slane %v4816_v46, 1 }
 0x2f6   : > { %3109 = vrot.lane.b32.xlu1 %v3108_v5, %s3472_s29  ;;  %2957 = vmatpush1.msra.mxu1 %v4800_v22 }
 0x2f7   : > { %2940 = vmatprep.subr.mxu1 %v3468_v6  ;;  %2259 = vmatprep.subr.mxu0 %v3468_v6  ;;  %v4888_v43 = vsel %vm465_vm2, %v1677_v45, %v1678_v49  ;;  %v4929_v45 = vld [vmem:[%s5542_s3 + $0x80] sm:$0xff] }
 0x2f8   : > { %2958 = vmatpush1.msra.mxu1 %v4813_v62  ;;  %2260 = vmatpush1.msra.mxu0 %v4752_v2  ;;  %v1732_v2 = vsel %vm576_vm3, %v1730_v24, %v1731_v10 }
 0x2f9   : > { %3104 = vrot.lane.b32.xlu0 %v4724_v61, %s3467_s17  ;;  %2941 = vmatprep.subr.mxu1 %v3468_v6  ;;  %v3163_v16 = vpack.i.bf16 %v4851_v48, %v1732_v2 }
 0x2fa   : > { %3119 = vrot.lane.b32.xlu1 %v3118_v7, %s5558_s16  ;;  %2959 = vmatpush1.msra.mxu1 %v4832_v52 }
 0x2fb   : > { %2942 = vmatprep.subr.mxu1 %v3468_v6  ;;  %2261 = vmatprep.subr.mxu0 %v3468_v6 }
 0x2fc   : > { %2960 = vmatpush1.msra.mxu1 %v4845_v3  ;;  %2262 = vmatpush1.msra.mxu0 %v4769_v0 }
 0x2fd   : > { %3114 = vrot.lane.b32.xlu0 %v3113_v56, %s5567_s14  ;;  %2943 = vmatprep.subr.mxu1 %v3468_v6 }
 0x2fe   : > { %3129 = vrot.lane.b32.xlu1 %v3108_v5, %s3463_s19  ;;  %2961 = vmatpush1.msra.mxu1 %v4866_v18  ;;  %v3153_v5 = vpack.i.bf16 %v4888_v43, %v1676_v17 }
 0x2ff   : > { %2944 = vmatprep.subr.mxu1 %v3468_v6  ;;  %2263 = vmatprep.subr.mxu0 %v3468_v6 }
 0x300   : > { %2962 = vmatpush1.msra.mxu1 %v4881_v19  ;;  %2264 = vmatpush1.msra.mxu0 %v4777_v28 }
 0x301   : > { %3124 = vrot.lane.b32.xlu0 %v4724_v61, %s5566_s18  ;;  %v4890_v61 = vld [vmem:[#allocation3 + $0x18] sm:$0xff]  ;;  %2945 = vmatprep.subr.mxu1 %v3468_v6 }
 0x302   : > { %3139 = vrot.lane.b32.xlu1 %v3118_v7, %s3467_s17  ;;  %v3168_v51 = vpack.i.bf16 %v4720_v38, %v4890_v61  ;;  %v4910_v7 = vld [vmem:[#allocation3 + $0x30] sm:$0xff]  ;;  %v1647_v60 = vrot.slane %v4890_v61, 1  ;;  %2963 = vmatpush1.msra.mxu1 %v4901_v42 }
 0x303   : > { %v1740_v25 = vrot.slane %v4910_v7, 2  ;;  %2946 = vmatprep.subr.mxu1 %v3468_v6  ;;  %2265 = vmatprep.subr.mxu0 %v3468_v6 }
 0x304   : > { %v1649_v0 = vsel %vm465_vm2, %v1647_v60, %v1648_v15  ;;  %2266 = vmatpush1.msra.mxu0 %v4793_v8 }
 0x305   : > { %3134 = vrot.lane.b32.xlu0 %v3113_v56, %s3465_s30  ;;  %v4916_v56 = vld [vmem:[%s5542_s3 + $0x88] sm:$0xff]  ;;  %v4946_v24 = vsel %vm576_vm3, %v1740_v25, %v1741_v37  ;;  %2267 = vmatprep.subr.mxu0 %v3468_v6  ;;  %v1765_v25 = vrot.slane %v4816_v46, 2 }
 0x306   : > { %3149 = vrot.lane.b32.xlu1 %v3148_v29, %s5567_s14  ;;  %v1646_v29 = vsel %vm465_vm2, %v1643_v4, %v1645_v26  ;;  %2964 = vmatpush2.msra.mxu1 %v4916_v56  ;;  %v1735_v4 = vrot.slane %v4890_v61, 2  ;;  %v1734_v26 = vsel %vm576_vm3, %v1731_v10, %v1733_v1 }
 0x307   : > { %2947 = vmatprep.subr.mxu1 %v3468_v6  ;;  %2826 = vmatprep.mubr.msk.f32.mxu0 %vm1094_vm5, %v4946_v24  ;;  %v3188_v37 = vpack.i.bf16 %v4856_v59, %v1734_v26 }
 0x308   : > { %2965 = vmatpush2.msra.mxu1 %v4929_v45  ;;  %2268 = vmatpush1.msra.mxu0 %v4800_v22 }
 0x309   : > { %3144 = vrot.lane.b32.xlu0 %v3143_v41, %s3472_s29  ;;  %v3178_v41 = vpack.i.bf16 %v4763_v20, %v1646_v29  ;;  %v3173_v20 = vpack.i.bf16 %v1676_v17, %v1649_v0  ;;  %2269 = vmatprep.subr.mxu0 %v3468_v6  ;;  %v1652_v17 = vrot.slane %v4910_v7, 1  ;;  %v1766_v29 = vrot.slane %v4826_v55, 2  ;;  %v1614_v0 = vld [vmem:[#allocation3 + $0xd0] sm:$0x3] }
 0x30a   : > { %3159 = vrot.lane.b32.xlu1 %v3158_v27, %s5566_s18  ;;  %v1763_v27 = vrot.slane %v4821_v21, 2  ;;  %v1737_v21 = vsel %vm576_vm3, %v1735_v4, %v1736_v35  ;;  %2270 = vmatpush1.msra.mxu0 %v4813_v62  ;;  %v3193_v62 = vpack.i.bf16 %v4826_v55, %v4910_v7 }
 0x30b   : > { %2271 = vmatprep.subr.mxu0 %v3468_v6  ;;  %v1654_v1 = vsel %vm465_vm2, %v1652_v17, %v1653_v34  ;;  %v4995_v4 = vsel %vm576_vm3, %v1765_v25, %v1766_v29  ;;  %v1925_v25 = vrot.slane %v1614_v0, 2 }
 0x30c   : > { %v4962_v28 = vsel %vm576_vm3, %v1761_v54, %v1763_v27  ;;  %v3198_v54 = vpack.i.bf16 %v4816_v46, %v4895_v30  ;;  %2272 = vmatpush1.msra.mxu0 %v4832_v52 }
 0x30d   : > { %3154 = vrot.lane.b32.xlu0 %v3153_v5, %s5568_s12  ;;  %v1593_v5 = vld [vmem:[#allocation3 + $0x28] sm:$0x3]  ;;  %v3183_v8 = vpack.i.bf16 %v4962_v28, %v1737_v21  ;;  %2273 = vmatprep.subr.mxu0 %v3468_v6  ;;  %v1615_v21 = vld [vmem:[#allocation3 + $0xd8] sm:$0xff] }
 0x30e   : > { %3169 = vrot.lane.b32.xlu1 %v3168_v51, %s3465_s30  ;;  %v1650_v10 = vrot.slane %v1593_v5, 1  ;;  %v1611_v51 = vld [vmem:[#allocation3 + $0xb8] sm:$0x3]  ;;  %v1738_v60 = vrot.slane %v1593_v5, 2  ;;  %2274 = vmatpush1.msra.mxu0 %v4845_v3  ;;  %v1612_v3 = vld [vmem:[#allocation3 + $0xc0] sm:$0xff] }
 0x30f   : > { %v1680_v2 = vrot.slane %v1611_v51, 1  ;;  %2275 = vmatprep.subr.mxu0 %v3468_v6  ;;  %v1922_v27 = vrot.slane %v1612_v3, 2 }
 0x310   : > { %v1651_v22 = vsel %vm465_vm2, %v1648_v15, %v1650_v10  ;;  %2276 = vmatpush1.msra.mxu0 %v4866_v18  ;;  %v3228_v18 = vpack.i.bf16 %v1612_v3, %v4632_v11  ;;  %v5034_v10 = vld [vmem:[#allocation3 + $0xe0] sm:$0xff] }
 0x311   : > { %3164 = vrot.lane.b32.xlu0 %v3163_v16, %s3463_s19  ;;  %v3208_v15 = vpack.i.bf16 %v4888_v43, %v1651_v22  ;;  %v1681_v52 = vsel %vm465_vm2, %v1678_v49, %v1680_v2  ;;  %v1739_v16 = vsel %vm576_vm3, %v1736_v35, %v1738_v60  ;;  %2277 = vmatprep.subr.mxu0 %v3468_v6  ;;  %v1869_v43 = vrot.slane %v1612_v3, 1 }
 0x312   : > { %3179 = vrot.lane.b32.xlu1 %v3178_v41, %s5566_s18  ;;  %v1613_v41 = vld [vmem:[#allocation3 + $0xc8] sm:$0xff]  ;;  %v3203_v34 = vpack.i.bf16 %v1681_v52, %v1654_v1  ;;  %2278 = vmatpush1.msra.mxu0 %v4881_v19  ;;  %v3218_v49 = vpack.i.bf16 %v4995_v4, %v1739_v16  ;;  %v2026_v2 = vrot.slane %v1615_v21, 1  ;;  %v2027_v22 = vrot.slane %v5034_v10, 1 }
 0x313   : > { %2279 = vmatprep.subr.mxu0 %v3468_v6  ;;  %v1870_v35 = vrot.slane %v1613_v41, 1  ;;  %v1923_v26 = vrot.slane %v1613_v41, 2  ;;  %v3263_v5 = vpack.i.bf16 %v1613_v41, %v4638_v33  ;;  %v3298_v60 = vpack.i.bf16 %v1615_v21, %v4628_v50 }
 0x314   : > { %2280 = vmatpush1.msra.mxu0 %v4901_v42  ;;  %v3323_v3 = vpack.i.bf16 %v5034_v10, %v4630_v9 }
 0x315   : > { %3174 = vrot.lane.b32.xlu0 %v3173_v20, %s3467_s17  ;;  %2309 = vmatprep.subr.mxu0 %v3468_v6  ;;  %v1871_v19 = vsel %vm465_vm2, %v1869_v43, %v1870_v35 }
 0x316   : > { %3189 = vrot.lane.b32.xlu1 %v3188_v37, %s3463_s19  ;;  %2310 = vmatpush2.msra.mxu0 %v4916_v56  ;;  %v3238_v42 = vpack.i.bf16 %v1871_v19, %v4652_v58  ;;  %v1768_v56 = vrot.slane %v1611_v51, 2  ;;  %v1872_v58 = vrot.slane %v1614_v0, 1  ;;  %v5032_v37 = vsel %vm576_vm3, %v1922_v27, %v1923_v26 }
 0x317   : > { %2311 = vmatprep.subr.mxu0 %v3468_v6  ;;  %v2080_v51 = vrot.slane %v5034_v10, 2 }
 0x318   : > { %2312 = vmatpush2.msra.mxu0 %v4929_v45  ;;  %v5021_v6 = vsel %vm576_vm3, %v1766_v29, %v1768_v56  ;;  %v5052_v29 = vld [vmem:[#allocation3 + $0xe8] sm:$0x3] }
 0x319   : > { %3184 = vrot.lane.b32.xlu0 %v3183_v8, %s3472_s29  ;;  %v3253_v45 = vpack.i.bf16 %v5021_v6, %v4946_v24  ;;  %v2079_v24 = vrot.slane %v1615_v21, 2  ;;  %v2029_v1 = vrot.slane %v5052_v29, 1 }
 0x31a   : > { %3199 = vrot.lane.b32.xlu1 %v3198_v54, %s3465_s30  ;;  %v3288_v54 = vpack.i.bf16 %v5032_v37, %v4671_v36 }
 0x31b   : > { %v5045_v17 = vsel %vm576_vm3, %v2079_v24, %v2080_v51  ;;  %v2030_v16 = vsel %vm465_vm2, %v2027_v22, %v2029_v1 }
 0x31d   : > { %3194 = vrot.lane.b32.xlu0 %v3193_v62, %s5567_s14 }
 0x31e   : > { %3209 = vrot.lane.b32.xlu1 %v3208_v15, %s3467_s17 }
 0x321   : > { %3204 = vrot.lane.b32.xlu0 %v3203_v34, %s5568_s12 }
 0x322   : > { %3219 = vrot.lane.b32.xlu1 %v3218_v49, %s3472_s29 }
 0x325   : > { %3214 = vrot.lane.b32.xlu0 %v3173_v20, %s5566_s18  ;;  %v1873_v20 = vsel %vm465_vm2, %v1870_v35, %v1872_v58 }
 0x326   : > { %3229 = vrot.lane.b32.xlu1 %v3228_v18, %s5567_s14 }
 0x329   : > { %3224 = vrot.lane.b32.xlu0 %v3183_v8, %s3463_s19  ;;  %v3273_v8 = vpack.i.bf16 %v1873_v20, %v4655_v31  ;;  %v2028_v31 = vsel %vm465_vm2, %v2026_v2, %v2027_v22 }
 0x32a   : > { %3239 = vrot.lane.b32.xlu1 %v3238_v42, %s5568_s12 }
 0x32d   : > { %3234 = vrot.lane.b32.xlu0 %v3193_v62, %s3465_s30  ;;  %v3308_v62 = vpack.i.bf16 %v2028_v31, %v4666_v14  ;;  %v3328_v14 = vpack.i.bf16 %v2030_v16, %v4658_v40 }
 0x32e   : > { %3249 = vrot.lane.b32.xlu1 %v3208_v15, %s5566_s18  ;;  %v5058_v15 = vsel %vm576_vm3, %v1923_v26, %v1925_v25 }
 0x32f   : > { %v3318_v52 = vpack.i.bf16 %v5058_v15, %v4682_v53 }
 0x331   : > { %3244 = vrot.lane.b32.xlu0 %v3203_v34, %s3467_s17 }
 0x332   : > { %3259 = vrot.lane.b32.xlu1 %v3218_v49, %s3463_s19 }
 0x335   : > { %3254 = vrot.lane.b32.xlu0 %v3253_v45, %s3472_s29 }
 0x336   : > { %3269 = vrot.lane.b32.xlu1 %v3228_v18, %s3465_s30 }
 0x339   : > { %3264 = vrot.lane.b32.xlu0 %v3263_v5, %s5567_s14 }
 0x33a   : > { %3279 = vrot.lane.b32.xlu1 %v3238_v42, %s3467_s17 }
 0x33d   : > { %3274 = vrot.lane.b32.xlu0 %v3273_v8, %s5568_s12 }
 0x33e   : > { %3289 = vrot.lane.b32.xlu1 %v3288_v54, %s3472_s29 }
 0x341   : > { %3284 = vrot.lane.b32.xlu0 %v3203_v34, %s5566_s18  ;;  %s3474_s18 = smov [#allocation4]  }
 0x342   : > { %3299 = vrot.lane.b32.xlu1 %v3298_v60, %s5567_s14 }
 0x345   : > { %3294 = vrot.lane.b32.xlu0 %v3253_v45, %s3463_s19  ;;  %s5569_s19 = sand.u32 1, %s3433_s22  }
 0x346   : > { %3309 = vrot.lane.b32.xlu1 %v3308_v62, %s5568_s12 }
 0x349   : > { %3304 = vrot.lane.b32.xlu0 %v3263_v5, %s3465_s30  ;;  %s5487_s30 = scalar_lea.sflag [#allocation5], %s5569_s19 }
 0x34a   : > { %3319 = vrot.lane.b32.xlu1 %v3318_v52, %s3472_s29  ;;  %s2852_s29 = sshll.u32 %s3441_s24, 4 }
 0x34d   : > { %3314 = vrot.lane.b32.xlu0 %v3273_v8, %s3467_s17 }
 0x34e   : > { %3329 = vrot.lane.b32.xlu1 %v3328_v14, %s5568_s12 }
 0x351   : > { %3324 = vrot.lane.b32.xlu0 %v3323_v3, %s5567_s14  ;;  %s2847_s14 = sshll.u32 %s3445_s25, 5  ;;  %s2714_s25 = sshll.u32 %s3592_s9, 4  ;;  %s5481_s25 = int_to_ptr.vmem [resolvable:$true] %s2714_s25 }
 0x352   : > { %s2711_s13 = sadd.s32 %s2852_s29, %s2847_s14  ;;  %s3365_s17 = scalar_lea.vmem %s5481_s25, 2048 }
 0x353   : > { %v3055_v41 = vpop.permute.xlu1 %3054  ;;  %s2848_s24 = sshll.u32 %s2711_s13, 7  ;;  %p3366_p1 = scmp.ne.s32.totalorder %s5481_s25, %s3365_s17 }
 0x354   : > { %v3056_v40 = vunpack.i.l.bf16 %v3055_v41  ;;  %v3057_v27 = vunpack.i.h.bf16 %v3055_v41  ;;  %s5479_s12 = scalar_lea.hbm %s5545_s6, %s2848_s24  ;;  %s3369_s29 = sshll.u32 %s3474_s18, 4  ;;  %s3370_s29 = int_to_ptr.vmem [resolvable:$false] %s3369_s29 }
 0x355   : > { %p3367_p2 = pnand %p3366_p1, %p3562_p3  ;;  %s3371_s14 = scalar_lea.vmem %s3370_s29, 4096 }
 0x356   : > { %p3372_p5 = scmp.lt.s32.totalorder %s5481_s25, %s3370_s29  ;;  %p3373_p6 = scmp.lt.s32.totalorder %s3371_s14, %s3365_s17 }
 0x357   : > { %v3060_v34 = vpop.permute.xlu0 %3059  ;;  %p3368_p4 = pneg %p3367_p2 }
 0x358   : > { %v3070_v49 = vpop.permute.xlu1 %3069  ;;  %v3062_v43 = vunpack.i.h.bf16 %v3060_v34  ;;  %v3061_v35 = vunpack.i.l.bf16 %v3060_v34  ;;  %p3374_p7 = por %p3373_p6, %p3372_p5 }
 0x359   : > { %v3071_v19 = vunpack.i.l.bf16 %v3070_v49  ;;  %v3072_v20 = vunpack.i.h.bf16 %v3070_v49 }
 0x35a   : > { %v2090_v45 = vsel %vm1094_vm5, %v4638_v33, %v3062_v43  ;;  %v2089_v58 = vsel %vm1094_vm5, %v4632_v11, %v3061_v35  ;;  %p3375_p9 = pnand %p3374_p7, %p3368_p4 }
 0x35b   : > { %v3065_v18 = vpop.permute.xlu0 %3064 }
 0x35c   : > { %v3067_v42 = vunpack.i.h.bf16 %v3065_v18  ;;  %v3066_v56 = vunpack.i.l.bf16 %v3065_v18  ;;  %v3080_v0 = vpop.permute.xlu1 %3079 }
 0x35d   : > { %v3081_v33 = vunpack.i.l.bf16 %v3080_v0  ;;  %v3082_v52 = vunpack.i.h.bf16 %v3080_v0 }
 0x35e   : > { %v2105_v26 = vsel %vm1136_vm7, %v2089_v58, %v3066_v56  ;;  %v2106_v5 = vsel %vm1136_vm7, %v2090_v45, %v3067_v42 }
 0x35f   : > { %v2121_v21 = vsel %vm1178_vm9, %v2105_v26, %v3056_v40  ;;  %v3075_v24 = vpop.permute.xlu0 %3074  ;;  %v2122_v8 = vsel %vm1178_vm9, %v2106_v5, %v3057_v27 }
 0x360   : > { %v2137_v54 = vsel %vm1220_vm11, %v2121_v21, %v3071_v19  ;;  %v3076_v2 = vunpack.i.l.bf16 %v3075_v24  ;;  %v3090_v22 = vpop.permute.xlu1 %3089  ;;  %v3077_v60 = vunpack.i.h.bf16 %v3075_v24  ;;  %v2138_v31 = vsel %vm1220_vm11, %v2122_v8, %v3072_v20 }
 0x361   : > { %v3091_v16 = vunpack.i.l.bf16 %v3090_v22  ;;  %v3092_v49 = vunpack.i.h.bf16 %v3090_v22 }
 0x362   : > { %v2154_v11 = vsel %vm2148_vm14, %v2137_v54, %v3076_v2  ;;  %v2155_v34 = vsel %vm2148_vm14, %v2138_v31, %v3077_v60 }
 0x363   : > { %v3085_v25 = vpop.permute.xlu0 %3084  ;;  %v2171_v14 = vsel %vm2165_vm15, %v2154_v11, %v3081_v33  ;;  %v2091_v42 = vsel %vm1094_vm5, %v4628_v50, %v3091_v16  ;;  %v2172_v0 = vsel %vm2165_vm15, %v2155_v34, %v3082_v52  ;;  %v2092_v58 = vsel %vm1094_vm5, %v4630_v9, %v3092_v49 }
 0x364   : > { %v3086_v62 = vunpack.i.l.bf16 %v3085_v25  ;;  %v3100_v1 = vpop.permute.xlu1 %3099  ;;  %v3087_v3 = vunpack.i.h.bf16 %v3085_v25 }
 0x365   : > { %v3101_v56 = vunpack.i.l.bf16 %v3100_v1  ;;  %v3102_v27 = vunpack.i.h.bf16 %v3100_v1 }
 0x366   : > { %v2188_v41 = vsel %vm2182_vm0, %v2171_v14, %v3086_v62  ;;  %v2189_v45 = vsel %vm2182_vm0, %v2172_v0, %v3087_v3 }
 0x367   : > { %v3095_v43 = vpop.permute.xlu0 %3094  ;;  %2339 = vmatmul.mubr.f32.vlgmr.msra.gmra.mxu1 %v2188_v41 }
 0x368   : > { %v3097_v35 = vunpack.i.h.bf16 %v3095_v43  ;;  %v3096_v18 = vunpack.i.l.bf16 %v3095_v43  ;;  %v3110_v19 = vpop.permute.xlu1 %3109  ;;  %2832 = vmatprep.mubr.msk.f32.mxu1 %vm1094_vm5, %v4734_v32 }
 0x369   : > { %v3111_v50 = vunpack.i.l.bf16 %v3110_v19  ;;  %v3112_v54 = vunpack.i.h.bf16 %v3110_v19 }
 0x36a   : > { %v2107_v40 = vsel %vm1136_vm7, %v2091_v42, %v3096_v18  ;;  %v2108_v5 = vsel %vm1136_vm7, %v2092_v58, %v3097_v35 }
 0x36b   : > { %v3105_v26 = vpop.permute.xlu0 %3104  ;;  %2344 = vmatmul.mubr.f32.gmra.mxu1 %v2189_v45  ;;  %v2123_v24 = vsel %vm1178_vm9, %v2107_v40, %v3101_v56  ;;  %v2124_v2 = vsel %vm1178_vm9, %v2108_v5, %v3102_v27 }
 0x36c   : > { %v3107_v20 = vunpack.i.h.bf16 %v3105_v26  ;;  %v3106_v32 = vunpack.i.l.bf16 %v3105_v26  ;;  %v3120_v21 = vpop.permute.xlu1 %3119  ;;  %2833 = vmatprep.mubr.msk.f32.mxu1 %vm1094_vm5, %v4851_v48 }
 0x36d   : > { %v3121_v9 = vunpack.i.l.bf16 %v3120_v21  ;;  %v3122_v1 = vunpack.i.h.bf16 %v3120_v21 }
 0x36e   : > { %v2139_v8 = vsel %vm1220_vm11, %v2123_v24, %v3106_v32  ;;  %v2140_v33 = vsel %vm1220_vm11, %v2124_v2, %v3107_v20 }
 0x36f   : > { %v3115_v22 = vpop.permute.xlu0 %3114  ;;  %v2156_v25 = vsel %vm2148_vm14, %v2139_v8, %v3111_v50  ;;  %v2157_v48 = vsel %vm2148_vm14, %v2140_v33, %v3112_v54 }
 0x370   : > { %v3117_v60 = vunpack.i.h.bf16 %v3115_v22  ;;  %v3116_v11 = vunpack.i.l.bf16 %v3115_v22  ;;  %v3130_v31 = vpop.permute.xlu1 %3129 }
 0x371   : > { %v3131_v34 = vunpack.i.l.bf16 %v3130_v31  ;;  %v3132_v56 = vunpack.i.h.bf16 %v3130_v31 }
 0x372   : > { %v2173_v62 = vsel %vm2165_vm15, %v2156_v25, %v3116_v11  ;;  %v2174_v41 = vsel %vm2165_vm15, %v2157_v48, %v3117_v60 }
 0x373   : > { %v3125_v52 = vpop.permute.xlu0 %3124  ;;  %v2190_v16 = vsel %vm2182_vm0, %v2173_v62, %v3121_v9  ;;  %v2191_v18 = vsel %vm2182_vm0, %v2174_v41, %v3122_v1 }
 0x374   : > { %v3126_v14 = vunpack.i.l.bf16 %v3125_v52  ;;  %v3140_v3 = vpop.permute.xlu1 %3139  ;;  %2349 = vmatmul.mubr.f32.gmra.mxu1 %v2190_v16  ;;  %v3127_v49 = vunpack.i.h.bf16 %v3125_v52 }
 0x375   : > { %2834 = vmatprep.mubr.msk.f32.mxu1 %vm1094_vm5, %v4856_v59  ;;  %v3141_v0 = vunpack.i.l.bf16 %v3140_v3  ;;  %v3142_v5 = vunpack.i.h.bf16 %v3140_v3 }
 0x376   : > { %v2093_v43 = vsel %vm1094_vm5, %v4642_v63, %v3126_v14  ;;  %v2094_v59 = vsel %vm1094_vm5, %v4661_v12, %v3127_v49 }
 0x377   : > { %v3135_v35 = vpop.permute.xlu0 %3134  ;;  %v2109_v40 = vsel %vm1136_vm7, %v2093_v43, %v3131_v34  ;;  %v2110_v20 = vsel %vm1136_vm7, %v2094_v59, %v3132_v56 }
 0x378   : > { %v3136_v19 = vunpack.i.l.bf16 %v3135_v35  ;;  %v3150_v42 = vpop.permute.xlu1 %3149  ;;  %2354 = vmatmul.mubr.f32.gmra.mxu1 %v2191_v18  ;;  %v3137_v45 = vunpack.i.h.bf16 %v3135_v35 }
 0x379   : > { %2835 = vmatprep.mubr.msk.f32.mxu1 %vm1094_vm5, %v4962_v28  ;;  %v3151_v21 = vunpack.i.l.bf16 %v3150_v42  ;;  %v3152_v9 = vunpack.i.h.bf16 %v3150_v42 }
 0x37a   : > { %v2125_v58 = vsel %vm1178_vm9, %v2109_v40, %v3136_v19  ;;  %v2126_v50 = vsel %vm1178_vm9, %v2110_v20, %v3137_v45 }
 0x37b   : > { %v3145_v63 = vpop.permute.xlu0 %3144  ;;  %v2141_v32 = vsel %vm1220_vm11, %v2125_v58, %v3141_v0  ;;  %v2142_v2 = vsel %vm1220_vm11, %v2126_v50, %v3142_v5 }
 0x37c   : > { %v3146_v27 = vunpack.i.l.bf16 %v3145_v63  ;;  %v3160_v26 = vpop.permute.xlu1 %3159  ;;  %v3147_v24 = vunpack.i.h.bf16 %v3145_v63 }
 0x37d   : > { %v3162_v16 = vunpack.i.h.bf16 %v3160_v26  ;;  %v3161_v14 = vunpack.i.l.bf16 %v3160_v26 }
 0x37e   : > { %v2158_v28 = vsel %vm2148_vm14, %v2141_v32, %v3146_v27  ;;  %v2159_v11 = vsel %vm2148_vm14, %v2142_v2, %v3147_v24 }
 0x37f   : > { %v3155_v8 = vpop.permute.xlu0 %3154  ;;  %v2175_v22 = vsel %vm2165_vm15, %v2158_v28, %v3151_v21  ;;  %v2176_v62 = vsel %vm2165_vm15, %v2159_v11, %v3152_v9  ;;  %v2095_v43 = vsel %vm1094_vm5, %v4674_v39, %v3162_v16 }
 0x380   : > { %v3156_v54 = vunpack.i.l.bf16 %v3155_v8  ;;  %v3170_v12 = vpop.permute.xlu1 %3169  ;;  %v3157_v33 = vunpack.i.h.bf16 %v3155_v8 }
 0x381   : > { %v3172_v35 = vunpack.i.h.bf16 %v3170_v12  ;;  %v3171_v18 = vunpack.i.l.bf16 %v3170_v12 }
 0x382   : > { %v2192_v60 = vsel %vm2182_vm0, %v2175_v22, %v3156_v54  ;;  %v2193_v48 = vsel %vm2182_vm0, %v2176_v62, %v3157_v33 }
 0x383   : > { %2359 = vmatmul.mubr.f32.gmra.mxu1 %v2192_v60  ;;  %v3165_v31 = vpop.permute.xlu0 %3164 }
 0x384   : > { %v3180_v25 = vpop.permute.xlu1 %3179  ;;  %2836 = vmatprep.mubr.msk.f32.mxu1 %vm1094_vm5, %v4995_v4  ;;  %v3167_v3 = vunpack.i.h.bf16 %v3165_v31  ;;  %v3166_v41 = vunpack.i.l.bf16 %v3165_v31  ;;  %v2084_v4 = vsel %vm1094_vm5, %v4803_v44, %v3161_v14 }
 0x385   : > { %v3182_v26 = vunpack.i.h.bf16 %v3180_v25  ;;  %v3181_v44 = vunpack.i.l.bf16 %v3180_v25 }
 0x386   : > { %v2100_v19 = vsel %vm1136_vm7, %v2084_v4, %v3166_v41  ;;  %v2111_v42 = vsel %vm1136_vm7, %v2095_v43, %v3167_v3 }
 0x387   : > { %2364 = vmatmul.mubr.f32.gmra.mxu1 %v2193_v48  ;;  %v3175_v1 = vpop.permute.xlu0 %3174  ;;  %v2116_v27 = vsel %vm1178_vm9, %v2100_v19, %v3171_v18  ;;  %v2127_v39 = vsel %vm1178_vm9, %v2111_v42, %v3172_v35  ;;  %v2096_v60 = vsel %vm1094_vm5, %v4718_v47, %v3182_v26  ;;  %v2085_v11 = vsel %vm1094_vm5, %v4805_v13, %v3181_v44 }
 0x388   : > { %v3190_v52 = vpop.permute.xlu1 %3189  ;;  %2837 = vmatprep.mubr.msk.f32.mxu1 %vm1094_vm5, %v5021_v6  ;;  %v3177_v56 = vunpack.i.h.bf16 %v3175_v1  ;;  %v3176_v6 = vunpack.i.l.bf16 %v3175_v1 }
 0x389   : > { %v3192_v2 = vunpack.i.h.bf16 %v3190_v52  ;;  %v3191_v9 = vunpack.i.l.bf16 %v3190_v52 }
 0x38a   : > { %v2132_v5 = vsel %vm1220_vm11, %v2116_v27, %v3176_v6  ;;  %v2143_v20 = vsel %vm1220_vm11, %v2127_v39, %v3177_v56 }
 0x38b   : > { %v3185_v34 = vpop.permute.xlu0 %3184  ;;  %v2101_v47 = vsel %vm1136_vm7, %v2085_v11, %v3191_v9  ;;  %v2112_v13 = vsel %vm1136_vm7, %v2096_v60, %v3192_v2 }
 0x38c   : > { %v3200_v49 = vpop.permute.xlu1 %3199  ;;  %v3187_v40 = vunpack.i.h.bf16 %v3185_v34  ;;  %v3186_v59 = vunpack.i.l.bf16 %v3185_v34 }
 0x38d   : > { %v3202_v31 = vunpack.i.h.bf16 %v3200_v49  ;;  %v3201_v25 = vunpack.i.l.bf16 %v3200_v49 }
 0x38e   : > { %v2149_v28 = vsel %vm2148_vm14, %v2132_v5, %v3186_v59  ;;  %v2160_v8 = vsel %vm2148_vm14, %v2143_v20, %v3187_v40 }
 0x38f   : > { %v3195_v0 = vpop.permute.xlu0 %3194  ;;  %v2117_v34 = vsel %vm1178_vm9, %v2101_v47, %v3201_v25  ;;  %v2128_v49 = vsel %vm1178_vm9, %v2112_v13, %v3202_v31 }
 0x390   : > { %v3210_v45 = vpop.permute.xlu1 %3209  ;;  %v3197_v58 = vunpack.i.h.bf16 %v3195_v0  ;;  %v3196_v63 = vunpack.i.l.bf16 %v3195_v0 }
 0x391   : > { %v3212_v48 = vunpack.i.h.bf16 %v3210_v45  ;;  %v3211_v1 = vunpack.i.l.bf16 %v3210_v45 }
 0x392   : > { %v2166_v54 = vsel %vm2165_vm15, %v2149_v28, %v3196_v63  ;;  %v2177_v12 = vsel %vm2165_vm15, %v2160_v8, %v3197_v58 }
 0x393   : > { %v3205_v32 = vpop.permute.xlu0 %3204  ;;  %v2133_v4 = vsel %vm1220_vm11, %v2117_v34, %v3211_v1 }
 0x394   : > { %v3207_v21 = vunpack.i.h.bf16 %v3205_v32  ;;  %v3206_v50 = vunpack.i.l.bf16 %v3205_v32  ;;  %v3220_v24 = vpop.permute.xlu1 %3219 }
 0x395   : > { %v3222_v52 = vunpack.i.h.bf16 %v3220_v24  ;;  %v3221_v14 = vunpack.i.l.bf16 %v3220_v24 }
 0x396   : > { %v2183_v22 = vsel %vm2182_vm0, %v2166_v54, %v3206_v50  ;;  %v2194_v33 = vsel %vm2182_vm0, %v2177_v12, %v3207_v21 }
 0x397   : > { %v3215_v62 = vpop.permute.xlu0 %3214  ;;  %2314 = vmatmul.mubr.f32.vlgmr.msra.gmra.mxu0 %v2183_v22  ;;  %2369 = vmatmul.mubr.f32.gmra.mxu1 %v2194_v33  ;;  %v2150_v19 = vsel %vm2148_vm14, %v2133_v4, %v3221_v14 }
 0x398   : > { %v3230_v16 = vpop.permute.xlu1 %3229  ;;  %2827 = vmatprep.mubr.msk.f32.mxu0 %vm1094_vm5, %v4671_v36  ;;  %2838 = vmatprep.mubr.msk.f32.mxu1 %vm1094_vm5, %v5032_v37  ;;  %v2144_v36 = vsel %vm1220_vm11, %v2128_v49, %v3212_v48  ;;  %v3217_v39 = vunpack.i.h.bf16 %v3215_v62  ;;  %v3216_v26 = vunpack.i.l.bf16 %v3215_v62 }
 0x399   : > { %v3232_v3 = vunpack.i.h.bf16 %v3230_v16  ;;  %v3231_v41 = vunpack.i.l.bf16 %v3230_v16  ;;  %v2161_v42 = vsel %vm2148_vm14, %v2144_v36, %v3222_v52 }
 0x39a   : > { %v2097_v8 = vsel %vm1094_vm5, %v4720_v38, %v3217_v39 }
 0x39b   : > { %v3225_v43 = vpop.permute.xlu0 %3224  ;;  %v2167_v56 = vsel %vm2165_vm15, %v2150_v19, %v3231_v41  ;;  %v2178_v6 = vsel %vm2165_vm15, %v2161_v42, %v3232_v3 }
 0x39c   : > { %v3240_v35 = vpop.permute.xlu1 %3239  ;;  %v3227_v5 = vunpack.i.h.bf16 %v3225_v43  ;;  %v3226_v20 = vunpack.i.l.bf16 %v3225_v43 }
 0x39d   : > { %v3242_v18 = vunpack.i.h.bf16 %v3240_v35  ;;  %v3241_v37 = vunpack.i.l.bf16 %v3240_v35 }
 0x39e   : > { %v2113_v9 = vsel %vm1136_vm7, %v2097_v8, %v3227_v5 }
 0x39f   : > { %v3235_v0 = vpop.permute.xlu0 %3234  ;;  %v2184_v40 = vsel %vm2182_vm0, %v2167_v56, %v3241_v37  ;;  %v2195_v59 = vsel %vm2182_vm0, %v2178_v6, %v3242_v18 }
 0x3a0   : > { %v3250_v45 = vpop.permute.xlu1 %3249  ;;  %2319 = vmatmul.mubr.f32.gmra.mxu0 %v2184_v40  ;;  %2374 = vmatmul.mubr.f32.gmra.mxu1 %v2195_v59  ;;  %v3237_v32 = vunpack.i.h.bf16 %v3235_v0  ;;  %v3236_v21 = vunpack.i.l.bf16 %v3235_v0 }
 0x3a1   : > { %2828 = vmatprep.mubr.msk.f32.mxu0 %vm1094_vm5, %v4682_v53  ;;  %2839 = vmatprep.mubr.msk.f32.mxu1 %vm1094_vm5, %v5058_v15  ;;  %v2086_v53 = vsel %vm1094_vm5, %v4890_v61, %v3216_v26  ;;  %v3252_v31 = vunpack.i.h.bf16 %v3250_v45  ;;  %v3251_v25 = vunpack.i.l.bf16 %v3250_v45 }
 0x3a2   : > { %v2102_v2 = vsel %vm1136_vm7, %v2086_v53, %v3226_v20  ;;  %v2129_v11 = vsel %vm1178_vm9, %v2113_v9, %v3237_v32 }
 0x3a3   : > { %v3245_v58 = vpop.permute.xlu0 %3244  ;;  %v2118_v60 = vsel %vm1178_vm9, %v2102_v2, %v3236_v21  ;;  %v2098_v43 = vsel %vm1094_vm5, %v4816_v46, %v3252_v31  ;;  %v2087_v4 = vsel %vm1094_vm5, %v4895_v30, %v3251_v25  ;;  %v2082_v46 = vrot.slane %v5052_v29, 2 }
 0x3a4   : > { %v3260_v63 = vpop.permute.xlu1 %3259  ;;  %v3247_v50 = vunpack.i.h.bf16 %v3245_v58  ;;  %v3246_v24 = vunpack.i.l.bf16 %v3245_v58 }
 0x3a5   : > { %v3262_v3 = vunpack.i.h.bf16 %v3260_v63  ;;  %v3261_v41 = vunpack.i.l.bf16 %v3260_v63  ;;  %v2083_v32 = vsel %vm576_vm3, %v2080_v51, %v2082_v46 }
 0x3a6   : > { %v2134_v38 = vsel %vm1220_vm11, %v2118_v60, %v3246_v24  ;;  %v2145_v62 = vsel %vm1220_vm11, %v2129_v11, %v3247_v50 }
 0x3a7   : > { %v3255_v27 = vpop.permute.xlu0 %3254  ;;  %v2103_v30 = vsel %vm1136_vm7, %v2087_v4, %v3261_v41  ;;  %v2114_v0 = vsel %vm1136_vm7, %v2098_v43, %v3262_v3 }
 0x3a8   : > { %v3270_v44 = vpop.permute.xlu1 %3269  ;;  %v3257_v15 = vunpack.i.h.bf16 %v3255_v27  ;;  %v3256_v54 = vunpack.i.l.bf16 %v3255_v27 }
 0x3a9   : > { %v3272_v36 = vunpack.i.h.bf16 %v3270_v44  ;;  %v3271_v35 = vunpack.i.l.bf16 %v3270_v44 }
 0x3aa   : > { %v2151_v52 = vsel %vm2148_vm14, %v2134_v38, %v3256_v54  ;;  %v2162_v14 = vsel %vm2148_vm14, %v2145_v62, %v3257_v15 }
 0x3ab   : > { %v3265_v28 = vpop.permute.xlu0 %3264  ;;  %v2119_v45 = vsel %vm1178_vm9, %v2103_v30, %v3271_v35  ;;  %v2130_v58 = vsel %vm1178_vm9, %v2114_v0, %v3272_v36 }
 0x3ac   : > { %v3280_v12 = vpop.permute.xlu1 %3279  ;;  %v3267_v22 = vunpack.i.h.bf16 %v3265_v28  ;;  %v3266_v33 = vunpack.i.l.bf16 %v3265_v28 }
 0x3ad   : > { %v3282_v37 = vunpack.i.h.bf16 %v3280_v12  ;;  %v3281_v19 = vunpack.i.l.bf16 %v3280_v12 }
 0x3ae   : > { %v2168_v47 = vsel %vm2165_vm15, %v2151_v52, %v3266_v33  ;;  %v2179_v13 = vsel %vm2165_vm15, %v2162_v14, %v3267_v22 }
 0x3af   : > { %v3275_v61 = vpop.permute.xlu0 %3274  ;;  %v2146_v27 = vsel %vm1220_vm11, %v2130_v58, %v3282_v37 }
 0x3b0   : > { %v3277_v48 = vunpack.i.h.bf16 %v3275_v61  ;;  %v3276_v1 = vunpack.i.l.bf16 %v3275_v61  ;;  %v3290_v16 = vpop.permute.xlu1 %3289 }
 0x3b1   : > { %v3292_v56 = vunpack.i.h.bf16 %v3290_v16  ;;  %v3291_v6 = vunpack.i.l.bf16 %v3290_v16 }
 0x3b2   : > { %v2185_v34 = vsel %vm2182_vm0, %v2168_v47, %v3276_v1  ;;  %v2196_v49 = vsel %vm2182_vm0, %v2179_v13, %v3277_v48 }
 0x3b3   : > { %v3285_v18 = vpop.permute.xlu0 %3284  ;;  %2324 = vmatmul.mubr.f32.gmra.mxu0 %v2185_v34  ;;  %2379 = vmatmul.mubr.f32.gmra.mxu1 %v2196_v49  ;;  %v2163_v44 = vsel %vm2148_vm14, %v2146_v27, %v3292_v56 }
 0x3b4   : > { %v3300_v42 = vpop.permute.xlu1 %3299  ;;  %2829 = vmatprep.mubr.msk.f32.mxu0 %vm1094_vm5, %v4687_v57  ;;  %2840 = vmatprep.mubr.msk.f32.mxu1 %vm1094_vm5, %v5045_v17  ;;  %v2135_v57 = vsel %vm1220_vm11, %v2119_v45, %v3281_v19  ;;  %v3287_v21 = vunpack.i.h.bf16 %v3285_v18  ;;  %v3286_v50 = vunpack.i.l.bf16 %v3285_v18 }
 0x3b5   : > { %v3302_v40 = vunpack.i.h.bf16 %v3300_v42  ;;  %v3301_v59 = vunpack.i.l.bf16 %v3300_v42  ;;  %v2152_v29 = vsel %vm2148_vm14, %v2135_v57, %v3291_v6 }
 0x3b6   : > { %v2099_v10 = vsel %vm1094_vm5, %v4826_v55, %v3287_v21  ;;  %v2088_v51 = vsel %vm1094_vm5, %v4910_v7, %v3286_v50 }
 0x3b7   : > { %v3295_v63 = vpop.permute.xlu0 %3294  ;;  %v2169_v5 = vsel %vm2165_vm15, %v2152_v29, %v3301_v59  ;;  %v2180_v20 = vsel %vm2165_vm15, %v2163_v44, %v3302_v40 }
 0x3b8   : > { %v3310_v17 = vpop.permute.xlu1 %3309  ;;  %v3297_v53 = vunpack.i.h.bf16 %v3295_v63  ;;  %v3296_v15 = vunpack.i.l.bf16 %v3295_v63 }
 0x3b9   : > { %v3312_v39 = vunpack.i.h.bf16 %v3310_v17  ;;  %v3311_v26 = vunpack.i.l.bf16 %v3310_v17 }
 0x3ba   : > { %v2104_v22 = vsel %vm1136_vm7, %v2088_v51, %v3296_v15  ;;  %v2115_v33 = vsel %vm1136_vm7, %v2099_v10, %v3297_v53 }
 0x3bb   : > { %v3305_v24 = vpop.permute.xlu0 %3304  ;;  %v2186_v28 = vsel %vm2182_vm0, %v2169_v5, %v3311_v26  ;;  %v2197_v8 = vsel %vm2182_vm0, %v2180_v20, %v3312_v39 }
 0x3bc   : > { %2329 = vmatmul.mubr.f32.gmra.mxu0 %v2186_v28  ;;  %2384 = vmatmul.mubr.f32.gmra.mxu1 %v2197_v8  ;;  %v3320_v54 = vpop.permute.xlu1 %3319  ;;  %v3307_v12 = vunpack.i.h.bf16 %v3305_v24  ;;  %v3306_v2 = vunpack.i.l.bf16 %v3305_v24 }
 0x3bd   : > { %2830 = vmatprep.mubr.msk.f32.mxu0 %vm1094_vm5, %v4693_v23  ;;  %2841 = vmatprep.mubr.msk.f32.mxu1 %vm1094_vm5, %v2083_v32  ;;  %v3322_v38 = vunpack.i.h.bf16 %v3320_v54  ;;  %v3321_v62 = vunpack.i.l.bf16 %v3320_v54 }
 0x3be   : > { %v2120_v25 = vsel %vm1178_vm9, %v2104_v22, %v3306_v2  ;;  %v2131_v23 = vsel %vm1178_vm9, %v2115_v33, %v3307_v12 }
 0x3bf   : > { %v3315_v9 = vpop.permute.xlu0 %3314 }
 0x3c0   : > { %v3317_v60 = vunpack.i.h.bf16 %v3315_v9  ;;  %v3316_v11 = vunpack.i.l.bf16 %v3315_v9  ;;  %v3330_v31 = vpop.permute.xlu1 %3329 }
 0x3c1   : > { %v3332_v7 = vunpack.i.h.bf16 %v3330_v31  ;;  %v3331_v1 = vunpack.i.l.bf16 %v3330_v31 }
 0x3c2   : > { %v2136_v61 = vsel %vm1220_vm11, %v2120_v25, %v3316_v11  ;;  %v2147_v55 = vsel %vm1220_vm11, %v2131_v23, %v3317_v60 }
 0x3c3   : > { %v3325_v48 = vpop.permute.xlu0 %3324  ;;  %v2153_v14 = vsel %vm2148_vm14, %v2136_v61, %v3321_v62  ;;  %v2164_v47 = vsel %vm2148_vm14, %v2147_v55, %v3322_v38 }
 0x3c4   : > { %v3327_v16 = vunpack.i.h.bf16 %v3325_v48  ;;  %v3326_v52 = vunpack.i.l.bf16 %v3325_v48 }
 0x3c6   : > { %v2170_v13 = vsel %vm2165_vm15, %v2153_v14, %v3326_v52  ;;  %v2181_v3 = vsel %vm2165_vm15, %v2164_v47, %v3327_v16 }
 0x3c7   : > { %v2187_v41 = vsel %vm2182_vm0, %v2170_v13, %v3331_v1  ;;  %v2198_v34 = vsel %vm2182_vm0, %v2181_v3, %v3332_v7 }
 0x3c8   : > { %2334 = vmatmul.mubr.f32.gmra.mxu0 %v2187_v41  ;;  %2389 = vmatmul.mubr.f32.gmra.mxu1 %v2198_v34 }
 0x427   : > { %v5233_v49 = vpop.f32.mrf.mxu1 }
 0x428   : > { %v2409_v58 = vsel %vm1094_vm5, %v5233_v49, 0.0 }
 0x429   : > { %v2342_v43 = vpop.f32.mrf.mxu1 }
 0x42b   : > { %v5235_v4 = vpop.f32.mrf.mxu1 }
 0x42c   : > { %v2412_v26 = vsel %vm1094_vm5, %v5235_v4, 0.0 }
 0x42d   : > { %v2347_v36 = vpop.f32.mrf.mxu1 }
 0x434   : > { %v5237_v35 = vpop.f32.mrf.mxu1 }
 0x435   : > { %v2415_v50 = vsel %vm1094_vm5, %v5237_v35, 0.0 }
 0x436   : > { %v2352_v18 = vpop.f32.mrf.mxu1 }
 0x438   : > { %v5239_v37 = vpop.f32.mrf.mxu1 }
 0x439   : > { %v2418_v29 = vsel %vm1094_vm5, %v5239_v37, 0.0 }
 0x43a   : > { %v2357_v19 = vpop.f32.mrf.mxu1 }
 0x443   : > { %v5241_v42 = vpop.f32.mrf.mxu1 }
 0x444   : > { %v2421_v54 = vsel %vm1094_vm5, %v5241_v42, 0.0 }
 0x445   : > { %v2362_v56 = vpop.f32.mrf.mxu1 }
 0x447   : > { %v5243_v6 = vpop.f32.mrf.mxu1 }
 0x448   : > { %v2424_v11 = vsel %vm1094_vm5, %v5243_v6, 0.0 }
 0x449   : > { %v2367_v46 = vpop.f32.mrf.mxu1 }
 0x457   : > { %v2315_v30 = vpop.f32.mrf.mxu0  ;;  %v5245_v0 = vpop.f32.mrf.mxu1 }
 0x458   : > { %v2394_v40 = vsel %vm1094_vm5, %v2315_v30, 0.0  ;;  %v2427_v12 = vsel %vm1094_vm5, %v5245_v0, 0.0 }
 0x459   : > { %v2372_v59 = vpop.f32.mrf.mxu1  ;;  %2395 = vadd.xlane.f32.xlu0 %v2394_v40  ;;  %v2317_v45 = vpop.f32.mrf.mxu0 }
 0x45d   : > { %2410 = vadd.xlane.f32.xlu0 %v2409_v58 }
 0x460   : > { %v2320_v63 = vpop.f32.mrf.mxu0  ;;  %v5250_v57 = vpop.f32.mrf.mxu1 }
 0x461   : > { %v2397_v27 = vsel %vm1094_vm5, %v2320_v63, 0.0  ;;  %v2430_v31 = vsel %vm1094_vm5, %v5250_v57, 0.0 }
 0x462   : > { %v2377_v17 = vpop.f32.mrf.mxu1  ;;  %2398 = vadd.xlane.f32.xlu1 %v2397_v27  ;;  %v2322_v39 = vpop.f32.mrf.mxu0 }
 0x466   : > { %2413 = vadd.xlane.f32.xlu1 %v2412_v26 }
 0x46a   : > { %2419 = vadd.xlane.f32.xlu1 %v2418_v29 }
 0x473   : > { %v5257_v44 = vpop.f32.mrf.mxu0  ;;  %v5259_v5 = vpop.f32.mrf.mxu1 }
 0x474   : > { %v2400_v20 = vsel %vm1094_vm5, %v5257_v44, 0.0  ;;  %v2433_v51 = vsel %vm1094_vm5, %v5259_v5, 0.0 }
 0x475   : > { %v2382_v32 = vpop.f32.mrf.mxu1  ;;  %2401 = vadd.xlane.f32.xlu0 %v2400_v20  ;;  %v2327_v21 = vpop.f32.mrf.mxu0 }
 0x479   : > { %2416 = vadd.xlane.f32.xlu0 %v2415_v50 }
 0x47c   : > { %v5265_v24 = vpop.f32.mrf.mxu0  ;;  %v5267_v28 = vpop.f32.mrf.mxu1 }
 0x47d   : > { %v2403_v8 = vsel %vm1094_vm5, %v5265_v24, 0.0  ;;  %v2436_v25 = vsel %vm1094_vm5, %v5267_v28, 0.0 }
 0x47e   : > { %v2387_v53 = vpop.f32.mrf.mxu1  ;;  %2404 = vadd.xlane.f32.xlu0 %v2403_v8  ;;  %v2332_v15 = vpop.f32.mrf.mxu0 }
 0x482   : > { %2422 = vadd.xlane.f32.xlu0 %v2421_v54 }
 0x486   : > { %2428 = vadd.xlane.f32.xlu0 %v2427_v12 }
 0x488   : > { %v5275_v2 = vpop.f32.mrf.mxu0  ;;  %v5277_v10 = vpop.f32.mrf.mxu1 }
 0x489   : > { %v2406_v9 = vsel %vm1094_vm5, %v5275_v2, 0.0  ;;  %v2439_v60 = vsel %vm1094_vm5, %v5277_v10, 0.0 }
 0x48a   : > { %v2392_v22 = vpop.f32.mrf.mxu1  ;;  %2434 = vadd.xlane.f32.xlu0 %v2433_v51  ;;  %2407 = vadd.xlane.f32.xlu1 %v2406_v9  ;;  %v2337_v33 = vpop.f32.mrf.mxu0 }
 0x48e   : > { %2440 = vadd.xlane.f32.xlu0 %v2439_v60  ;;  %2425 = vadd.xlane.f32.xlu1 %v2424_v11 }
 0x492   : > { %2431 = vadd.xlane.f32.xlu1 %v2430_v31 }
 0x496   : > { %2437 = vadd.xlane.f32.xlu1 %v2436_v25 }
 0x4e2   : > { %v2396_v23 = vpop.xlane.xlu0 %2395 }
 0x4e3   : > { %v2443_v38 = vmul.f32 0.0625, %v2396_v23 }
 0x4e5   : > { %v5291_v62 = vsub.f32 %v2315_v30, %v2443_v38 }
 0x4e6   : > { %v2411_v61 = vpop.xlane.xlu0 %2410 }
 0x4e7   : > { %v2448_v55 = vmul.f32 0.0625, %v2411_v61  ;;  %v2475_v48 = vmul.f32 %v5291_v62, %v5291_v62 }
 0x4e9   : > { %v5296_v7 = vsub.f32 %v5233_v49, %v2448_v55  ;;  %v2491_v1 = vsel %vm1094_vm5, %v2475_v48, 0.0 }
 0x4ea   : > { %2492 = vadd.xlane.f32.xlu1 %v2491_v1 }
 0x4eb   : > { %v2399_v16 = vpop.xlane.xlu1 %2398  ;;  %v2480_v52 = vmul.f32 %v5296_v7, %v5296_v7 }
 0x4ec   : > { %v2444_v14 = vmul.f32 0.0625, %v2399_v16 }
 0x4ed   : > { %v2506_v47 = vsel %vm1094_vm5, %v2480_v52, 0.0 }
 0x4ee   : > { %v5302_v13 = vsub.f32 %v2320_v63, %v2444_v14  ;;  %2507 = vadd.xlane.f32.xlu0 %v2506_v47 }
 0x4ef   : > { %v2414_v3 = vpop.xlane.xlu1 %2413 }
 0x4f0   : > { %v2449_v41 = vmul.f32 0.0625, %v2414_v3  ;;  %v2476_v34 = vmul.f32 %v5302_v13, %v5302_v13 }
 0x4f2   : > { %v5307_v49 = vsub.f32 %v5235_v4, %v2449_v41  ;;  %v2494_v43 = vsel %vm1094_vm5, %v2476_v34, 0.0 }
 0x4f3   : > { %2495 = vadd.xlane.f32.xlu0 %v2494_v43  ;;  %v2420_v19 = vpop.xlane.xlu1 %2419 }
 0x4f4   : > { %v2481_v36 = vmul.f32 %v5307_v49, %v5307_v49  ;;  %v2451_v56 = vmul.f32 0.0625, %v2420_v19 }
 0x4f6   : > { %v2509_v18 = vsel %vm1094_vm5, %v2481_v36, 0.0  ;;  %v5314_v40 = vsub.f32 %v5239_v37, %v2451_v56 }
 0x4f7   : > { %2510 = vadd.xlane.f32.xlu1 %v2509_v18 }
 0x4f8   : > { %v2483_v17 = vmul.f32 %v5314_v40, %v5314_v40 }
 0x4fe   : > { %v2402_v46 = vpop.xlane.xlu0 %2401 }
 0x4ff   : > { %v2445_v30 = vmul.f32 0.0625, %v2402_v46 }
 0x501   : > { %v5317_v59 = vsub.f32 %v5257_v44, %v2445_v30  ;;  %v2515_v44 = vsel %vm1094_vm5, %v2483_v17, 0.0 }
 0x502   : > { %v2417_v4 = vpop.xlane.xlu0 %2416 }
 0x503   : > { %v2450_v45 = vmul.f32 0.0625, %v2417_v4  ;;  %v2477_v58 = vmul.f32 %v5317_v59, %v5317_v59 }
 0x505   : > { %v5322_v63 = vsub.f32 %v5237_v35, %v2450_v45  ;;  %v2497_v27 = vsel %vm1094_vm5, %v2477_v58, 0.0 }
 0x506   : > { %2498 = vadd.xlane.f32.xlu1 %v2497_v27 }
 0x507   : > { %v2405_v39 = vpop.xlane.xlu0 %2404  ;;  %v2482_v37 = vmul.f32 %v5322_v63, %v5322_v63 }
 0x508   : > { %v2446_v26 = vmul.f32 0.0625, %v2405_v39 }
 0x509   : > { %v2512_v29 = vsel %vm1094_vm5, %v2482_v37, 0.0 }
 0x50a   : > { %v5332_v20 = vsub.f32 %v5265_v24, %v2446_v26  ;;  %2513 = vadd.xlane.f32.xlu0 %v2512_v29  ;;  %2516 = vadd.xlane.f32.xlu1 %v2515_v44  ;;  %v5388_v44 = vld [vmem:[%s5543_s4] ss:$0 sm:$0xff] }
 0x50b   : > { %v2423_v35 = vpop.xlane.xlu0 %2422 }
 0x50c   : > { %v2452_v32 = vmul.f32 0.0625, %v2423_v35  ;;  %v2478_v21 = vmul.f32 %v5332_v20, %v5332_v20 }
 0x50e   : > { %v5337_v50 = vsub.f32 %v5241_v42, %v2452_v32  ;;  %v2500_v8 = vsel %vm1094_vm5, %v2478_v21, 0.0  ;;  %v5394_v32 = vld [vmem:[%s5544_s5] ss:$0 sm:$0xff] }
 0x50f   : > { %2501 = vadd.xlane.f32.xlu0 %v2500_v8  ;;  %v2429_v53 = vpop.xlane.xlu0 %2428 }
 0x510   : > { %v2454_v15 = vmul.f32 0.0625, %v2429_v53  ;;  %v2484_v54 = vmul.f32 %v5337_v50, %v5337_v50 }
 0x512   : > { %v5343_v24 = vsub.f32 %v5245_v0, %v2454_v15  ;;  %v2518_v12 = vsel %vm1094_vm5, %v2484_v54, 0.0 }
 0x513   : > { %2519 = vadd.xlane.f32.xlu0 %v2518_v12  ;;  %v2435_v51 = vpop.xlane.xlu0 %2434  ;;  %v2408_v9 = vpop.xlane.xlu1 %2407 }
 0x514   : > { %v2456_v22 = vmul.f32 0.0625, %v2435_v51  ;;  %v2447_v33 = vmul.f32 0.0625, %v2408_v9  ;;  %v2486_v42 = vmul.f32 %v5343_v24, %v5343_v24 }
 0x516   : > { %v5349_v60 = vsub.f32 %v5259_v5, %v2456_v22  ;;  %v5352_v11 = vsub.f32 %v5275_v2, %v2447_v33  ;;  %v2524_v31 = vsel %vm1094_vm5, %v2486_v42, 0.0 }
 0x517   : > { %2525 = vadd.xlane.f32.xlu0 %v2524_v31  ;;  %v2441_v0 = vpop.xlane.xlu0 %2440  ;;  %v2426_v25 = vpop.xlane.xlu1 %2425 }
 0x518   : > { %v2458_v23 = vmul.f32 0.0625, %v2441_v0  ;;  %v2453_v38 = vmul.f32 0.0625, %v2426_v25  ;;  %v2488_v61 = vmul.f32 %v5349_v60, %v5349_v60  ;;  %v2479_v55 = vmul.f32 %v5352_v11, %v5352_v11 }
 0x51a   : > { %v5360_v48 = vsub.f32 %v5277_v10, %v2458_v23  ;;  %v5363_v5 = vsub.f32 %v5243_v6, %v2453_v38  ;;  %v2530_v2 = vsel %vm1094_vm5, %v2488_v61, 0.0  ;;  %v2503_v1 = vsel %vm1094_vm5, %v2479_v55, 0.0 }
 0x51b   : > { %2531 = vadd.xlane.f32.xlu0 %v2530_v2  ;;  %2504 = vadd.xlane.f32.xlu1 %v2503_v1  ;;  %v2432_v16 = vpop.xlane.xlu1 %2431 }
 0x51c   : > { %v2455_v52 = vmul.f32 0.0625, %v2432_v16  ;;  %v2490_v14 = vmul.f32 %v5360_v48, %v5360_v48  ;;  %v2485_v47 = vmul.f32 %v5363_v5, %v5363_v5 }
 0x51e   : > { %v5372_v10 = vsub.f32 %v5250_v57, %v2455_v52  ;;  %v2536_v6 = vsel %vm1094_vm5, %v2490_v14, 0.0  ;;  %v2521_v3 = vsel %vm1094_vm5, %v2485_v47, 0.0 }
 0x51f   : > { %2537 = vadd.xlane.f32.xlu0 %v2536_v6  ;;  %2522 = vadd.xlane.f32.xlu1 %v2521_v3  ;;  %v2438_v41 = vpop.xlane.xlu1 %2437 }
 0x520   : > { %v2457_v34 = vmul.f32 0.0625, %v2438_v41  ;;  %v2487_v43 = vmul.f32 %v5372_v10, %v5372_v10 }
 0x522   : > { %v5379_v36 = vsub.f32 %v5267_v28, %v2457_v34  ;;  %v2527_v18 = vsel %vm1094_vm5, %v2487_v43, 0.0 }
 0x523   : > { %2528 = vadd.xlane.f32.xlu1 %v2527_v18 }
 0x524   : > { %v2489_v57 = vmul.f32 %v5379_v36, %v5379_v36 }
 0x526   : > { %v2533_v19 = vsel %vm1094_vm5, %v2489_v57, 0.0 }
 0x527   : > { %2534 = vadd.xlane.f32.xlu1 %v2533_v19 }
 0x573   : > { %v2493_v56 = vpop.xlane.xlu1 %2492 }
 0x574   : > { %v2539_v46 = vmul.f32 0.0625, %v2493_v56 }
 0x576   : > { %v2555_v30 = vadd.f32 1e-05, %v2539_v46 }
 0x577   : > { %v2508_v4 = vpop.xlane.xlu0 %2507 }
 0x578   : > { %3333 = vrsqrt.f32 %v2555_v30  ;;  %v2544_v45 = vmul.f32 0.0625, %v2508_v4 }
 0x57a   : > { %v2560_v58 = vadd.f32 1e-05, %v2544_v45 }
 0x57c   : > { %3335 = vrsqrt.f32 %v2560_v58  ;;  %v2496_v27 = vpop.xlane.xlu0 %2495 }
 0x57d   : > { %v2540_v28 = vmul.f32 0.0625, %v2496_v27 }
 0x57f   : > { %v2556_v17 = vadd.f32 1e-05, %v2540_v28 }
 0x580   : > { %v2511_v39 = vpop.xlane.xlu1 %2510 }
 0x581   : > { %3337 = vrsqrt.f32 %v2556_v17  ;;  %v2545_v37 = vmul.f32 0.0625, %v2511_v39 }
 0x583   : > { %v2561_v26 = vadd.f32 1e-05, %v2545_v37 }
 0x585   : > { %v3334_v29 = vpop.eup %3333  ;;  %3339 = vrsqrt.f32 %v2561_v26 }
 0x586   : > { %v2587_v35 = vmul.f32 %v3334_v29, %v5291_v62 }
 0x588   : > { %v2610_v21 = vmul.f32 %v5388_v44, %v2587_v35 }
 0x589   : > { %v3336_v8 = vpop.eup %3335 }
 0x58a   : > { %v2633_v53 = vadd.f32 %v5394_v32, %v2610_v21  ;;  %v2592_v15 = vmul.f32 %v3336_v8, %v5296_v7 }
 0x58c   : > { %v2649_v54 = vmul.f32 0.01, %v2633_v53  ;;  %v2615_v12 = vmul.f32 %v5388_v44, %v2592_v15 }
 0x58e   : > { %v3338_v51 = vpop.eup %3337  ;;  %v2665_v9 = vmax.f32 %v2633_v53, %v2649_v54  ;;  %v2638_v62 = vadd.f32 %v5394_v32, %v2615_v12 }
 0x58f   : > { %v2588_v22 = vmul.f32 %v3338_v51, %v5302_v13  ;;  %v2499_v33 = vpop.xlane.xlu1 %2498 }
 0x590   : > { %2681 = vst.msk [vmem:[%s3592_s9] sm:$0xff] %vm1094_vm5, %v2665_v9  ;;  %v2654_v42 = vmul.f32 0.01, %v2638_v62  ;;  %v2541_v31 = vmul.f32 0.0625, %v2499_v33 }
 0x591   : > { %v2611_v0 = vmul.f32 %v5388_v44, %v2588_v22 }
 0x592   : > { %v3340_v25 = vpop.eup %3339  ;;  %v2670_v23 = vmax.f32 %v2638_v62, %v2654_v42  ;;  %v2557_v7 = vadd.f32 1e-05, %v2541_v31 }
 0x593   : > { %v2634_v38 = vadd.f32 %v5394_v32, %v2611_v0  ;;  %v2593_v61 = vmul.f32 %v3340_v25, %v5307_v49  ;;  %v2514_v55 = vpop.xlane.xlu0 %2513  ;;  %v2517_v2 = vpop.xlane.xlu1 %2516 }
 0x594   : > { %2686 = vst.msk [vmem:[%s3592_s9 + $0x28] sm:$0xff] %vm1094_vm5, %v2670_v23  ;;  %3341 = vrsqrt.f32 %v2557_v7  ;;  %v2546_v13 = vmul.f32 0.0625, %v2514_v55  ;;  %v2547_v1 = vmul.f32 0.0625, %v2517_v2 }
 0x595   : > { %v2650_v16 = vmul.f32 0.01, %v2634_v38  ;;  %v2616_v52 = vmul.f32 %v5388_v44, %v2593_v61 }
 0x596   : > { %v2562_v14 = vadd.f32 1e-05, %v2546_v13  ;;  %v2563_v47 = vadd.f32 1e-05, %v2547_v1 }
 0x597   : > { %v2666_v6 = vmax.f32 %v2634_v38, %v2650_v16  ;;  %v2639_v3 = vadd.f32 %v5394_v32, %v2616_v52 }
 0x598   : > { %3343 = vrsqrt.f32 %v2562_v14  ;;  %v2502_v41 = vpop.xlane.xlu0 %2501 }
 0x599   : > { %2682 = vst.msk [vmem:[%s3592_s9 + $0x8] sm:$0xff] %vm1094_vm5, %v2666_v6  ;;  %v2655_v49 = vmul.f32 0.01, %v2639_v3  ;;  %3345 = vrsqrt.f32 %v2563_v47  ;;  %v2542_v34 = vmul.f32 0.0625, %v2502_v41 }
 0x59b   : > { %v2671_v43 = vmax.f32 %v2639_v3, %v2655_v49  ;;  %v2558_v18 = vadd.f32 1e-05, %v2542_v34 }
 0x59c   : > { %v2520_v57 = vpop.xlane.xlu0 %2519 }
 0x59d   : > { %2687 = vst.msk [vmem:[%s3592_s9 + $0x30] sm:$0xff] %vm1094_vm5, %v2671_v43  ;;  %3347 = vrsqrt.f32 %v2558_v18  ;;  %v2548_v19 = vmul.f32 0.0625, %v2520_v57 }
 0x59f   : > { %v2564_v56 = vadd.f32 1e-05, %v2548_v19 }
 0x5a0   : > { %v2526_v46 = vpop.xlane.xlu0 %2525 }
 0x5a1   : > { %v3342_v30 = vpop.eup %3341  ;;  %3349 = vrsqrt.f32 %v2564_v56  ;;  %v2550_v4 = vmul.f32 0.0625, %v2526_v46 }
 0x5a2   : > { %v2589_v45 = vmul.f32 %v3342_v30, %v5317_v59 }
 0x5a3   : > { %v2566_v58 = vadd.f32 1e-05, %v2550_v4 }
 0x5a4   : > { %v2612_v27 = vmul.f32 %v5388_v44, %v2589_v45  ;;  %v2532_v28 = vpop.xlane.xlu0 %2531  ;;  %v2505_v17 = vpop.xlane.xlu1 %2504 }
 0x5a5   : > { %v3344_v39 = vpop.eup %3343  ;;  %3351 = vrsqrt.f32 %v2566_v58  ;;  %v2552_v37 = vmul.f32 0.0625, %v2532_v28  ;;  %v2543_v26 = vmul.f32 0.0625, %v2505_v17 }
 0x5a6   : > { %v3346_v29 = vpop.eup %3345  ;;  %v2635_v35 = vadd.f32 %v5394_v32, %v2612_v27  ;;  %v2594_v21 = vmul.f32 %v3344_v39, %v5322_v63 }
 0x5a7   : > { %v2595_v8 = vmul.f32 %v3346_v29, %v5314_v40  ;;  %v2568_v53 = vadd.f32 1e-05, %v2552_v37  ;;  %v2559_v15 = vadd.f32 1e-05, %v2543_v26 }
 0x5a8   : > { %v2651_v54 = vmul.f32 0.01, %v2635_v35  ;;  %v2617_v59 = vmul.f32 %v5388_v44, %v2594_v21  ;;  %v2538_v12 = vpop.xlane.xlu0 %2537  ;;  %v2523_v51 = vpop.xlane.xlu1 %2522 }
 0x5a9   : > { %v2618_v9 = vmul.f32 %v5388_v44, %v2595_v8  ;;  %3353 = vrsqrt.f32 %v2568_v53  ;;  %v2554_v62 = vmul.f32 0.0625, %v2538_v12  ;;  %v2549_v22 = vmul.f32 0.0625, %v2523_v51 }
 0x5aa   : > { %v3348_v33 = vpop.eup %3347  ;;  %v2667_v42 = vmax.f32 %v2635_v35, %v2651_v54  ;;  %v2640_v31 = vadd.f32 %v5394_v32, %v2617_v59  ;;  %3355 = vrsqrt.f32 %v2559_v15 }
 0x5ab   : > { %v2641_v40 = vadd.f32 %v5394_v32, %v2618_v9  ;;  %v2590_v63 = vmul.f32 %v3348_v33, %v5332_v20  ;;  %v2570_v0 = vadd.f32 1e-05, %v2554_v62  ;;  %v2565_v25 = vadd.f32 1e-05, %v2549_v22 }
 0x5ac   : > { %2683 = vst.msk [vmem:[%s3592_s9 + $0x10] sm:$0xff] %vm1094_vm5, %v2667_v42  ;;  %v2656_v23 = vmul.f32 0.01, %v2640_v31  ;;  %v2529_v7 = vpop.xlane.xlu1 %2528 }
 0x5ad   : > { %v2657_v38 = vmul.f32 0.01, %v2641_v40  ;;  %v2613_v61 = vmul.f32 %v5388_v44, %v2590_v63  ;;  %3357 = vrsqrt.f32 %v2570_v0  ;;  %v2551_v55 = vmul.f32 0.0625, %v2529_v7 }
 0x5ae   : > { %v3350_v2 = vpop.eup %3349  ;;  %v2672_v13 = vmax.f32 %v2640_v31, %v2656_v23  ;;  %3359 = vrsqrt.f32 %v2565_v25 }
 0x5af   : > { %v2673_v1 = vmax.f32 %v2641_v40, %v2657_v38  ;;  %v2636_v20 = vadd.f32 %v5394_v32, %v2613_v61  ;;  %v2596_v16 = vmul.f32 %v3350_v2, %v5337_v50  ;;  %v2567_v52 = vadd.f32 1e-05, %v2551_v55 }
 0x5b0   : > { %2688 = vst.msk [vmem:[%s3592_s9 + $0x38] sm:$0xff] %vm1094_vm5, %v2672_v13  ;;  %v2535_v14 = vpop.xlane.xlu1 %2534 }
 0x5b1   : > { %2689 = vst.msk [vmem:[%s3592_s9 + $0x40] sm:$0xff] %vm1094_vm5, %v2673_v1  ;;  %v2652_v47 = vmul.f32 0.01, %v2636_v20  ;;  %v2619_v6 = vmul.f32 %v5388_v44, %v2596_v16  ;;  %3361 = vrsqrt.f32 %v2567_v52  ;;  %v2553_v3 = vmul.f32 0.0625, %v2535_v14 }
 0x5b2   : > { %v3352_v41 = vpop.eup %3351 }
 0x5b3   : > { %v2668_v49 = vmax.f32 %v2636_v20, %v2652_v47  ;;  %v2642_v34 = vadd.f32 %v5394_v32, %v2619_v6  ;;  %v2598_v43 = vmul.f32 %v3352_v41, %v5343_v24  ;;  %v2569_v18 = vadd.f32 1e-05, %v2553_v3 }
 0x5b5   : > { %2684 = vst.msk [vmem:[%s3592_s9 + $0x18] sm:$0xff] %vm1094_vm5, %v2668_v49  ;;  %v2658_v50 = vmul.f32 0.01, %v2642_v34  ;;  %v2621_v57 = vmul.f32 %v5388_v44, %v2598_v43  ;;  %3363 = vrsqrt.f32 %v2569_v18 }
 0x5b6   : > { %v3354_v19 = vpop.eup %3353 }
 0x5b7   : > { %v3356_v56 = vpop.eup %3355  ;;  %v2674_v46 = vmax.f32 %v2642_v34, %v2658_v50  ;;  %v2644_v30 = vadd.f32 %v5394_v32, %v2621_v57  ;;  %v2600_v4 = vmul.f32 %v3354_v19, %v5349_v60 }
 0x5b8   : > { %v2591_v45 = vmul.f32 %v3356_v56, %v5352_v11 }
 0x5b9   : > { %2690 = vst.msk [vmem:[%s3592_s9 + $0x48] sm:$0xff] %vm1094_vm5, %v2674_v46  ;;  %v2660_v24 = vmul.f32 0.01, %v2644_v30  ;;  %v2623_v58 = vmul.f32 %v5388_v44, %v2600_v4 }
 0x5ba   : > { %v3358_v27 = vpop.eup %3357  ;;  %v2614_v28 = vmul.f32 %v5388_v44, %v2591_v45 }
 0x5bb   : > { %v3360_v17 = vpop.eup %3359  ;;  %v2676_v39 = vmax.f32 %v2644_v30, %v2660_v24  ;;  %v2646_v37 = vadd.f32 %v5394_v32, %v2623_v58  ;;  %v2602_v26 = vmul.f32 %v3358_v27, %v5360_v48 }
 0x5bc   : > { %v2637_v29 = vadd.f32 %v5394_v32, %v2614_v28  ;;  %v2597_v60 = vmul.f32 %v3360_v17, %v5363_v5 }
 0x5bd   : > { %2692 = vst.msk [vmem:[%s3592_s9 + $0x58] sm:$0xff] %vm1094_vm5, %v2676_v39  ;;  %v2662_v11 = vmul.f32 0.01, %v2646_v37  ;;  %v2625_v35 = vmul.f32 %v5388_v44, %v2602_v26 }
 0x5be   : > { %v3362_v21 = vpop.eup %3361  ;;  %v2653_v8 = vmul.f32 0.01, %v2637_v29  ;;  %v2620_v53 = vmul.f32 %v5388_v44, %v2597_v60 }
 0x5bf   : > { %v2678_v15 = vmax.f32 %v2646_v37, %v2662_v11  ;;  %v2648_v54 = vadd.f32 %v5394_v32, %v2625_v35  ;;  %v2599_v48 = vmul.f32 %v3362_v21, %v5372_v10 }
 0x5c0   : > { %v2669_v59 = vmax.f32 %v2637_v29, %v2653_v8  ;;  %v2643_v5 = vadd.f32 %v5394_v32, %v2620_v53 }
 0x5c1   : > { %2694 = vst.msk [vmem:[%s3592_s9 + $0x68] sm:$0xff] %vm1094_vm5, %v2678_v15  ;;  %v2664_v12 = vmul.f32 0.01, %v2648_v54  ;;  %v2622_v51 = vmul.f32 %v5388_v44, %v2599_v48 }
 0x5c2   : > { %v3364_v9 = vpop.eup %3363  ;;  %2685 = vst.msk [vmem:[%s3592_s9 + $0x20] sm:$0xff] %vm1094_vm5, %v2669_v59  ;;  %v2659_v62 = vmul.f32 0.01, %v2643_v5 }
 0x5c3   : > { %v2680_v22 = vmax.f32 %v2648_v54, %v2664_v12  ;;  %v2645_v10 = vadd.f32 %v5394_v32, %v2622_v51  ;;  %v2601_v33 = vmul.f32 %v3364_v9, %v5379_v36 }
 0x5c4   : > { %v2675_v42 = vmax.f32 %v2643_v5, %v2659_v62 }
 0x5c5   : > { %2696 = vst.msk [vmem:[%s3592_s9 + $0x78] sm:$0xff] %vm1094_vm5, %v2680_v22  ;;  %v2661_v31 = vmul.f32 0.01, %v2645_v10  ;;  %v2624_v40 = vmul.f32 %v5388_v44, %v2601_v33 }
 0x5c6   : > { %2691 = vst.msk [vmem:[%s3592_s9 + $0x50] sm:$0xff] %vm1094_vm5, %v2675_v42 }
 0x5c7   : > { %v2677_v63 = vmax.f32 %v2645_v10, %v2661_v31  ;;  %v2647_v0 = vadd.f32 %v5394_v32, %v2624_v40 }
 0x5c9   : > { %2693 = vst.msk [vmem:[%s3592_s9 + $0x60] sm:$0xff] %vm1094_vm5, %v2677_v63  ;;  %v2663_v36 = vmul.f32 0.01, %v2647_v0 }
 0x5cb   : > { %v2679_v25 = vmax.f32 %v2647_v0, %v2663_v36 }
 0x5cd   : > { %2695 = vst.msk [vmem:[%s3592_s9 + $0x70] sm:$0xff] %vm1094_vm5, %v2679_v25 }
 0x5ce   : > { %3378 = shalt.err (!%p3375_p9)
}
 0x5cf   : > { %s3379_s9 = scalar_lea.hbm %s5479_s12, 2048  ;;  %s3383_s16 = scalar_lea.hbm %s5545_s6, 8192 }
 0x5d0   : > { %p3380_p10 = scmp.ne.s32.totalorder %s5479_s12, %s3379_s9  ;;  %p3384_p13 = scmp.lt.s32.totalorder %s5479_s12, %s5545_s6 }
 0x5d1   : > { %p3385_p0 = scmp.lt.s32.totalorder %s3383_s16, %s3379_s9 }
 0x5d2   : > { %p3381_p11 = pnand %p3380_p10, %p3562_p3 }
 0x5d3   : > { %p3386_p1 = por %p3385_p0, %p3384_p13 }
 0x5d4   : > { %p3382_p12 = pneg %p3381_p11 }
 0x5d6   : > { %p3387_p2 = pnand %p3386_p1, %p3382_p12 }
 0x5d8   : > { %3390 = shalt.err (!%p3387_p2)
}
 0x5d9   : > { %s3475_s17 = smov 128   ;;  %s5570_s18 = smov 8  }
 0x5da   : > { %2966 = dma.vmem_to_hbm [thread:$0]  (%p3562_p3), %s5481_s25, 2048, %s5479_s12, %s5487_s30, %s3475_s17, %s3475_s17, %s5570_s18  }
 0x5db PF: > { %p2972_p4 = scmp.ge.s32.totalorder %s3457_s28, 2  ;;  %s2729_s29 = sand.u32 1, %s3429_s21  }
 0x5dc   : > { %s2730_s14 = scalar_lea.sflag [#allocation5], %s2729_s29 }
 0x5dd   : > { %p2969_p5 = pnand %p2972_p4, %p3571_p8 }
 0x5df   : > { %p2970_p6 = pneg %p2969_p5 }
 0x5e1   : > { %3424 = dma.done.wait (%p2970_p6), %s2730_s14, 2048  }
 0x5e2   : > { %3426 = vsyncadd (%p2970_p6), %s2730_s14, 4294965248  ;;  %s19_s28 = sadd.s32 1, %s3457_s28   ;;  %s5571_s21 = smov %s3433_s22 }
 0x5e3   : > { %p16_p7 = scmp.ge.s32.totalorder %s19_s28, 6   ;;  %s5572_s22 = smov %s3437_s23 }
 0x5e4   : > { %s5573_s23 = smov %s3580_s15  ;;  %s5574_s24 = smov %s3449_s26 }
 0x5e5   : > { %s5575_s25 = smov %s3453_s27  ;;  %s5576_s26 = smov %s5579_s7 }
 0x5e6   : > { %s5577_s27 = smov %s5583_s8  ;;  %18 = sbr.rel (!%p16_p7) target bundleno = 5 (0x5), region = 94 }
 0x5eb   :  { %2735 = vsyncpa [#allocation5], 1 }
 0x5ec   :  { %2737 = vsyncpa [#allocation5 + $0x1], 1 }

</bundles_post_ra>
